<compile_context>
chip_gen: v6e
topology: v6e:2x2x1
jax: 0.10.0
libtpu: 0.0.40
codegen_flags: <defaults>
</compile_context>

<pallas_src>
import numpy as np

import jax
import jax.numpy as jnp
from jax.experimental import pallas as pl
from jax.experimental.pallas import tpu as pltpu

# ----------------------------- configuration -------------------------------
B = 2                 # batch
H = W = 8             # input_resolution
C = 32                # dim
WS = 4                # window_size
SHIFT = 2             # shift_size (>0 -> SW-MSA mask path is exercised)
NH = 4                # num_heads
HD = C // NH          # head dim (8)
N = WS * WS           # tokens per window (16)
NW = (H // WS) * (W // WS)   # windows per image (4)
BW = B * NW           # total windows (8)
TOK = BW * N          # total tokens handled by the single kernel step (128)
L = H * W
MLP_RATIO = 4.0
HID = int(C * MLP_RATIO)     # 128
EPS = 1e-5
SCALE = HD ** (-0.5)
NEG = -1.0e9          # off-window block "mask"; exp underflows to exactly 0
WPAD = max(3 * C, HID)       # 128: lane width of the packed input-side weights
F32 = jnp.float32
BF16 = jnp.bfloat16


# ----------------------------- shared math ----------------------------------
def _layernorm(x, gamma, beta):
    mu = jnp.mean(x, axis=-1, keepdims=True)
    var = jnp.mean(jnp.square(x - mu), axis=-1, keepdims=True)
    return (x - mu) * jax.lax.rsqrt(var + EPS) * gamma + beta


def _gelu_tanh(x):
    # tanh-approx GELU: tanh sits on the EUP (its own VLIW slot), relieving the
    # VALU slot that dominates this kernel.  |diff vs exact erf GELU| << 2e-3.
    return 0.5 * x * (1.0 + jnp.tanh(0.7978845608028654 * (x + 0.044715 * x * x * x)))


def _gelu_exact(x):
    # exact GELU (PyTorch nn.GELU default) -- used only in the pure-JAX reference.
    return 0.5 * x * (1.0 + jax.lax.erf(x * 0.7071067811865476))


# ------------------------- fused Swin block kernel ---------------------------
def _swin_block_kernel(x_ref, bias_ref, w_in_ref, b_in_ref, w_out_ref, vecs_ref,
                       o_ref):
    x = x_ref[...]                                        # (TOK, C) pre-LN tokens

    g1, be1 = vecs_ref[0:1, :], vecs_ref[1:2, :]
    g2, be2 = vecs_ref[2:3, :], vecs_ref[3:4, :]
    bproj, b2 = vecs_ref[4:5, :], vecs_ref[5:6, :]

    # ---- LN1 + fused QKV over ALL windows of both images ---------------------
    xn = _layernorm(x, g1, be1)
    qkv = jnp.dot(xn, w_in_ref[0:C, :], preferred_element_type=F32) + b_in_ref[0:1, :]
    # qkv: (TOK, WPAD); lanes [0, 3C) hold q|k|v (scale folded into q), rest = 0 pad.

    # ---- block-diagonal window attention + per-head output projection --------
    acc = jnp.zeros((TOK, C), F32)
    for h in range(NH):                                   # NH=4, static unroll
        q = qkv[:, h * HD:(h + 1) * HD]                   # (TOK, HD)
        k = qkv[:, C + h * HD:C + (h + 1) * HD]
        v = qkv[:, 2 * C + h * HD:2 * C + (h + 1) * HD]
        s = jax.lax.dot_general(q, k, (((1,), (1,)), ((), ())),
                                preferred_element_type=F32)        # (TOK, TOK)
        s = s + bias_ref[h].astype(F32)      # rpb + shift mask (block-diag, -1e9 off)
        s = s - jnp.max(s, axis=-1, keepdims=True)        # 128-lane-dense reductions
        e = jnp.exp(s)
        p = e * pl.reciprocal(jnp.sum(e, axis=-1, keepdims=True), approx=False)
        o_h = jnp.dot(p, v, preferred_element_type=F32)   # (TOK, HD)
        # accumulate the output projection per head (sublane-aligned wproj rows,
        # no head-concat lane interleave)
        acc = acc + jnp.dot(o_h, w_out_ref[h * HD:(h + 1) * HD, :],
                            preferred_element_type=F32)   # (TOK, C)
    attn = acc + bproj

    # ---- residual 1 + LN2 + MLP (tanh GELU) + residual 2 ---------------------
    x1 = x + attn
    xn2 = _layernorm(x1, g2, be2)
    hmid = jnp.dot(xn2, w_in_ref[C:2 * C, :], preferred_element_type=F32) + b_in_ref[1:2, :]
    hmid = _gelu_tanh(hmid)                               # (TOK, HID)
    y = jnp.dot(hmid, w_out_ref[C:C + HID, :], preferred_element_type=F32) + b2
    o_ref[...] = (x1 + y).astype(o_ref.dtype)


def fused_swin_block_pallas(xw, bias_full, w_in, b_in, w_out, vecs):
    """xw: (TOK, C) pre-LN tokens in (rolled) window order. Returns same shape/order."""
    def full_spec(a):
        nd = a.ndim
        return pl.BlockSpec(a.shape, lambda i, _nd=nd: (0,) * _nd)

    return pl.pallas_call(
        _swin_block_kernel,
        out_shape=jax.ShapeDtypeStruct((TOK, C), xw.dtype),
        grid=(1,),                                        # one fat step, no serial grid
        in_specs=[full_spec(xw), full_spec(bias_full), full_spec(w_in),
                  full_spec(b_in), full_spec(w_out), full_spec(vecs)],
        out_specs=pl.BlockSpec((TOK, C), lambda i: (0, 0)),
        compiler_params=pltpu.CompilerParams(dimension_semantics=("arbitrary",)),
    )(xw, bias_full, w_in, b_in, w_out, vecs)


# ------------------------------- glue (JAX) ----------------------------------
def window_partition(x, ws):
    b, h, w, c = x.shape
    x = x.reshape(b, h // ws, ws, w // ws, ws, c)
    return jnp.transpose(x, (0, 1, 3, 2, 4, 5)).reshape(-1, ws, ws, c)


def window_reverse(windows, ws, h, w):
    b = windows.shape[0] // ((h * w) // (ws * ws))
    x = windows.reshape(b, h // ws, w // ws, ws, ws, -1)
    return jnp.transpose(x, (0, 1, 3, 2, 4, 5)).reshape(b, h, w, -1)


def relative_position_bias(table):
    coords = np.stack(np.meshgrid(np.arange(WS), np.arange(WS), indexing="ij"))
    cf = coords.reshape(2, -1)
    rel = (cf[:, :, None] - cf[:, None, :]).transpose(1, 2, 0).astype(np.int64)
    rel[:, :, 0] += WS - 1
    rel[:, :, 1] += WS - 1
    rel[:, :, 0] *= 2 * WS - 1
    rpi = rel.sum(-1)                                     # (N, N)
    bias = np.asarray(table)[rpi.reshape(-1)].reshape(N, N, NH)
    return jnp.asarray(np.transpose(bias, (2, 0, 1)))     # (NH, N, N)


def build_attn_mask():
    img_mask = np.zeros((1, H, W, 1), np.float32)
    slices = (slice(0, -WS), slice(-WS, -SHIFT), slice(-SHIFT, None))
    cnt = 0
    for hs in slices:
        for ws_ in slices:
            img_mask[:, hs, ws_, :] = cnt
            cnt += 1
    mw = img_mask.reshape(1, H // WS, WS, W // WS, WS, 1)
    mw = mw.transpose(0, 1, 3, 2, 4, 5).reshape(-1, N)
    am = mw[:, None, :] - mw[:, :, None]
    am = np.where(am != 0, -100.0, 0.0).astype(np.float32)
    return jnp.asarray(am)                                # (NW, N, N)


def prepare_kernel_operands(p, attn_mask, rpb):
    """One-time host-side folding / packing of all constant kernel operands."""
    # (NH, TOK, TOK) block-diagonal bias: rpb + shift mask on the diagonal window
    # blocks, NEG off-block.  bf16 halves the biggest DMA; masks are exact in bf16.
    rpb_np = np.asarray(rpb, np.float32)
    mask_np = np.asarray(attn_mask, np.float32)
    bias = np.full((NH, TOK, TOK), NEG, np.float32)
    for blk in range(BW):
        r0 = blk * N
        bias[:, r0:r0 + N, r0:r0 + N] = rpb_np + mask_np[blk % NW][None]
    bias_full = jnp.asarray(bias, BF16)

    # w_in = [ wqkv (Q cols pre-scaled, padded to WPAD lanes) ; w1 ]  -> (2C, WPAD)
    wqkv = np.asarray(p["wqkv"], np.float32).copy()
    bqkv = np.asarray(p["bqkv"], np.float32).copy()
    wqkv[:, :C] *= SCALE                                  # fold qk scale into Q
    bqkv[:C] *= SCALE
    w_in = np.zeros((2 * C, WPAD), np.float32)
    w_in[:C, :3 * C] = wqkv
    w_in[C:, :HID] = np.asarray(p["w1"], np.float32)
    b_in = np.zeros((2, WPAD), np.float32)
    b_in[0, :3 * C] = bqkv
    b_in[1, :HID] = np.asarray(p["b1"], np.float32)

    # w_out = [ wproj ; w2 ]  -> (C + HID, C): only sublane slices in-kernel.
    w_out = np.concatenate([np.asarray(p["wproj"], np.float32),
                            np.asarray(p["w2"], np.float32)], axis=0)

    # 6 tiny affine/bias vectors packed into one (6, C) array.
    vecs = np.stack([np.asarray(p[k], np.float32) for k in
                     ("gamma1", "beta1", "gamma2", "beta2", "bproj", "b2")], axis=0)

    return (bias_full, jnp.asarray(w_in), jnp.asarray(b_in),
            jnp.asarray(w_out), jnp.asarray(vecs))


def swin_block_forward(x, operands):
    """Pallas-backed SwinTransformerBlock.forward.  x: (B, L, C)."""
    # roll + window_partition = one token permutation.  Every per-token op (LN,
    # residual, MLP) commutes with it, so the whole block runs in window order
    # inside the fused kernel and is un-permuted once afterwards.
    xs = x.reshape(B, H, W, C)
    if SHIFT > 0:
        xs = jnp.roll(xs, shift=(-SHIFT, -SHIFT), axis=(1, 2))
    xw = window_partition(xs, WS).reshape(TOK, C)         # (128, C) pre-LN tokens

    out_w = fused_swin_block_pallas(xw, *operands)

    aw = out_w.reshape(BW, WS, WS, C)
    xs = window_reverse(aw, WS, H, W)
    if SHIFT > 0:
        xs = jnp.roll(xs, shift=(SHIFT, SHIFT), axis=(1, 2))
    return xs.reshape(B, L, C)


# --------------------------- pure-JAX reference ------------------------------
def swin_block_reference(x, p, attn_mask, rpb):
    shortcut = x
    xs = _layernorm(x, p["gamma1"], p["beta1"]).reshape(B, H, W, C)
    xs = jnp.roll(xs, shift=(-SHIFT, -SHIFT), axis=(1, 2))
    xw = window_partition(xs, WS).reshape(-1, N, C)
    qkv = xw @ p["wqkv"] + p["bqkv"]
    qkv = qkv.reshape(BW, N, 3, NH, HD).transpose(2, 0, 3, 1, 4)
    q, k, v = qkv[0] * SCALE, qkv[1], qkv[2]
    attn = jnp.einsum("bhnd,bhmd->bhnm", q, k)
    attn = attn + rpb[None]
    attn = attn.reshape(B, NW, NH, N, N) + attn_mask[None, :, None]
    attn = jax.nn.softmax(attn.reshape(BW, NH, N, N), axis=-1)
    o = jnp.einsum("bhnm,bhmd->bhnd", attn, v).transpose(0, 2, 1, 3).reshape(BW, N, C)
    o = o @ p["wproj"] + p["bproj"]
    xs = window_reverse(o.reshape(-1, WS, WS, C), WS, H, W)
    xs = jnp.roll(xs, shift=(SHIFT, SHIFT), axis=(1, 2))
    x1 = shortcut + xs.reshape(B, L, C)
    hid = _gelu_exact(_layernorm(x1, p["gamma2"], p["beta2"]) @ p["w1"] + p["b1"])
    return x1 + (hid @ p["w2"] + p["b2"])


# ----------------------------------- main ------------------------------------
if __name__ == "__main__":
    key = jax.random.PRNGKey(0)
    ks = jax.random.split(key, 13)
    x = jax.random.normal(ks[0], (B, L, C), F32)

    params = {
        "gamma1": 1.0 + 0.1 * jax.random.normal(ks[1], (C,), F32),
        "beta1": 0.1 * jax.random.normal(ks[2], (C,), F32),
        "wqkv": 0.05 * jax.random.normal(ks[3], (C, 3 * C), F32),
        "bqkv": 0.02 * jax.random.normal(ks[4], (3 * C,), F32),
        "wproj": 0.05 * jax.random.normal(ks[5], (C, C), F32),
        "bproj": 0.02 * jax.random.normal(ks[6], (C,), F32),
        "gamma2": 1.0 + 0.1 * jax.random.normal(ks[7], (C,), F32),
        "beta2": 0.1 * jax.random.normal(ks[8], (C,), F32),
        "w1": 0.05 * jax.random.normal(ks[9], (C, HID), F32),
        "b1": 0.02 * jax.random.normal(ks[10], (HID,), F32),
        "w2": 0.05 * jax.random.normal(ks[11], (HID, C), F32),
        "b2": 0.02 * jax.random.normal(ks[12], (C,), F32),
    }
    # trunc_normal_(std=0.02) analogue for the relative position bias table
    table = 0.02 * jax.random.truncated_normal(
        jax.random.PRNGKey(42), -2.0, 2.0, ((2 * WS - 1) ** 2, NH), F32)
    rpb = relative_position_bias(table)
    attn_mask = build_attn_mask()

    operands = prepare_kernel_operands(params, attn_mask, rpb)
    fwd = jax.jit(lambda xx: swin_block_forward(xx, operands))
    out = jax.block_until_ready(fwd(x))

    ref = swin_block_reference(x, params, attn_mask, rpb)
    assert out.shape == (B, L, C) and out.dtype == F32
    np.testing.assert_allclose(np.asarray(out), np.asarray(ref), atol=2e-3, rtol=2e-3)
    print("KERNEL_OK")
</pallas_src>

<mosaic_0001>
module attributes {stable_mosaic.version = 11 : i64} {
  func.func @_swin_block_kernel(%arg0: i32, %arg1: memref<128x32xf32, #tpu.memory_space<vmem>>, %arg2: memref<4x128x128xbf16, #tpu.memory_space<vmem>>, %arg3: memref<64x128xf32, #tpu.memory_space<vmem>>, %arg4: memref<2x128xf32, #tpu.memory_space<vmem>>, %arg5: memref<160x32xf32, #tpu.memory_space<vmem>>, %arg6: memref<6x32xf32, #tpu.memory_space<vmem>>, %arg7: memref<128x32xf32, #tpu.memory_space<vmem>>) attributes {dimension_semantics = [#tpu.dimension_semantics<arbitrary>], iteration_bounds = array<i64: 1>, scalar_prefetch = 0 : i64, scratch_operands = 0 : i64, tpu.core_type = #tpu.core_type<tc>, window_params = [{pipeline_mode = #tpu.pipeline_mode<synchronous>, transform_indices = @transform_0, window_bounds = array<i64: 128, 32>}, {pipeline_mode = #tpu.pipeline_mode<synchronous>, transform_indices = @transform_1, window_bounds = array<i64: 4, 128, 128>}, {pipeline_mode = #tpu.pipeline_mode<synchronous>, transform_indices = @transform_2, window_bounds = array<i64: 64, 128>}, {pipeline_mode = #tpu.pipeline_mode<synchronous>, transform_indices = @transform_3, window_bounds = array<i64: 2, 128>}, {pipeline_mode = #tpu.pipeline_mode<synchronous>, transform_indices = @transform_4, window_bounds = array<i64: 160, 32>}, {pipeline_mode = #tpu.pipeline_mode<synchronous>, transform_indices = @transform_5, window_bounds = array<i64: 6, 32>}, {pipeline_mode = #tpu.pipeline_mode<synchronous>, transform_indices = @transform_6, window_bounds = array<i64: 128, 32>}]} {
    %c0 = arith.constant 0 : index
    %c0_0 = arith.constant 0 : index
    %0 = vector.load %arg1[%c0, %c0_0] : memref<128x32xf32, #tpu.memory_space<vmem>>, vector<128x32xf32>
    %c0_1 = arith.constant 0 : index
    %c0_2 = arith.constant 0 : index
    %1 = vector.load %arg6[%c0_1, %c0_2] : memref<6x32xf32, #tpu.memory_space<vmem>>, vector<1x32xf32>
    %c1 = arith.constant 1 : index
    %c0_3 = arith.constant 0 : index
    %2 = vector.load %arg6[%c1, %c0_3] : memref<6x32xf32, #tpu.memory_space<vmem>>, vector<1x32xf32>
    %c2 = arith.constant 2 : index
    %c0_4 = arith.constant 0 : index
    %3 = vector.load %arg6[%c2, %c0_4] : memref<6x32xf32, #tpu.memory_space<vmem>>, vector<1x32xf32>
    %c3 = arith.constant 3 : index
    %c0_5 = arith.constant 0 : index
    %4 = vector.load %arg6[%c3, %c0_5] : memref<6x32xf32, #tpu.memory_space<vmem>>, vector<1x32xf32>
    %c4 = arith.constant 4 : index
    %c0_6 = arith.constant 0 : index
    %5 = vector.load %arg6[%c4, %c0_6] : memref<6x32xf32, #tpu.memory_space<vmem>>, vector<1x32xf32>
    %c5 = arith.constant 5 : index
    %c0_7 = arith.constant 0 : index
    %6 = vector.load %arg6[%c5, %c0_7] : memref<6x32xf32, #tpu.memory_space<vmem>>, vector<1x32xf32>
    %cst = arith.constant dense<0.000000e+00> : vector<128xf32>
    %7 = vector.multi_reduction <add>, %0, %cst [1] : vector<128x32xf32> to vector<128xf32>
    %8 = vector.shape_cast %7 : vector<128xf32> to vector<128x1xf32>
    %cst_8 = arith.constant 3.200000e+01 : f32
    %9 = vector.broadcast %cst_8 : f32 to vector<128x1xf32>
    %10 = arith.divf %8, %9 : vector<128x1xf32>
    %11 = vector.broadcast %10 : vector<128x1xf32> to vector<128x32xf32>
    %12 = arith.subf %0, %11 : vector<128x32xf32>
    %13 = arith.mulf %12, %12 : vector<128x32xf32>
    %cst_9 = arith.constant dense<0.000000e+00> : vector<128xf32>
    %14 = vector.multi_reduction <add>, %13, %cst_9 [1] : vector<128x32xf32> to vector<128xf32>
    %15 = vector.shape_cast %14 : vector<128xf32> to vector<128x1xf32>
    %cst_10 = arith.constant 3.200000e+01 : f32
    %16 = vector.broadcast %cst_10 : f32 to vector<128x1xf32>
    %17 = arith.divf %15, %16 : vector<128x1xf32>
    %18 = vector.broadcast %10 : vector<128x1xf32> to vector<128x32xf32>
    %19 = arith.subf %0, %18 : vector<128x32xf32>
    %cst_11 = arith.constant 9.99999974E-6 : f32
    %20 = vector.broadcast %cst_11 : f32 to vector<128x1xf32>
    %21 = arith.addf %17, %20 : vector<128x1xf32>
    %22 = math.rsqrt %21 : vector<128x1xf32>
    %23 = vector.broadcast %22 : vector<128x1xf32> to vector<128x32xf32>
    %24 = arith.mulf %19, %23 : vector<128x32xf32>
    %25 = vector.broadcast %1 : vector<1x32xf32> to vector<128x32xf32>
    %26 = arith.mulf %24, %25 : vector<128x32xf32>
    %27 = vector.broadcast %2 : vector<1x32xf32> to vector<128x32xf32>
    %28 = arith.addf %26, %27 : vector<128x32xf32>
    %c0_12 = arith.constant 0 : index
    %c0_13 = arith.constant 0 : index
    %29 = vector.load %arg3[%c0_12, %c0_13] : memref<64x128xf32, #tpu.memory_space<vmem>>, vector<32x128xf32>
    %cst_14 = arith.constant dense<0.000000e+00> : vector<128x128xf32>
    %30 = tpu.matmul %28, %29, %cst_14 {dimension_numbers = #tpu.dot_dimension_numbers<[1], [0], [0], [1], [0, 0, 1, 1], [], []>} : vector<128x32xf32>, vector<32x128xf32>, vector<128x128xf32> -> vector<128x128xf32>
    %c0_15 = arith.constant 0 : index
    %c0_16 = arith.constant 0 : index
    %31 = vector.load %arg4[%c0_15, %c0_16] : memref<2x128xf32, #tpu.memory_space<vmem>>, vector<1x128xf32>
    %32 = vector.broadcast %31 : vector<1x128xf32> to vector<128x128xf32>
    %33 = arith.addf %30, %32 : vector<128x128xf32>
    %cst_17 = arith.constant 0.000000e+00 : f32
    %34 = vector.broadcast %cst_17 : f32 to vector<128x32xf32>
    %35 = vector.extract_strided_slice %33 {offsets = [0, 0], sizes = [128, 8], strides = [1, 1]} : vector<128x128xf32> to vector<128x8xf32>
    %36 = vector.extract_strided_slice %33 {offsets = [0, 32], sizes = [128, 8], strides = [1, 1]} : vector<128x128xf32> to vector<128x8xf32>
    %37 = vector.extract_strided_slice %33 {offsets = [0, 64], sizes = [128, 8], strides = [1, 1]} : vector<128x128xf32> to vector<128x8xf32>
    %cst_18 = arith.constant dense<0.000000e+00> : vector<128x128xf32>
    %38 = tpu.matmul %35, %36, %cst_18 {dimension_numbers = #tpu.dot_dimension_numbers<[1], [1], [0], [0], [0, 0, 1, 0], [], []>} : vector<128x8xf32>, vector<128x8xf32>, vector<128x128xf32> -> vector<128x128xf32>
    %c0_19 = arith.constant 0 : index
    %c0_20 = arith.constant 0 : index
    %c0_21 = arith.constant 0 : index
    %39 = vector.load %arg2[%c0_19, %c0_20, %c0_21] : memref<4x128x128xbf16, #tpu.memory_space<vmem>>, vector<1x128x128xbf16>
    %40 = vector.shape_cast %39 : vector<1x128x128xbf16> to vector<128x128xbf16>
    %41 = arith.extf %40 : vector<128x128xbf16> to vector<128x128xf32>
    %42 = arith.addf %38, %41 : vector<128x128xf32>
    %cst_22 = arith.constant dense<0xFF800000> : vector<128xf32>
    %43 = vector.multi_reduction <maximumf>, %42, %cst_22 [1] : vector<128x128xf32> to vector<128xf32>
    %44 = vector.shape_cast %43 : vector<128xf32> to vector<128x1xf32>
    %45 = vector.broadcast %44 : vector<128x1xf32> to vector<128x128xf32>
    %46 = arith.subf %42, %45 : vector<128x128xf32>
    %47 = math.exp %46 : vector<128x128xf32>
    %cst_23 = arith.constant dense<0.000000e+00> : vector<128xf32>
    %48 = vector.multi_reduction <add>, %47, %cst_23 [1] : vector<128x128xf32> to vector<128xf32>
    %49 = vector.shape_cast %48 : vector<128xf32> to vector<128x1xf32>
    %50 = tpu.reciprocal %49 : vector<128x1xf32> -> vector<128x1xf32>
    %51 = vector.broadcast %50 : vector<128x1xf32> to vector<128x128xf32>
    %52 = arith.mulf %47, %51 : vector<128x128xf32>
    %cst_24 = arith.constant dense<0.000000e+00> : vector<128x8xf32>
    %53 = tpu.matmul %52, %37, %cst_24 {dimension_numbers = #tpu.dot_dimension_numbers<[1], [0], [0], [1], [0, 0, 1, 1], [], []>} : vector<128x128xf32>, vector<128x8xf32>, vector<128x8xf32> -> vector<128x8xf32>
    %c0_25 = arith.constant 0 : index
    %c0_26 = arith.constant 0 : index
    %54 = vector.load %arg5[%c0_25, %c0_26] : memref<160x32xf32, #tpu.memory_space<vmem>>, vector<8x32xf32>
    %cst_27 = arith.constant dense<0.000000e+00> : vector<128x32xf32>
    %55 = tpu.matmul %53, %54, %cst_27 {dimension_numbers = #tpu.dot_dimension_numbers<[1], [0], [0], [1], [0, 0, 1, 1], [], []>} : vector<128x8xf32>, vector<8x32xf32>, vector<128x32xf32> -> vector<128x32xf32>
    %56 = arith.addf %34, %55 : vector<128x32xf32>
    %57 = vector.extract_strided_slice %33 {offsets = [0, 8], sizes = [128, 8], strides = [1, 1]} : vector<128x128xf32> to vector<128x8xf32>
    %58 = vector.extract_strided_slice %33 {offsets = [0, 40], sizes = [128, 8], strides = [1, 1]} : vector<128x128xf32> to vector<128x8xf32>
    %59 = vector.extract_strided_slice %33 {offsets = [0, 72], sizes = [128, 8], strides = [1, 1]} : vector<128x128xf32> to vector<128x8xf32>
    %cst_28 = arith.constant dense<0.000000e+00> : vector<128x128xf32>
    %60 = tpu.matmul %57, %58, %cst_28 {dimension_numbers = #tpu.dot_dimension_numbers<[1], [1], [0], [0], [0, 0, 1, 0], [], []>} : vector<128x8xf32>, vector<128x8xf32>, vector<128x128xf32> -> vector<128x128xf32>
    %c1_29 = arith.constant 1 : index
    %c0_30 = arith.constant 0 : index
    %c0_31 = arith.constant 0 : index
    %61 = vector.load %arg2[%c1_29, %c0_30, %c0_31] : memref<4x128x128xbf16, #tpu.memory_space<vmem>>, vector<1x128x128xbf16>
    %62 = vector.shape_cast %61 : vector<1x128x128xbf16> to vector<128x128xbf16>
    %63 = arith.extf %62 : vector<128x128xbf16> to vector<128x128xf32>
    %64 = arith.addf %60, %63 : vector<128x128xf32>
    %cst_32 = arith.constant dense<0xFF800000> : vector<128xf32>
    %65 = vector.multi_reduction <maximumf>, %64, %cst_32 [1] : vector<128x128xf32> to vector<128xf32>
    %66 = vector.shape_cast %65 : vector<128xf32> to vector<128x1xf32>
    %67 = vector.broadcast %66 : vector<128x1xf32> to vector<128x128xf32>
    %68 = arith.subf %64, %67 : vector<128x128xf32>
    %69 = math.exp %68 : vector<128x128xf32>
    %cst_33 = arith.constant dense<0.000000e+00> : vector<128xf32>
    %70 = vector.multi_reduction <add>, %69, %cst_33 [1] : vector<128x128xf32> to vector<128xf32>
    %71 = vector.shape_cast %70 : vector<128xf32> to vector<128x1xf32>
    %72 = tpu.reciprocal %71 : vector<128x1xf32> -> vector<128x1xf32>
    %73 = vector.broadcast %72 : vector<128x1xf32> to vector<128x128xf32>
    %74 = arith.mulf %69, %73 : vector<128x128xf32>
    %cst_34 = arith.constant dense<0.000000e+00> : vector<128x8xf32>
    %75 = tpu.matmul %74, %59, %cst_34 {dimension_numbers = #tpu.dot_dimension_numbers<[1], [0], [0], [1], [0, 0, 1, 1], [], []>} : vector<128x128xf32>, vector<128x8xf32>, vector<128x8xf32> -> vector<128x8xf32>
    %c8 = arith.constant 8 : index
    %c0_35 = arith.constant 0 : index
    %76 = vector.load %arg5[%c8, %c0_35] : memref<160x32xf32, #tpu.memory_space<vmem>>, vector<8x32xf32>
    %cst_36 = arith.constant dense<0.000000e+00> : vector<128x32xf32>
    %77 = tpu.matmul %75, %76, %cst_36 {dimension_numbers = #tpu.dot_dimension_numbers<[1], [0], [0], [1], [0, 0, 1, 1], [], []>} : vector<128x8xf32>, vector<8x32xf32>, vector<128x32xf32> -> vector<128x32xf32>
    %78 = arith.addf %56, %77 : vector<128x32xf32>
    %79 = vector.extract_strided_slice %33 {offsets = [0, 16], sizes = [128, 8], strides = [1, 1]} : vector<128x128xf32> to vector<128x8xf32>
    %80 = vector.extract_strided_slice %33 {offsets = [0, 48], sizes = [128, 8], strides = [1, 1]} : vector<128x128xf32> to vector<128x8xf32>
    %81 = vector.extract_strided_slice %33 {offsets = [0, 80], sizes = [128, 8], strides = [1, 1]} : vector<128x128xf32> to vector<128x8xf32>
    %cst_37 = arith.constant dense<0.000000e+00> : vector<128x128xf32>
    %82 = tpu.matmul %79, %80, %cst_37 {dimension_numbers = #tpu.dot_dimension_numbers<[1], [1], [0], [0], [0, 0, 1, 0], [], []>} : vector<128x8xf32>, vector<128x8xf32>, vector<128x128xf32> -> vector<128x128xf32>
    %c2_38 = arith.constant 2 : index
    %c0_39 = arith.constant 0 : index
    %c0_40 = arith.constant 0 : index
    %83 = vector.load %arg2[%c2_38, %c0_39, %c0_40] : memref<4x128x128xbf16, #tpu.memory_space<vmem>>, vector<1x128x128xbf16>
    %84 = vector.shape_cast %83 : vector<1x128x128xbf16> to vector<128x128xbf16>
    %85 = arith.extf %84 : vector<128x128xbf16> to vector<128x128xf32>
    %86 = arith.addf %82, %85 : vector<128x128xf32>
    %cst_41 = arith.constant dense<0xFF800000> : vector<128xf32>
    %87 = vector.multi_reduction <maximumf>, %86, %cst_41 [1] : vector<128x128xf32> to vector<128xf32>
    %88 = vector.shape_cast %87 : vector<128xf32> to vector<128x1xf32>
    %89 = vector.broadcast %88 : vector<128x1xf32> to vector<128x128xf32>
    %90 = arith.subf %86, %89 : vector<128x128xf32>
    %91 = math.exp %90 : vector<128x128xf32>
    %cst_42 = arith.constant dense<0.000000e+00> : vector<128xf32>
    %92 = vector.multi_reduction <add>, %91, %cst_42 [1] : vector<128x128xf32> to vector<128xf32>
    %93 = vector.shape_cast %92 : vector<128xf32> to vector<128x1xf32>
    %94 = tpu.reciprocal %93 : vector<128x1xf32> -> vector<128x1xf32>
    %95 = vector.broadcast %94 : vector<128x1xf32> to vector<128x128xf32>
    %96 = arith.mulf %91, %95 : vector<128x128xf32>
    %cst_43 = arith.constant dense<0.000000e+00> : vector<128x8xf32>
    %97 = tpu.matmul %96, %81, %cst_43 {dimension_numbers = #tpu.dot_dimension_numbers<[1], [0], [0], [1], [0, 0, 1, 1], [], []>} : vector<128x128xf32>, vector<128x8xf32>, vector<128x8xf32> -> vector<128x8xf32>
    %c16 = arith.constant 16 : index
    %c0_44 = arith.constant 0 : index
    %98 = vector.load %arg5[%c16, %c0_44] : memref<160x32xf32, #tpu.memory_space<vmem>>, vector<8x32xf32>
    %cst_45 = arith.constant dense<0.000000e+00> : vector<128x32xf32>
    %99 = tpu.matmul %97, %98, %cst_45 {dimension_numbers = #tpu.dot_dimension_numbers<[1], [0], [0], [1], [0, 0, 1, 1], [], []>} : vector<128x8xf32>, vector<8x32xf32>, vector<128x32xf32> -> vector<128x32xf32>
    %100 = arith.addf %78, %99 : vector<128x32xf32>
    %101 = vector.extract_strided_slice %33 {offsets = [0, 24], sizes = [128, 8], strides = [1, 1]} : vector<128x128xf32> to vector<128x8xf32>
    %102 = vector.extract_strided_slice %33 {offsets = [0, 56], sizes = [128, 8], strides = [1, 1]} : vector<128x128xf32> to vector<128x8xf32>
    %103 = vector.extract_strided_slice %33 {offsets = [0, 88], sizes = [128, 8], strides = [1, 1]} : vector<128x128xf32> to vector<128x8xf32>
    %cst_46 = arith.constant dense<0.000000e+00> : vector<128x128xf32>
    %104 = tpu.matmul %101, %102, %cst_46 {dimension_numbers = #tpu.dot_dimension_numbers<[1], [1], [0], [0], [0, 0, 1, 0], [], []>} : vector<128x8xf32>, vector<128x8xf32>, vector<128x128xf32> -> vector<128x128xf32>
    %c3_47 = arith.constant 3 : index
    %c0_48 = arith.constant 0 : index
    %c0_49 = arith.constant 0 : index
    %105 = vector.load %arg2[%c3_47, %c0_48, %c0_49] : memref<4x128x128xbf16, #tpu.memory_space<vmem>>, vector<1x128x128xbf16>
    %106 = vector.shape_cast %105 : vector<1x128x128xbf16> to vector<128x128xbf16>
    %107 = arith.extf %106 : vector<128x128xbf16> to vector<128x128xf32>
    %108 = arith.addf %104, %107 : vector<128x128xf32>
    %cst_50 = arith.constant dense<0xFF800000> : vector<128xf32>
    %109 = vector.multi_reduction <maximumf>, %108, %cst_50 [1] : vector<128x128xf32> to vector<128xf32>
    %110 = vector.shape_cast %109 : vector<128xf32> to vector<128x1xf32>
    %111 = vector.broadcast %110 : vector<128x1xf32> to vector<128x128xf32>
    %112 = arith.subf %108, %111 : vector<128x128xf32>
    %113 = math.exp %112 : vector<128x128xf32>
    %cst_51 = arith.constant dense<0.000000e+00> : vector<128xf32>
    %114 = vector.multi_reduction <add>, %113, %cst_51 [1] : vector<128x128xf32> to vector<128xf32>
    %115 = vector.shape_cast %114 : vector<128xf32> to vector<128x1xf32>
    %116 = tpu.reciprocal %115 : vector<128x1xf32> -> vector<128x1xf32>
    %117 = vector.broadcast %116 : vector<128x1xf32> to vector<128x128xf32>
    %118 = arith.mulf %113, %117 : vector<128x128xf32>
    %cst_52 = arith.constant dense<0.000000e+00> : vector<128x8xf32>
    %119 = tpu.matmul %118, %103, %cst_52 {dimension_numbers = #tpu.dot_dimension_numbers<[1], [0], [0], [1], [0, 0, 1, 1], [], []>} : vector<128x128xf32>, vector<128x8xf32>, vector<128x8xf32> -> vector<128x8xf32>
    %c24 = arith.constant 24 : index
    %c0_53 = arith.constant 0 : index
    %120 = vector.load %arg5[%c24, %c0_53] : memref<160x32xf32, #tpu.memory_space<vmem>>, vector<8x32xf32>
    %cst_54 = arith.constant dense<0.000000e+00> : vector<128x32xf32>
    %121 = tpu.matmul %119, %120, %cst_54 {dimension_numbers = #tpu.dot_dimension_numbers<[1], [0], [0], [1], [0, 0, 1, 1], [], []>} : vector<128x8xf32>, vector<8x32xf32>, vector<128x32xf32> -> vector<128x32xf32>
    %122 = arith.addf %100, %121 : vector<128x32xf32>
    %123 = vector.broadcast %5 : vector<1x32xf32> to vector<128x32xf32>
    %124 = arith.addf %122, %123 : vector<128x32xf32>
    %125 = arith.addf %0, %124 : vector<128x32xf32>
    %cst_55 = arith.constant dense<0.000000e+00> : vector<128xf32>
    %126 = vector.multi_reduction <add>, %125, %cst_55 [1] : vector<128x32xf32> to vector<128xf32>
    %127 = vector.shape_cast %126 : vector<128xf32> to vector<128x1xf32>
    %cst_56 = arith.constant 3.200000e+01 : f32
    %128 = vector.broadcast %cst_56 : f32 to vector<128x1xf32>
    %129 = arith.divf %127, %128 : vector<128x1xf32>
    %130 = vector.broadcast %129 : vector<128x1xf32> to vector<128x32xf32>
    %131 = arith.subf %125, %130 : vector<128x32xf32>
    %132 = arith.mulf %131, %131 : vector<128x32xf32>
    %cst_57 = arith.constant dense<0.000000e+00> : vector<128xf32>
    %133 = vector.multi_reduction <add>, %132, %cst_57 [1] : vector<128x32xf32> to vector<128xf32>
    %134 = vector.shape_cast %133 : vector<128xf32> to vector<128x1xf32>
    %cst_58 = arith.constant 3.200000e+01 : f32
    %135 = vector.broadcast %cst_58 : f32 to vector<128x1xf32>
    %136 = arith.divf %134, %135 : vector<128x1xf32>
    %137 = vector.broadcast %129 : vector<128x1xf32> to vector<128x32xf32>
    %138 = arith.subf %125, %137 : vector<128x32xf32>
    %cst_59 = arith.constant 9.99999974E-6 : f32
    %139 = vector.broadcast %cst_59 : f32 to vector<128x1xf32>
    %140 = arith.addf %136, %139 : vector<128x1xf32>
    %141 = math.rsqrt %140 : vector<128x1xf32>
    %142 = vector.broadcast %141 : vector<128x1xf32> to vector<128x32xf32>
    %143 = arith.mulf %138, %142 : vector<128x32xf32>
    %144 = vector.broadcast %3 : vector<1x32xf32> to vector<128x32xf32>
    %145 = arith.mulf %143, %144 : vector<128x32xf32>
    %146 = vector.broadcast %4 : vector<1x32xf32> to vector<128x32xf32>
    %147 = arith.addf %145, %146 : vector<128x32xf32>
    %c32 = arith.constant 32 : index
    %c0_60 = arith.constant 0 : index
    %148 = vector.load %arg3[%c32, %c0_60] : memref<64x128xf32, #tpu.memory_space<vmem>>, vector<32x128xf32>
    %cst_61 = arith.constant dense<0.000000e+00> : vector<128x128xf32>
    %149 = tpu.matmul %147, %148, %cst_61 {dimension_numbers = #tpu.dot_dimension_numbers<[1], [0], [0], [1], [0, 0, 1, 1], [], []>} : vector<128x32xf32>, vector<32x128xf32>, vector<128x128xf32> -> vector<128x128xf32>
    %c1_62 = arith.constant 1 : index
    %c0_63 = arith.constant 0 : index
    %150 = vector.load %arg4[%c1_62, %c0_63] : memref<2x128xf32, #tpu.memory_space<vmem>>, vector<1x128xf32>
    %151 = vector.broadcast %150 : vector<1x128xf32> to vector<128x128xf32>
    %152 = arith.addf %149, %151 : vector<128x128xf32>
    %cst_64 = arith.constant 5.000000e-01 : f32
    %153 = vector.broadcast %cst_64 : f32 to vector<128x128xf32>
    %154 = arith.mulf %153, %152 : vector<128x128xf32>
    %cst_65 = arith.constant 4.471500e-02 : f32
    %155 = vector.broadcast %cst_65 : f32 to vector<128x128xf32>
    %156 = arith.mulf %155, %152 : vector<128x128xf32>
    %157 = arith.mulf %156, %152 : vector<128x128xf32>
    %158 = arith.mulf %157, %152 : vector<128x128xf32>
    %159 = arith.addf %152, %158 : vector<128x128xf32>
    %cst_66 = arith.constant 0.797884583 : f32
    %160 = vector.broadcast %cst_66 : f32 to vector<128x128xf32>
    %161 = arith.mulf %160, %159 : vector<128x128xf32>
    %162 = math.tanh %161 : vector<128x128xf32>
    %cst_67 = arith.constant 1.000000e+00 : f32
    %163 = vector.broadcast %cst_67 : f32 to vector<128x128xf32>
    %164 = arith.addf %163, %162 : vector<128x128xf32>
    %165 = arith.mulf %154, %164 : vector<128x128xf32>
    %c32_68 = arith.constant 32 : index
    %c0_69 = arith.constant 0 : index
    %166 = vector.load %arg5[%c32_68, %c0_69] : memref<160x32xf32, #tpu.memory_space<vmem>>, vector<128x32xf32>
    %cst_70 = arith.constant dense<0.000000e+00> : vector<128x32xf32>
    %167 = tpu.matmul %165, %166, %cst_70 {dimension_numbers = #tpu.dot_dimension_numbers<[1], [0], [0], [1], [0, 0, 1, 1], [], []>} : vector<128x128xf32>, vector<128x32xf32>, vector<128x32xf32> -> vector<128x32xf32>
    %168 = vector.broadcast %6 : vector<1x32xf32> to vector<128x32xf32>
    %169 = arith.addf %167, %168 : vector<128x32xf32>
    %170 = arith.addf %125, %169 : vector<128x32xf32>
    %c0_71 = arith.constant 0 : index
    %c0_72 = arith.constant 0 : index
    %171 = vector.load %arg7[%c0_71, %c0_72] : memref<128x32xf32, #tpu.memory_space<vmem>>, vector<128x32xf32>
    tpu.vector_store %arg7[%c0_71, %c0_72], %170 {strides = array<i32>} : memref<128x32xf32, #tpu.memory_space<vmem>>, vector<128x32xf32>,
    return
  }
  func.func @transform_0(%arg0: i32) -> (i32, i32) {
    %c0_i32 = arith.constant 0 : i32
    %c0_i32_0 = arith.constant 0 : i32
    %c0_i32_1 = arith.constant 0 : i32
    return %c0_i32, %c0_i32_0 : i32, i32
  }
  func.func @transform_1(%arg0: i32) -> (i32, i32, i32) {
    %c0_i32 = arith.constant 0 : i32
    %c0_i32_0 = arith.constant 0 : i32
    %c0_i32_1 = arith.constant 0 : i32
    %c0_i32_2 = arith.constant 0 : i32
    return %c0_i32, %c0_i32_0, %c0_i32_1 : i32, i32, i32
  }
  func.func @transform_2(%arg0: i32) -> (i32, i32) {
    %c0_i32 = arith.constant 0 : i32
    %c0_i32_0 = arith.constant 0 : i32
    %c0_i32_1 = arith.constant 0 : i32
    return %c0_i32, %c0_i32_0 : i32, i32
  }
  func.func @transform_3(%arg0: i32) -> (i32, i32) {
    %c0_i32 = arith.constant 0 : i32
    %c0_i32_0 = arith.constant 0 : i32
    %c0_i32_1 = arith.constant 0 : i32
    return %c0_i32, %c0_i32_0 : i32, i32
  }
  func.func @transform_4(%arg0: i32) -> (i32, i32) {
    %c0_i32 = arith.constant 0 : i32
    %c0_i32_0 = arith.constant 0 : i32
    %c0_i32_1 = arith.constant 0 : i32
    return %c0_i32, %c0_i32_0 : i32, i32
  }
  func.func @transform_5(%arg0: i32) -> (i32, i32) {
    %c0_i32 = arith.constant 0 : i32
    %c0_i32_0 = arith.constant 0 : i32
    %c0_i32_1 = arith.constant 0 : i32
    return %c0_i32, %c0_i32_0 : i32, i32
  }
  func.func @transform_6(%arg0: i32) -> (i32, i32) {
    %c0_i32 = arith.constant 0 : i32
    %c0_i32_0 = arith.constant 0 : i32
    %c0_i32_1 = arith.constant 0 : i32
    return %c0_i32, %c0_i32_0 : i32, i32
  }
}

</mosaic_0001>

<bundles_post_ra>
// kernel: _lambda_.1
= control target key start
LH: loop header
LB: loop body
LE: loop exit
PB: predicated region body
PF: predicated region fallthrough
CT: control target
= control target key end

     0   :  { %vm45_vm0 = vcmask 261120   ;;  %vm577_vm1 = vcmask 64512   ;;  %s6610_s19 = smov 96   ;;  %s6611_s20 = smov 64   ;;  %s9060_s0 = inlined_call_operand.vmem [shape: f32[128,32], index: 0, kind: input, shape index: {}]   ;;  %s9061_s2 = inlined_call_operand.vmem [shape: f32[64,128], index: 2, kind: input, shape index: {}]   ;;  %s9062_s5 = inlined_call_operand.vmem [shape: f32[6,32], index: 5, kind: input, shape index: {}]   ;;  %s9063_s3 = inlined_call_operand.vmem [shape: f32[2,128], index: 3, kind: input, shape index: {}]   ;;  %s9064_s1 = inlined_call_operand.vmem [shape: bf16[4,128,128], index: 1, kind: input, shape index: {}]   ;;  %s9065_s4 = inlined_call_operand.vmem [shape: f32[160,32], index: 4, kind: input, shape index: {}]   ;;  %s9066_s6 = inlined_call_operand.vmem [shape: f32[128,32], index: 6, kind: output, shape index: {}]  }
   0x1   :  { %v23_v0 = vld [vmem:[%s9060_s0] sm:$0xff]  ;;  %v25_v1 = vld [vmem:[%s9060_s0 + $0x10] sm:$0xff]  ;;  %v24_v2 = vld [vmem:[%s9060_s0 + $0x8] sm:$0xff]  ;;  %s6612_s21 = smov 88   ;;  %s6613_s14 = smov 120  }
   0x2   :  { %v46_v3 = vsel %vm45_vm0, %v23_v0, 0.0  ;;  %v52_v4 = vsel %vm45_vm0, %v25_v1, 0.0  ;;  %v26_v5 = vld [vmem:[%s9060_s0 + $0x18] sm:$0xff]  ;;  %v49_v6 = vsel %vm45_vm0, %v24_v2, 0.0  ;;  %v27_v8 = vld [vmem:[%s9060_s0 + $0x20] sm:$0xff]  ;;  %v28_v9 = vld [vmem:[%s9060_s0 + $0x28] sm:$0xff] }
   0x3   :  { %47 = vadd.xlane.f32.xlu0 %v46_v3  ;;  %53 = vadd.xlane.f32.xlu1 %v52_v4  ;;  %v55_v7 = vsel %vm45_vm0, %v26_v5, 0.0  ;;  %v58_v10 = vsel %vm45_vm0, %v27_v8, 0.0  ;;  %v61_v11 = vsel %vm45_vm0, %v28_v9, 0.0  ;;  %v6683_v12 = vld [vmem:[%s9060_s0 + $0x30] sm:$0xff]  ;;  %v6688_v13 = vld [vmem:[%s9060_s0 + $0x38] sm:$0xff]  ;;  %v6697_v16 = vld [vmem:[%s9060_s0 + $0x40] sm:$0xff] }
   0x4   :  { %v64_v14 = vsel %vm45_vm0, %v6683_v12, 0.0  ;;  %v67_v15 = vsel %vm45_vm0, %v6688_v13, 0.0  ;;  %v6702_v17 = vld [vmem:[%s9060_s0 + $0x48] sm:$0xff]  ;;  %v70_v18 = vsel %vm45_vm0, %v6697_v16, 0.0  ;;  %v6711_v20 = vld [vmem:[%s9060_s0 + $0x50] sm:$0xff]  ;;  %v6716_v21 = vld [vmem:[%s9060_s0 + $0x58] sm:$0xff] }
   0x5   :  { %v73_v19 = vsel %vm45_vm0, %v6702_v17, 0.0  ;;  %v76_v22 = vsel %vm45_vm0, %v6711_v20, 0.0  ;;  %v79_v23 = vsel %vm45_vm0, %v6716_v21, 0.0  ;;  %v6725_v24 = vld [vmem:[%s9060_s0 + $0x60] sm:$0xff]  ;;  %v6730_v25 = vld [vmem:[%s9060_s0 + $0x68] sm:$0xff]  ;;  %v6739_v28 = vld [vmem:[%s9060_s0 + $0x70] sm:$0xff] }
   0x6   :  { %v82_v26 = vsel %vm45_vm0, %v6725_v24, 0.0  ;;  %v85_v27 = vsel %vm45_vm0, %v6730_v25, 0.0  ;;  %v6744_v29 = vld [vmem:[%s9060_s0 + $0x78] sm:$0xff]  ;;  %v88_v30 = vsel %vm45_vm0, %v6739_v28, 0.0  ;;  %s6614_s15 = smov 56   ;;  %s6615_s10 = smov 80  }
   0x7   :  { %50 = vadd.xlane.f32.xlu0 %v49_v6  ;;  %56 = vadd.xlane.f32.xlu1 %v55_v7  ;;  %v91_v31 = vsel %vm45_vm0, %v6744_v29, 0.0  ;;  %s6616_s11 = smov 112   ;;  %s6619_s16 = smov 48  }
   0x8   :  { %s6620_s26 = smov 40  }
   0xb   :  { %59 = vadd.xlane.f32.xlu0 %v58_v10  ;;  %62 = vadd.xlane.f32.xlu1 %v61_v11 }
   0xf   :  { %65 = vadd.xlane.f32.xlu0 %v64_v14  ;;  %68 = vadd.xlane.f32.xlu1 %v67_v15 }
  0x13   :  { %71 = vadd.xlane.f32.xlu0 %v70_v18  ;;  %74 = vadd.xlane.f32.xlu1 %v73_v19 }
  0x17   :  { %77 = vadd.xlane.f32.xlu0 %v76_v22  ;;  %80 = vadd.xlane.f32.xlu1 %v79_v23 }
  0x1b   :  { %83 = vadd.xlane.f32.xlu0 %v82_v26  ;;  %86 = vadd.xlane.f32.xlu1 %v85_v27 }
  0x1f   :  { %89 = vadd.xlane.f32.xlu0 %v88_v30  ;;  %92 = vadd.xlane.f32.xlu1 %v91_v31 }
  0x8c   :  { %v48_v32 = vpop.xlane.xlu0 %47  ;;  %v54_v33 = vpop.xlane.xlu1 %53 }
  0x8d   :  { %v95_v34 = vmul.f32 0.03125, %v48_v32  ;;  %v97_v35 = vmul.f32 0.03125, %v54_v33 }
  0x8f   :  { %v6750_v36 = vsub.f32 %v23_v0, %v95_v34  ;;  %v6752_v37 = vsub.f32 %v25_v1, %v97_v35 }
  0x90   :  { %v51_v38 = vpop.xlane.xlu0 %50  ;;  %v57_v39 = vpop.xlane.xlu1 %56 }
  0x91   :  { %v96_v40 = vmul.f32 0.03125, %v51_v38  ;;  %v98_v41 = vmul.f32 0.03125, %v57_v39  ;;  %v127_v42 = vmul.f32 %v6750_v36, %v6750_v36  ;;  %v129_v43 = vmul.f32 %v6752_v37, %v6752_v37 }
  0x93   :  { %v6758_v44 = vsub.f32 %v24_v2, %v96_v40  ;;  %v6760_v45 = vsub.f32 %v26_v5, %v98_v41  ;;  %v143_v46 = vsel %vm45_vm0, %v127_v42, 0.0  ;;  %v149_v49 = vsel %vm45_vm0, %v129_v43, 0.0 }
  0x94   :  { %144 = vadd.xlane.f32.xlu0 %v143_v46  ;;  %v60_v47 = vpop.xlane.xlu0 %59  ;;  %v63_v48 = vpop.xlane.xlu1 %62 }
  0x95   :  { %v99_v50 = vmul.f32 0.03125, %v60_v47  ;;  %v100_v51 = vmul.f32 0.03125, %v63_v48  ;;  %v128_v52 = vmul.f32 %v6758_v44, %v6758_v44  ;;  %v130_v53 = vmul.f32 %v6760_v45, %v6760_v45 }
  0x97   :  { %v6768_v54 = vsub.f32 %v27_v8, %v99_v50  ;;  %v6770_v55 = vsub.f32 %v28_v9, %v100_v51  ;;  %v146_v56 = vsel %vm45_vm0, %v128_v52, 0.0  ;;  %v152_v59 = vsel %vm45_vm0, %v130_v53, 0.0  ;;  %v297_v53 = vld [vmem:[%s9061_s2 + $0x10] sm:$0xff] }
  0x98   :  { %150 = vadd.xlane.f32.xlu0 %v149_v49  ;;  %147 = vadd.xlane.f32.xlu1 %v146_v56  ;;  %v66_v57 = vpop.xlane.xlu0 %65  ;;  %v69_v58 = vpop.xlane.xlu1 %68  ;;  %v296_v56 = vld [vmem:[%s9061_s2 + $0x8] sm:$0xff] }
  0x99   :  { %v101_v60 = vmul.f32 0.03125, %v66_v57  ;;  %v102_v61 = vmul.f32 0.03125, %v69_v58  ;;  %v131_v62 = vmul.f32 %v6768_v54, %v6768_v54  ;;  %v132_v63 = vmul.f32 %v6770_v55, %v6770_v55  ;;  %v295_v57 = vld [vmem:[%s9061_s2] sm:$0xff] }
  0x9b   :  { %v6779_v0 = vsub.f32 %v6683_v12, %v101_v60  ;;  %v6782_v1 = vsub.f32 %v6688_v13, %v102_v61  ;;  %v155_v2 = vsel %vm45_vm0, %v131_v62, 0.0  ;;  %v158_v5 = vsel %vm45_vm0, %v132_v63, 0.0 }
  0x9c   :  { %153 = vadd.xlane.f32.xlu1 %v152_v59  ;;  %156 = vadd.xlane.f32.xlu0 %v155_v2  ;;  %v72_v3 = vpop.xlane.xlu0 %71  ;;  %v75_v4 = vpop.xlane.xlu1 %74 }
  0x9d   :  { %v103_v6 = vmul.f32 0.03125, %v72_v3  ;;  %v104_v7 = vmul.f32 0.03125, %v75_v4  ;;  %v133_v8 = vmul.f32 %v6779_v0, %v6779_v0  ;;  %v134_v9 = vmul.f32 %v6782_v1, %v6782_v1 }
  0x9f   :  { %v6791_v10 = vsub.f32 %v6697_v16, %v103_v6  ;;  %v6794_v11 = vsub.f32 %v6702_v17, %v104_v7  ;;  %v161_v12 = vsel %vm45_vm0, %v133_v8, 0.0  ;;  %v164_v15 = vsel %vm45_vm0, %v134_v9, 0.0 }
  0xa0   :  { %159 = vadd.xlane.f32.xlu1 %v158_v5  ;;  %162 = vadd.xlane.f32.xlu0 %v161_v12  ;;  %v78_v13 = vpop.xlane.xlu0 %77  ;;  %v81_v14 = vpop.xlane.xlu1 %80 }
  0xa1   :  { %v105_v18 = vmul.f32 0.03125, %v78_v13  ;;  %v106_v19 = vmul.f32 0.03125, %v81_v14  ;;  %v135_v22 = vmul.f32 %v6791_v10, %v6791_v10  ;;  %v136_v16 = vmul.f32 %v6794_v11, %v6794_v11 }
  0xa3   :  { %v6803_v23 = vsub.f32 %v6711_v20, %v105_v18  ;;  %v6806_v17 = vsub.f32 %v6716_v21, %v106_v19  ;;  %v167_v26 = vsel %vm45_vm0, %v135_v22, 0.0  ;;  %v170_v31 = vsel %vm45_vm0, %v136_v16, 0.0 }
  0xa4   :  { %165 = vadd.xlane.f32.xlu1 %v164_v15  ;;  %168 = vadd.xlane.f32.xlu0 %v167_v26  ;;  %v84_v27 = vpop.xlane.xlu0 %83  ;;  %v87_v30 = vpop.xlane.xlu1 %86 }
  0xa5   :  { %v107_v32 = vmul.f32 0.03125, %v84_v27  ;;  %v108_v33 = vmul.f32 0.03125, %v87_v30  ;;  %v137_v34 = vmul.f32 %v6803_v23, %v6803_v23  ;;  %v138_v20 = vmul.f32 %v6806_v17, %v6806_v17 }
  0xa7   :  { %v6815_v35 = vsub.f32 %v6725_v24, %v107_v32  ;;  %v6818_v21 = vsub.f32 %v6730_v25, %v108_v33  ;;  %v173_v38 = vsel %vm45_vm0, %v137_v34, 0.0  ;;  %v176_v41 = vsel %vm45_vm0, %v138_v20, 0.0  ;;  %v6855_v32 = vld [vmem:[%s9062_s5] ss:$0 sm:$0xff] }
  0xa8   :  { %171 = vadd.xlane.f32.xlu1 %v170_v31  ;;  %174 = vadd.xlane.f32.xlu0 %v173_v38  ;;  %v90_v39 = vpop.xlane.xlu0 %89  ;;  %v93_v40 = vpop.xlane.xlu1 %92 }
  0xa9   :  { %v109_v42 = vmul.f32 0.03125, %v90_v39  ;;  %v110_v43 = vmul.f32 0.03125, %v93_v40  ;;  %v139_v46 = vmul.f32 %v6815_v35, %v6815_v35  ;;  %v140_v24 = vmul.f32 %v6818_v21, %v6818_v21  ;;  %v6861_v40 = vld [vmem:[%s9062_s5 + $0x1] ss:$0 sm:$0xff] }
  0xab   :  { %v6827_v47 = vsub.f32 %v6739_v28, %v109_v42  ;;  %v6830_v25 = vsub.f32 %v6744_v29, %v110_v43  ;;  %v179_v48 = vsel %vm45_vm0, %v139_v46, 0.0  ;;  %v182_v49 = vsel %vm45_vm0, %v140_v24, 0.0  ;;  %v298_v29 = vld [vmem:[%s9061_s2 + $0x18] sm:$0xff] }
  0xac   :  { %177 = vadd.xlane.f32.xlu1 %v176_v41  ;;  %180 = vadd.xlane.f32.xlu0 %v179_v48 }
  0xad   :  { %v141_v50 = vmul.f32 %v6827_v47, %v6827_v47  ;;  %v142_v51 = vmul.f32 %v6830_v25, %v6830_v25  ;;  %5527 = vmatprep.subr.mxu0 %v298_v29 }
  0xae   :  { %5528 = vmatpush3.msra.mxu0 %v298_v29 }
  0xaf   :  { %v185_v52 = vsel %vm45_vm0, %v141_v50, 0.0  ;;  %v188_v28 = vsel %vm45_vm0, %v142_v51, 0.0  ;;  %5529 = vmatprep.subr.mxu0 %v297_v53 }
  0xb0   :  { %183 = vadd.xlane.f32.xlu1 %v182_v49  ;;  %186 = vadd.xlane.f32.xlu0 %v185_v52 }
  0xb1   :  { %5530 = vmatpush3.msra.mxu0 %v297_v53 }
  0xb2   :  { %5531 = vmatprep.subr.mxu0 %v296_v56 }
  0xb3   :  { %5532 = vmatpush3.msra.mxu0 %v296_v56 }
  0xb4   :  { %189 = vadd.xlane.f32.xlu1 %v188_v28  ;;  %5533 = vmatprep.subr.mxu0 %v295_v57 }
  0xb5   :  { %5534 = vmatpush3.msra.mxu0 %v295_v57 }
 0x11d   :  { %v145_v58 = vpop.xlane.xlu0 %144 }
 0x11e   :  { %v191_v59 = vmul.f32 0.03125, %v145_v58 }
 0x120   :  { %v207_v60 = vadd.f32 1e-05, %v191_v59 }
 0x121   :  { %v148_v61 = vpop.xlane.xlu1 %147  ;;  %v151_v62 = vpop.xlane.xlu0 %150 }
 0x122   :  { %6242 = vrsqrt.f32 %v207_v60  ;;  %v192_v63 = vmul.f32 0.03125, %v148_v61  ;;  %v193_v2 = vmul.f32 0.03125, %v151_v62 }
 0x124   :  { %v208_v3 = vadd.f32 1e-05, %v192_v63  ;;  %v209_v4 = vadd.f32 1e-05, %v193_v2 }
 0x125   :  { %v154_v5 = vpop.xlane.xlu1 %153  ;;  %v157_v6 = vpop.xlane.xlu0 %156 }
 0x126   :  { %6244 = vrsqrt.f32 %v208_v3  ;;  %v194_v7 = vmul.f32 0.03125, %v154_v5  ;;  %v195_v8 = vmul.f32 0.03125, %v157_v6 }
 0x127   :  { %6246 = vrsqrt.f32 %v209_v4 }
 0x128   :  { %v210_v9 = vadd.f32 1e-05, %v194_v7  ;;  %v211_v12 = vadd.f32 1e-05, %v195_v8 }
 0x129   :  { %v160_v13 = vpop.xlane.xlu1 %159  ;;  %v163_v14 = vpop.xlane.xlu0 %162 }
 0x12a   :  { %6248 = vrsqrt.f32 %v210_v9  ;;  %v196_v15 = vmul.f32 0.03125, %v160_v13  ;;  %v197_v18 = vmul.f32 0.03125, %v163_v14 }
 0x12b   :  { %6250 = vrsqrt.f32 %v211_v12 }
 0x12c   :  { %v212_v19 = vadd.f32 1e-05, %v196_v15  ;;  %v213_v22 = vadd.f32 1e-05, %v197_v18 }
 0x12d   :  { %v166_v16 = vpop.xlane.xlu1 %165  ;;  %v169_v26 = vpop.xlane.xlu0 %168 }
 0x12e   :  { %6252 = vrsqrt.f32 %v212_v19  ;;  %v198_v27 = vmul.f32 0.03125, %v166_v16  ;;  %v199_v30 = vmul.f32 0.03125, %v169_v26 }
 0x12f   :  { %v6243_v31 = vpop.eup %6242  ;;  %6254 = vrsqrt.f32 %v213_v22 }
 0x130   :  { %v214_v33 = vadd.f32 1e-05, %v198_v27  ;;  %v215_v34 = vadd.f32 1e-05, %v199_v30  ;;  %v239_v20 = vmul.f32 %v6243_v31, %v6750_v36 }
 0x131   :  { %v172_v38 = vpop.xlane.xlu1 %171  ;;  %v175_v39 = vpop.xlane.xlu0 %174 }
 0x132   :  { %6256 = vrsqrt.f32 %v214_v33  ;;  %v200_v41 = vmul.f32 0.03125, %v172_v38  ;;  %v201_v42 = vmul.f32 0.03125, %v175_v39  ;;  %v259_v43 = vmul.f32 %v6855_v32, %v239_v20 }
 0x133   :  { %v6245_v46 = vpop.eup %6244  ;;  %6258 = vrsqrt.f32 %v215_v34 }
 0x134   :  { %v6247_v24 = vpop.eup %6246  ;;  %v216_v48 = vadd.f32 1e-05, %v200_v41  ;;  %v217_v49 = vadd.f32 1e-05, %v201_v42  ;;  %v279_v50 = vadd.f32 %v6861_v40, %v259_v43  ;;  %v240_v36 = vmul.f32 %v6245_v46, %v6758_v44 }
 0x135   :  { %v178_v51 = vpop.xlane.xlu1 %177  ;;  %v181_v52 = vpop.xlane.xlu0 %180  ;;  %v241_v28 = vmul.f32 %v6247_v24, %v6752_v37 }
 0x136   :  { %6260 = vrsqrt.f32 %v216_v48  ;;  %v202_v29 = vmul.f32 0.03125, %v178_v51  ;;  %v203_v53 = vmul.f32 0.03125, %v181_v52  ;;  %5535 = vmatprep.mubr.msk.f32.mxu0 %vm45_vm0, %v279_v50  ;;  %v260_v56 = vmul.f32 %v6855_v32, %v240_v36 }
 0x137   :  { %v6249_v57 = vpop.eup %6248  ;;  %6262 = vrsqrt.f32 %v217_v49  ;;  %v261_v58 = vmul.f32 %v6855_v32, %v241_v28 }
 0x138   :  { %v6251_v59 = vpop.eup %6250  ;;  %v218_v60 = vadd.f32 1e-05, %v202_v29  ;;  %v219_v61 = vadd.f32 1e-05, %v203_v53  ;;  %v280_v44 = vadd.f32 %v6861_v40, %v260_v56  ;;  %v242_v62 = vmul.f32 %v6249_v57, %v6760_v45 }
 0x139   :  { %v184_v63 = vpop.xlane.xlu1 %183  ;;  %v187_v37 = vpop.xlane.xlu0 %186  ;;  %v281_v2 = vadd.f32 %v6861_v40, %v261_v58  ;;  %v243_v3 = vmul.f32 %v6251_v59, %v6768_v54 }
 0x13a   :  { %6264 = vrsqrt.f32 %v218_v60  ;;  %v204_v4 = vmul.f32 0.03125, %v184_v63  ;;  %v205_v5 = vmul.f32 0.03125, %v187_v37  ;;  %5536 = vmatmul.mubr.msk.f32.vlgmr.msra.gmra.mxu0 %vm45_vm0, %v280_v44  ;;  %v262_v6 = vmul.f32 %v6855_v32, %v242_v62  ;;  %v4694_v62 = vld [vmem:[%s9063_s3] ss:$0 sm:$0xff] }
 0x13b   :  { %v6253_v7 = vpop.eup %6252  ;;  %6266 = vrsqrt.f32 %v219_v61  ;;  %5538 = vmatprep.mubr.msk.f32.mxu0 %vm45_vm0, %v281_v2  ;;  %v263_v8 = vmul.f32 %v6855_v32, %v243_v3 }
 0x13c   :  { %v6255_v45 = vpop.eup %6254  ;;  %v220_v9 = vadd.f32 1e-05, %v204_v4  ;;  %v221_v12 = vadd.f32 1e-05, %v205_v5  ;;  %v282_v13 = vadd.f32 %v6861_v40, %v262_v6  ;;  %v244_v54 = vmul.f32 %v6253_v7, %v6770_v55 }
 0x13d   :  { %v190_v14 = vpop.xlane.xlu1 %189  ;;  %v283_v15 = vadd.f32 %v6861_v40, %v263_v8  ;;  %v245_v18 = vmul.f32 %v6255_v45, %v6779_v0 }
 0x13e   :  { %6268 = vrsqrt.f32 %v220_v9  ;;  %v206_v19 = vmul.f32 0.03125, %v190_v14  ;;  %5539 = vmatmul.mubr.msk.f32.gmra.mxu0 %vm45_vm0, %v282_v13  ;;  %v264_v22 = vmul.f32 %v6855_v32, %v244_v54 }
 0x13f   :  { %v6257_v16 = vpop.eup %6256  ;;  %6270 = vrsqrt.f32 %v221_v12  ;;  %5541 = vmatprep.mubr.msk.f32.mxu0 %vm45_vm0, %v283_v15  ;;  %v265_v26 = vmul.f32 %v6855_v32, %v245_v18 }
 0x140   :  { %v6259_v27 = vpop.eup %6258  ;;  %v222_v30 = vadd.f32 1e-05, %v206_v19  ;;  %v284_v55 = vadd.f32 %v6861_v40, %v264_v22  ;;  %v246_v31 = vmul.f32 %v6257_v16, %v6782_v1 }
 0x141   :  { %v285_v0 = vadd.f32 %v6861_v40, %v265_v26  ;;  %v247_v33 = vmul.f32 %v6259_v27, %v6791_v10 }
 0x142   :  { %6272 = vrsqrt.f32 %v222_v30  ;;  %5542 = vmatmul.mubr.msk.f32.gmra.mxu0 %vm45_vm0, %v284_v55  ;;  %v266_v34 = vmul.f32 %v6855_v32, %v246_v31 }
 0x143   :  { %v6261_v20 = vpop.eup %6260  ;;  %5544 = vmatprep.mubr.msk.f32.mxu0 %vm45_vm0, %v285_v0  ;;  %v267_v38 = vmul.f32 %v6855_v32, %v247_v33 }
 0x144   :  { %v6263_v39 = vpop.eup %6262  ;;  %v286_v41 = vadd.f32 %v6861_v40, %v266_v34  ;;  %v248_v42 = vmul.f32 %v6261_v20, %v6794_v11 }
 0x145   :  { %v287_v1 = vadd.f32 %v6861_v40, %v267_v38  ;;  %v249_v43 = vmul.f32 %v6263_v39, %v6803_v23 }
 0x146   :  { %5545 = vmatmul.mubr.msk.f32.gmra.mxu0 %vm45_vm0, %v286_v41  ;;  %v268_v10 = vmul.f32 %v6855_v32, %v248_v42 }
 0x147   :  { %v6265_v46 = vpop.eup %6264  ;;  %5547 = vmatprep.mubr.msk.f32.mxu0 %vm45_vm0, %v287_v1  ;;  %v269_v24 = vmul.f32 %v6855_v32, %v249_v43 }
 0x148   :  { %v6267_v48 = vpop.eup %6266  ;;  %v288_v49 = vadd.f32 %v6861_v40, %v268_v10  ;;  %v250_v50 = vmul.f32 %v6265_v46, %v6806_v17 }
 0x149   :  { %v289_v11 = vadd.f32 %v6861_v40, %v269_v24  ;;  %v251_v36 = vmul.f32 %v6267_v48, %v6815_v35 }
 0x14a   :  { %5548 = vmatmul.mubr.msk.f32.gmra.mxu0 %vm45_vm0, %v288_v49  ;;  %v270_v23 = vmul.f32 %v6855_v32, %v250_v50 }
 0x14b   :  { %v6269_v51 = vpop.eup %6268  ;;  %5550 = vmatprep.mubr.msk.f32.mxu0 %vm45_vm0, %v289_v11  ;;  %v271_v52 = vmul.f32 %v6855_v32, %v251_v36 }
 0x14c   :  { %v6271_v28 = vpop.eup %6270  ;;  %v290_v29 = vadd.f32 %v6861_v40, %v270_v23  ;;  %v252_v53 = vmul.f32 %v6269_v51, %v6818_v21 }
 0x14d   :  { %v291_v17 = vadd.f32 %v6861_v40, %v271_v52  ;;  %v253_v56 = vmul.f32 %v6271_v28, %v6827_v47 }
 0x14e   :  { %5551 = vmatmul.mubr.msk.f32.gmra.mxu0 %vm45_vm0, %v290_v29  ;;  %v272_v35 = vmul.f32 %v6855_v32, %v252_v53 }
 0x14f   :  { %v6273_v57 = vpop.eup %6272  ;;  %5553 = vmatprep.mubr.msk.f32.mxu0 %vm45_vm0, %v291_v17  ;;  %v273_v58 = vmul.f32 %v6855_v32, %v253_v56 }
 0x150   :  { %v292_v59 = vadd.f32 %v6861_v40, %v272_v35  ;;  %v254_v60 = vmul.f32 %v6273_v57, %v6830_v25 }
 0x151   :  { %v293_v61 = vadd.f32 %v6861_v40, %v273_v58 }
 0x152   :  { %5554 = vmatmul.mubr.msk.f32.gmra.mxu0 %vm45_vm0, %v292_v59  ;;  %v274_v21 = vmul.f32 %v6855_v32, %v254_v60 }
 0x153   :  { %5556 = vmatprep.mubr.msk.f32.mxu0 %vm45_vm0, %v293_v61 }
 0x154   :  { %v294_v47 = vadd.f32 %v6861_v40, %v274_v21 }
 0x156   :  { %5557 = vmatmul.mubr.msk.f32.gmra.mxu0 %vm45_vm0, %v294_v47 }
 0x1fa   :  { %v5537_v44 = vpop.f32.mrf.mxu0 }
 0x1fb   :  { %v6979_v0 = vadd.f32 %v5537_v44, %v4694_v62 }
 0x1fc   :  { %v418_v63 = vpop.f32.mrf.mxu0 }
 0x1fd   :  { %v6929_v25 = vadd.f32 %v4694_v62, %v418_v63 }
 0x1fe   :  { %v5540_v37 = vpop.f32.mrf.mxu0 }
 0x1ff   :  { %5591 = vmatprep.mubr.msk.f32.mxu1 %vm577_vm1, %v6929_v25  ;;  %v6971_v55 = vadd.f32 %v5540_v37, %v4694_v62  ;;  %v4973_v37 = vld [vmem:[%s9064_s1] sm:$0xff]  }
 0x200   :  { %v428_v32 = vpop.f32.mrf.mxu0 }
 0x201   :  { %v6989_v34 = vadd.f32 %v4694_v62, %v428_v32  ;;  %v4975_v32 = vunpack.c.h.bf16 %v4973_v37 }
 0x202   :  { %v5543_v2 = vpop.f32.mrf.mxu0 }
 0x203   :  { %v6963_v27 = vadd.f32 %v5543_v2, %v4694_v62  ;;  %v4974_v2 = vunpack.c.l.bf16 %v4973_v37 }
 0x204   :  { %v438_v3 = vpop.f32.mrf.mxu0 }
 0x205   :  { %v6983_v33 = vadd.f32 %v4694_v62, %v438_v3 }
 0x206   :  { %v5546_v4 = vpop.f32.mrf.mxu0 }
 0x207   :  { %v6955_v16 = vadd.f32 %v5546_v4, %v4694_v62  ;;  %v5100_v4 = vld [vmem:[%s9064_s1 + $0x8] sm:$0xff]  }
 0x208   :  { %v448_v40 = vpop.f32.mrf.mxu0 }
 0x209   :  { %v6975_v31 = vadd.f32 %v4694_v62, %v448_v40 }
 0x20a   :  { %v5549_v5 = vpop.f32.mrf.mxu0 }
 0x20b   :  { %v6947_v19 = vadd.f32 %v5549_v5, %v4694_v62 }
 0x20c   :  { %v458_v6 = vpop.f32.mrf.mxu0 }
 0x20d   :  { %v6967_v30 = vadd.f32 %v4694_v62, %v458_v6  ;;  %v5101_v6 = vld [vmem:[%s9064_s1 + $0x10] sm:$0xff]  }
 0x20e   :  { %v5552_v7 = vpop.f32.mrf.mxu0 }
 0x20f   :  { %v6939_v15 = vadd.f32 %v5552_v7, %v4694_v62 }
 0x210   :  { %v468_v8 = vpop.f32.mrf.mxu0 }
 0x211   :  { %v6959_v26 = vadd.f32 %v4694_v62, %v468_v8  ;;  %v4979_v8 = vunpack.c.h.bf16 %v5100_v4 }
 0x212   :  { %v5555_v45 = vpop.f32.mrf.mxu0 }
 0x213   :  { %v6943_v18 = vadd.f32 %v5555_v45, %v4694_v62 }
 0x214   :  { %v478_v9 = vpop.f32.mrf.mxu0 }
 0x215   :  { %v6951_v22 = vadd.f32 %v4694_v62, %v478_v9  ;;  %v4983_v9 = vunpack.c.h.bf16 %v5101_v6 }
 0x216   :  { %v5558_v12 = vpop.f32.mrf.mxu0 }
 0x217   :  { %v6933_v13 = vadd.f32 %v5558_v12, %v4694_v62 }
 0x218   :  { %v488_v54 = vpop.f32.mrf.mxu0 }
 0x219   :  { %v6935_v14 = vadd.f32 %v4694_v62, %v488_v54  ;;  %575 = vrot.lane.b32.xlu0 %v6933_v13, %s6610_s19  ;;  %v5102_v54 = vld [vmem:[%s9064_s1 + $0x18] sm:$0xff]  }
 0x21b   :  { %573 = vrot.lane.b32.xlu1 %v6935_v14, %s6610_s19 }
 0x21d   :  { %567 = vrot.lane.b32.xlu0 %v6939_v15, %s6610_s19 }
 0x21f   :  { %571 = vrot.lane.b32.xlu1 %v6943_v18, %s6610_s19 }
 0x221   :  { %563 = vrot.lane.b32.xlu0 %v6947_v19, %s6610_s19 }
 0x223   :  { %569 = vrot.lane.b32.xlu1 %v6951_v22, %s6610_s19 }
 0x225   :  { %559 = vrot.lane.b32.xlu0 %v6955_v16, %s6610_s19 }
 0x227   :  { %565 = vrot.lane.b32.xlu1 %v6959_v26, %s6610_s19 }
 0x229   :  { %555 = vrot.lane.b32.xlu0 %v6963_v27, %s6610_s19 }
 0x22b   :  { %561 = vrot.lane.b32.xlu1 %v6967_v30, %s6610_s19 }
 0x22d   :  { %551 = vrot.lane.b32.xlu0 %v6971_v55, %s6610_s19 }
 0x22f   :  { %557 = vrot.lane.b32.xlu1 %v6975_v31, %s6610_s19 }
 0x231   :  { %547 = vrot.lane.b32.xlu0 %v6979_v0, %s6610_s19 }
 0x233   :  { %553 = vrot.lane.b32.xlu1 %v6983_v33, %s6610_s19 }
 0x235   :  { %961 = vrot.lane.b32.xlu0 %v6933_v13, %s6611_s20 }
 0x237   :  { %549 = vrot.lane.b32.xlu1 %v6989_v34, %s6610_s19 }
 0x239   :  { %957 = vrot.lane.b32.xlu0 %v6943_v18, %s6611_s20 }
 0x23b   :  { %545 = vrot.lane.b32.xlu1 %v6929_v25, %s6610_s19 }
 0x23d   :  { %953 = vrot.lane.b32.xlu0 %v6939_v15, %s6611_s20 }
 0x23f   :  { %955 = vrot.lane.b32.xlu1 %v6951_v22, %s6611_s20 }
 0x241   :  { %945 = vrot.lane.b32.xlu0 %v6955_v16, %s6611_s20 }
 0x243   :  { %951 = vrot.lane.b32.xlu1 %v6959_v26, %s6611_s20 }
 0x245   :  { %941 = vrot.lane.b32.xlu0 %v6963_v27, %s6611_s20 }
 0x247   :  { %949 = vrot.lane.b32.xlu1 %v6947_v19, %s6611_s20 }
 0x249   :  { %937 = vrot.lane.b32.xlu0 %v6971_v55, %s6611_s20 }
 0x24b   :  { %947 = vrot.lane.b32.xlu1 %v6967_v30, %s6611_s20 }
 0x24d   :  { %933 = vrot.lane.b32.xlu0 %v6979_v0, %s6611_s20 }
 0x24f   :  { %943 = vrot.lane.b32.xlu1 %v6975_v31, %s6611_s20 }
 0x251   :  { %1220 = vrot.lane.b32.xlu0 %v6933_v13, %s6612_s21 }
 0x253   :  { %939 = vrot.lane.b32.xlu1 %v6983_v33, %s6611_s20 }
 0x255   :  { %1216 = vrot.lane.b32.xlu0 %v6943_v18, %s6612_s21 }
 0x257   :  { %935 = vrot.lane.b32.xlu1 %v6989_v34, %s6611_s20 }
 0x259   :  { %1212 = vrot.lane.b32.xlu0 %v6939_v15, %s6612_s21 }
 0x25b   :  { %931 = vrot.lane.b32.xlu1 %v6929_v25, %s6611_s20 }
 0x25f   :  { %1214 = vrot.lane.b32.xlu1 %v6951_v22, %s6612_s21 }
 0x263   :  { %959 = vrot.lane.b32.xlu1 %v6935_v14, %s6611_s20 }
 0x267   :  { %1218 = vrot.lane.b32.xlu1 %v6935_v14, %s6612_s21 }
 0x28b   :  { %v576_v20 = vpop.permute.xlu0 %575 }
 0x28c   :  { %5559 = vmatprep.subr.msk.mxu1 %vm577_vm1, %v576_v20 }
 0x28d   :  { %5560 = vmatpush3.xpose.msk.msra.mxu1 %vm577_vm1, %v576_v20  ;;  %v574_v38 = vpop.permute.xlu1 %573 }
 0x28e   :  { %5561 = vmatprep.subr.msk.mxu1 %vm577_vm1, %v574_v38 }
 0x28f   :  { %v568_v39 = vpop.permute.xlu0 %567 }
 0x291   :  { %5562 = vmatpush3.xpose.msk.msra.mxu1 %vm577_vm1, %v574_v38  ;;  %v572_v41 = vpop.permute.xlu1 %571  ;;  %v4978_v38 = vunpack.c.l.bf16 %v5100_v4 }
 0x292   :  { %5563 = vmatprep.subr.msk.mxu1 %vm577_vm1, %v572_v41 }
 0x293   :  { %v564_v42 = vpop.permute.xlu0 %563 }
 0x295   :  { %5564 = vmatpush3.xpose.msk.msra.mxu1 %vm577_vm1, %v572_v41  ;;  %v570_v1 = vpop.permute.xlu1 %569 }
 0x296   :  { %5565 = vmatprep.subr.msk.mxu1 %vm577_vm1, %v570_v1 }
 0x297   :  { %v560_v43 = vpop.permute.xlu0 %559 }
 0x299   :  { %5566 = vmatpush3.xpose.msk.msra.mxu1 %vm577_vm1, %v570_v1  ;;  %v566_v10 = vpop.permute.xlu1 %565 }
 0x29a   :  { %5567 = vmatprep.subr.msk.mxu1 %vm577_vm1, %v568_v39 }
 0x29b   :  { %v556_v46 = vpop.permute.xlu0 %555 }
 0x29d   :  { %5568 = vmatpush3.xpose.msk.msra.mxu1 %vm577_vm1, %v568_v39  ;;  %v562_v24 = vpop.permute.xlu1 %561 }
 0x29e   :  { %5569 = vmatprep.subr.msk.mxu1 %vm577_vm1, %v566_v10 }
 0x29f   :  { %v552_v48 = vpop.permute.xlu0 %551 }
 0x2a1   :  { %5570 = vmatpush3.xpose.msk.msra.mxu1 %vm577_vm1, %v566_v10  ;;  %v558_v49 = vpop.permute.xlu1 %557 }
 0x2a2   :  { %5571 = vmatprep.subr.msk.mxu1 %vm577_vm1, %v564_v42 }
 0x2a3   :  { %v548_v50 = vpop.permute.xlu0 %547 }
 0x2a5   :  { %5572 = vmatpush3.xpose.msk.msra.mxu1 %vm577_vm1, %v564_v42  ;;  %v554_v11 = vpop.permute.xlu1 %553  ;;  %v4987_v42 = vunpack.c.h.bf16 %v5102_v54 }
 0x2a6   :  { %5573 = vmatprep.subr.msk.mxu1 %vm577_vm1, %v562_v24 }
 0x2a7   :  { %v962_v36 = vpop.permute.xlu0 %961 }
 0x2a8   :  { %5615 = vmatprep.subr.mxu0 %v962_v36 }
 0x2a9   :  { %5574 = vmatpush3.xpose.msk.msra.mxu1 %vm577_vm1, %v562_v24  ;;  %5616 = vmatpush3.msra.mxu0 %v962_v36  ;;  %v550_v23 = vpop.permute.xlu1 %549 }
 0x2aa   :  { %5575 = vmatprep.subr.msk.mxu1 %vm577_vm1, %v560_v43 }
 0x2ab   :  { %v958_v58 = vpop.permute.xlu0 %957 }
 0x2ad   :  { %5576 = vmatpush3.xpose.msk.msra.mxu1 %vm577_vm1, %v560_v43  ;;  %v546_v51 = vpop.permute.xlu1 %545  ;;  %v5103_v43 = vld [vmem:[%s9064_s1 + $0x20] sm:$0xff]  }
 0x2ae   :  { %5577 = vmatprep.subr.msk.mxu1 %vm577_vm1, %v558_v49 }
 0x2af   :  { %v954_v60 = vpop.permute.xlu0 %953 }
 0x2b1   :  { %5578 = vmatpush3.xpose.msk.msra.mxu1 %vm577_vm1, %v558_v49  ;;  %v956_v52 = vpop.permute.xlu1 %955  ;;  %v4991_v49 = vunpack.c.h.bf16 %v5103_v43 }
 0x2b2   :  { %5579 = vmatprep.subr.msk.mxu1 %vm577_vm1, %v556_v46 }
 0x2b3   :  { %v946_v21 = vpop.permute.xlu0 %945 }
 0x2b5   :  { %5580 = vmatpush3.xpose.msk.msra.mxu1 %vm577_vm1, %v556_v46  ;;  %v952_v28 = vpop.permute.xlu1 %951  ;;  %v4982_v46 = vunpack.c.l.bf16 %v5101_v6 }
 0x2b6   :  { %5581 = vmatprep.subr.msk.mxu1 %vm577_vm1, %v554_v11 }
 0x2b7   :  { %v942_v47 = vpop.permute.xlu0 %941 }
 0x2b9   :  { %5582 = vmatpush3.xpose.msk.msra.mxu1 %vm577_vm1, %v554_v11  ;;  %v950_v29 = vpop.permute.xlu1 %949  ;;  %v5104_v11 = vld [vmem:[%s9064_s1 + $0x28] sm:$0xff]  }
 0x2ba   :  { %5583 = vmatprep.subr.msk.mxu1 %vm577_vm1, %v552_v48 }
 0x2bb   :  { %v938_v44 = vpop.permute.xlu0 %937 }
 0x2bd   :  { %5584 = vmatpush3.xpose.msk.msra.mxu1 %vm577_vm1, %v552_v48  ;;  %v948_v53 = vpop.permute.xlu1 %947 }
 0x2be   :  { %5585 = vmatprep.subr.msk.mxu1 %vm577_vm1, %v550_v23 }
 0x2bf   :  { %v934_v62 = vpop.permute.xlu0 %933 }
 0x2c1   :  { %5586 = vmatpush3.xpose.msk.msra.mxu1 %vm577_vm1, %v550_v23  ;;  %v944_v17 = vpop.permute.xlu1 %943  ;;  %v4986_v23 = vunpack.c.l.bf16 %v5102_v54 }
 0x2c2   :  { %5587 = vmatprep.subr.msk.mxu1 %vm577_vm1, %v548_v50 }
 0x2c3   :  { %v7085_v63 = vpop.permute.xlu0 %1220 }
 0x2c5   :  { %5588 = vmatpush3.xpose.msk.msra.mxu1 %vm577_vm1, %v548_v50  ;;  %v940_v56 = vpop.permute.xlu1 %939 }
 0x2c6   :  { %5589 = vmatprep.subr.msk.mxu1 %vm577_vm1, %v546_v51 }
 0x2c9   :  { %5590 = vmatpush3.xpose.msk.msra.mxu1 %vm577_vm1, %v546_v51  ;;  %v936_v35 = vpop.permute.xlu1 %935 }
 0x2cc   :  { %5592 = vmatmul.mubr.msk.f32.vlgmr.msra.gmra.mxu1 %vm577_vm1, %v6979_v0 }
 0x2cd   :  { %5594 = vmatprep.mubr.msk.f32.mxu1 %vm577_vm1, %v6989_v34  ;;  %v932_v57 = vpop.permute.xlu1 %931 }
 0x2d0   :  { %5595 = vmatmul.mubr.msk.f32.gmra.mxu1 %vm577_vm1, %v6971_v55 }
 0x2d1   :  { %5597 = vmatprep.mubr.msk.f32.mxu1 %vm577_vm1, %v6983_v33  ;;  %v7061_v59 = vpop.permute.xlu1 %1214 }
 0x2d4   :  { %5598 = vmatmul.mubr.msk.f32.gmra.mxu1 %vm577_vm1, %v6963_v27 }
 0x2d5   :  { %5600 = vmatprep.mubr.msk.f32.mxu1 %vm577_vm1, %v6975_v31  ;;  %v960_v61 = vpop.permute.xlu1 %959 }
 0x2d6   :  { %5617 = vmatprep.subr.mxu0 %v960_v61 }
 0x2d7   :  { %5618 = vmatpush3.msra.mxu0 %v960_v61  ;;  %v5106_v61 = vld [vmem:[%s9064_s1 + $0x38] sm:$0xff]  }
 0x2d8   :  { %5601 = vmatmul.mubr.msk.f32.gmra.mxu1 %vm577_vm1, %v6955_v16  ;;  %5619 = vmatprep.subr.mxu0 %v958_v58  ;;  %v5003_v37 = vunpack.c.h.bf16 %v5106_v61 }
 0x2d9   :  { %5603 = vmatprep.mubr.msk.f32.mxu1 %vm577_vm1, %v6967_v30  ;;  %5620 = vmatpush3.msra.mxu0 %v958_v58  ;;  %v7175_v54 = vpop.permute.xlu1 %1218 }
 0x2da   :  { %5621 = vmatprep.subr.mxu0 %v956_v52 }
 0x2db   :  { %5622 = vmatpush3.msra.mxu0 %v956_v52 }
 0x2dc   :  { %5604 = vmatmul.mubr.msk.f32.gmra.mxu1 %vm577_vm1, %v6947_v19  ;;  %5623 = vmatprep.subr.mxu0 %v954_v60 }
 0x2dd   :  { %5606 = vmatprep.mubr.msk.f32.mxu1 %vm577_vm1, %v6959_v26  ;;  %5624 = vmatpush3.msra.mxu0 %v954_v60 }
 0x2de   :  { %5625 = vmatprep.subr.mxu0 %v952_v28 }
 0x2df   :  { %5626 = vmatpush3.msra.mxu0 %v952_v28  ;;  %v4995_v28 = vunpack.c.h.bf16 %v5104_v11 }
 0x2e0   :  { %5607 = vmatmul.mubr.msk.f32.gmra.mxu1 %vm577_vm1, %v6939_v15  ;;  %5627 = vmatprep.subr.mxu0 %v950_v29 }
 0x2e1   :  { %5609 = vmatprep.mubr.msk.f32.mxu1 %vm577_vm1, %v6951_v22  ;;  %5628 = vmatpush3.msra.mxu0 %v950_v29 }
 0x2e2   :  { %5629 = vmatprep.subr.mxu0 %v948_v53 }
 0x2e3   :  { %5630 = vmatpush3.msra.mxu0 %v948_v53  ;;  %v5105_v53 = vld [vmem:[%s9064_s1 + $0x30] sm:$0xff]  }
 0x2e4   :  { %5610 = vmatmul.mubr.msk.f32.gmra.mxu1 %vm577_vm1, %v6943_v18  ;;  %5631 = vmatprep.subr.mxu0 %v946_v21  ;;  %v4999_v58 = vunpack.c.h.bf16 %v5105_v53 }
 0x2e5   :  { %5612 = vmatprep.mubr.msk.f32.mxu1 %vm577_vm1, %v6935_v14  ;;  %5632 = vmatpush3.msra.mxu0 %v946_v21 }
 0x2e6   :  { %5633 = vmatprep.subr.mxu0 %v944_v17 }
 0x2e7   :  { %5634 = vmatpush3.msra.mxu0 %v944_v17 }
 0x2e8   :  { %5613 = vmatmul.mubr.msk.f32.gmra.mxu1 %vm577_vm1, %v6933_v13  ;;  %5635 = vmatprep.subr.mxu0 %v942_v47 }
 0x2e9   :  { %5636 = vmatpush3.msra.mxu0 %v942_v47  ;;  %v4994_v47 = vunpack.c.l.bf16 %v5104_v11 }
 0x2ea   :  { %5637 = vmatprep.subr.mxu0 %v940_v56 }
 0x2eb   :  { %5638 = vmatpush3.msra.mxu0 %v940_v56  ;;  %v4990_v56 = vunpack.c.l.bf16 %v5103_v43 }
 0x2ec   :  { %5639 = vmatprep.subr.mxu0 %v938_v44 }
 0x2ed   :  { %5640 = vmatpush3.msra.mxu0 %v938_v44 }
 0x2ee   :  { %5641 = vmatprep.subr.mxu0 %v936_v35 }
 0x2ef   :  { %5642 = vmatpush3.msra.mxu0 %v936_v35 }
 0x2f0   :  { %5643 = vmatprep.subr.mxu0 %v934_v62 }
 0x2f1   :  { %5644 = vmatpush3.msra.mxu0 %v934_v62 }
 0x2f2   :  { %5645 = vmatprep.subr.mxu0 %v932_v57 }
 0x2f3   :  { %5646 = vmatpush3.msra.mxu0 %v932_v57 }
 0x2f4   :  { %5671 = vmatprep.subr.msk.mxu0 %vm577_vm1, %v7085_v63 }
 0x38c   :  { %v5593_v3 = vpop.f32.mrf.mxu1 }
 0x38d   :  { %v7095_v40 = vadd.f32 %v5593_v3, %v4975_v32  ;;  %v4998_v3 = vunpack.c.l.bf16 %v5105_v53 }
 0x38e   :  { %v708_v5 = vpop.f32.mrf.mxu1 }
 0x38f   :  { %v7100_v7 = vadd.f32 %v4974_v2, %v708_v5  ;;  %789 = vmax.xlane.f32.xlu1 %v7095_v40 }
 0x390   :  { %v5596_v45 = vpop.f32.mrf.mxu1 }
 0x391   :  { %787 = vmax.xlane.f32.xlu0 %v7100_v7  ;;  %v7107_v20 = vadd.f32 %v5596_v45, %v4979_v8  ;;  %v5002_v8 = vunpack.c.l.bf16 %v5106_v61 }
 0x392   :  { %v718_v12 = vpop.f32.mrf.mxu1 }
 0x393   :  { %v7115_v10 = vadd.f32 %v4978_v38, %v718_v12  ;;  %v7173_v12 = vpop.permute.xlu0 %1216 }
 0x394   :  { %v5599_v39 = vpop.f32.mrf.mxu1 }
 0x395   :  { %v7109_v41 = vadd.f32 %v5599_v39, %v4983_v9  ;;  %793 = vmax.xlane.f32.xlu0 %v7107_v20 }
 0x396   :  { %v728_v1 = vpop.f32.mrf.mxu1 }
 0x397   :  { %797 = vmax.xlane.f32.xlu1 %v7109_v41  ;;  %v7124_v36 = vadd.f32 %v4982_v46, %v728_v1  ;;  %v7177_v38 = vpop.permute.xlu0 %1212 }
 0x398   :  { %v5602_v24 = vpop.f32.mrf.mxu1 }
 0x399   :  { %v7118_v48 = vadd.f32 %v5602_v24, %v4987_v42  ;;  %791 = vmax.xlane.f32.xlu0 %v7115_v10 }
 0x39a   :  { %v738_v50 = vpop.f32.mrf.mxu1 }
 0x39b   :  { %801 = vmax.xlane.f32.xlu1 %v7118_v48  ;;  %v7133_v17 = vadd.f32 %v4986_v23, %v738_v50 }
 0x39c   :  { %v5605_v51 = vpop.f32.mrf.mxu1 }
 0x39d   :  { %v7127_v52 = vadd.f32 %v5605_v51, %v4991_v49  ;;  %795 = vmax.xlane.f32.xlu0 %v7124_v36 }
 0x39e   :  { %v748_v29 = vpop.f32.mrf.mxu1 }
 0x39f   :  { %805 = vmax.xlane.f32.xlu1 %v7127_v52  ;;  %v7142_v21 = vadd.f32 %v4990_v56, %v748_v29 }
 0x3a0   :  { %v5608_v35 = vpop.f32.mrf.mxu1 }
 0x3a1   :  { %v7136_v57 = vadd.f32 %v5608_v35, %v4995_v28  ;;  %799 = vmax.xlane.f32.xlu0 %v7133_v17 }
 0x3a2   :  { %v758_v60 = vpop.f32.mrf.mxu1 }
 0x3a3   :  { %809 = vmax.xlane.f32.xlu1 %v7136_v57  ;;  %v7148_v2 = vadd.f32 %v4994_v47, %v758_v60 }
 0x3a4   :  { %v5611_v44 = vpop.f32.mrf.mxu1 }
 0x3a5   :  { %v7145_v62 = vadd.f32 %v5611_v44, %v4999_v58  ;;  %803 = vmax.xlane.f32.xlu0 %v7142_v21 }
 0x3a6   :  { %v768_v32 = vpop.f32.mrf.mxu1 }
 0x3a7   :  { %813 = vmax.xlane.f32.xlu1 %v7145_v62  ;;  %v7154_v6 = vadd.f32 %v4998_v3, %v768_v32 }
 0x3a8   :  { %v5614_v4 = vpop.f32.mrf.mxu1 }
 0x3a9   :  { %v7151_v5 = vadd.f32 %v5614_v4, %v5003_v37  ;;  %807 = vmax.xlane.f32.xlu0 %v7148_v2 }
 0x3aa   :  { %v778_v45 = vpop.f32.mrf.mxu1 }
 0x3ab   :  { %817 = vmax.xlane.f32.xlu1 %v7151_v5  ;;  %v7158_v9 = vadd.f32 %v5002_v8, %v778_v45 }
 0x3ad   :  { %811 = vmax.xlane.f32.xlu0 %v7154_v6 }
 0x3b1   :  { %815 = vmax.xlane.f32.xlu0 %v7158_v9 }
 0x3bc   :  { %1208 = vrot.lane.b32.xlu1 %v6947_v19, %s6612_s21 }
 0x3c0   :  { %1204 = vrot.lane.b32.xlu1 %v6955_v16, %s6612_s21 }
 0x3c4   :  { %1202 = vrot.lane.b32.xlu1 %v6975_v31, %s6612_s21 }
 0x3c7   :  { %1210 = vrot.lane.b32.xlu0 %v6959_v26, %s6612_s21 }
 0x3c8   :  { %1200 = vrot.lane.b32.xlu1 %v6963_v27, %s6612_s21 }
 0x3cc   :  { %1198 = vrot.lane.b32.xlu1 %v6983_v33, %s6612_s21 }
 0x418   :  { %v790_v39 = vpop.xlane.xlu1 %789 }
 0x419   :  { %v820_v42 = vsub.f32 %v7095_v40, %v790_v39 }
 0x41a   :  { %v788_v1 = vpop.xlane.xlu0 %787 }
 0x41b   :  { %v837_v43 = vmul.f32 1.442695, %v820_v42  ;;  %v819_v46 = vsub.f32 %v7100_v7, %v788_v1 }
 0x41d   :  { %6274 = vpow2.f32 %v837_v43  ;;  %v835_v24 = vmul.f32 1.442695, %v819_v46 }
 0x41e   :  { %v794_v49 = vpop.xlane.xlu0 %793 }
 0x41f   :  { %6276 = vpow2.f32 %v835_v24  ;;  %v822_v50 = vsub.f32 %v7107_v20, %v794_v49 }
 0x420   :  { %v798_v11 = vpop.xlane.xlu1 %797 }
 0x421   :  { %v841_v23 = vmul.f32 1.442695, %v822_v50  ;;  %v824_v51 = vsub.f32 %v7109_v41, %v798_v11 }
 0x422   :  { %v792_v28 = vpop.xlane.xlu0 %791 }
 0x423   :  { %6278 = vpow2.f32 %v841_v23  ;;  %v845_v29 = vmul.f32 1.442695, %v824_v51  ;;  %v821_v46 = vsub.f32 %v7115_v10, %v792_v28 }
 0x424   :  { %v802_v53 = vpop.xlane.xlu1 %801 }
 0x425   :  { %6280 = vpow2.f32 %v845_v29  ;;  %v826_v40 = vsub.f32 %v7118_v48, %v802_v53  ;;  %v839_v50 = vmul.f32 1.442695, %v821_v46 }
 0x426   :  { %v796_v56 = vpop.xlane.xlu0 %795 }
 0x427   :  { %v823_v7 = vsub.f32 %v7124_v36, %v796_v56  ;;  %v849_v20 = vmul.f32 1.442695, %v826_v40 }
 0x428   :  { %v806_v35 = vpop.xlane.xlu1 %805 }
 0x429   :  { %v843_v58 = vmul.f32 1.442695, %v823_v7  ;;  %v828_v47 = vsub.f32 %v7127_v52, %v806_v35 }
 0x42a   :  { %v7185_v60 = vpop.eup %6274  ;;  %v800_v61 = vpop.xlane.xlu0 %799 }
 0x42b   :  { %6282 = vpow2.f32 %v843_v58  ;;  %869 = vadd.xlane.f32.xlu0 %v7185_v60  ;;  %v853_v48 = vmul.f32 1.442695, %v828_v47  ;;  %v825_v11 = vsub.f32 %v7133_v17, %v800_v61 }
 0x42c   :  { %v7189_v41 = vpop.eup %6276  ;;  %6284 = vpow2.f32 %v849_v20  ;;  %v810_v24 = vpop.xlane.xlu1 %809 }
 0x42d   :  { %867 = vadd.xlane.f32.xlu1 %v7189_v41  ;;  %6286 = vpow2.f32 %v853_v48  ;;  %v847_v51 = vmul.f32 1.442695, %v825_v11  ;;  %v830_v29 = vsub.f32 %v7136_v57, %v810_v24 }
 0x42e   :  { %v804_v44 = vpop.xlane.xlu0 %803 }
 0x42f   :  { %v827_v36 = vsub.f32 %v7142_v21, %v804_v44  ;;  %v857_v53 = vmul.f32 1.442695, %v830_v29 }
 0x430   :  { %v7193_v37 = vpop.eup %6278  ;;  %v814_v23 = vpop.xlane.xlu1 %813 }
 0x431   :  { %873 = vadd.xlane.f32.xlu1 %v7193_v37  ;;  %v851_v3 = vmul.f32 1.442695, %v827_v36  ;;  %v832_v56 = vsub.f32 %v7145_v62, %v814_v23 }
 0x432   :  { %v808_v32 = vpop.xlane.xlu0 %807  ;;  %v7197_v4 = vpop.eup %6280 }
 0x433   :  { %v829_v52 = vsub.f32 %v7148_v2, %v808_v32  ;;  %6288 = vpow2.f32 %v851_v3  ;;  %v861_v10 = vmul.f32 1.442695, %v832_v56 }
 0x434   :  { %v818_v40 = vpop.xlane.xlu1 %817 }
 0x435   :  { %877 = vadd.xlane.f32.xlu1 %v7197_v4  ;;  %v855_v45 = vmul.f32 1.442695, %v829_v52  ;;  %v834_v28 = vsub.f32 %v7151_v5, %v818_v40 }
 0x436   :  { %v812_v8 = vpop.xlane.xlu0 %811 }
 0x437   :  { %v831_v39 = vsub.f32 %v7154_v6, %v812_v8  ;;  %6290 = vpow2.f32 %v855_v45  ;;  %v865_v7 = vmul.f32 1.442695, %v834_v28 }
 0x438   :  { %v7201_v42 = vpop.eup %6282 }
 0x439   :  { %875 = vadd.xlane.f32.xlu1 %v7201_v42  ;;  %v859_v21 = vmul.f32 1.442695, %v831_v39  ;;  %v7204_v1 = vpop.eup %6284 }
 0x43a   :  { %v7207_v2 = vpop.eup %6286  ;;  %v816_v58 = vpop.xlane.xlu0 %815 }
 0x43b   :  { %6292 = vpow2.f32 %v859_v21  ;;  %v833_v61 = vsub.f32 %v7158_v9, %v816_v58  ;;  %v1209_v9 = vpop.permute.xlu1 %1208 }
 0x43c   :  { %6294 = vpow2.f32 %v839_v50 }
 0x43d   :  { %881 = vadd.xlane.f32.xlu1 %v7204_v1  ;;  %6296 = vpow2.f32 %v847_v51  ;;  %v863_v20 = vmul.f32 1.442695, %v833_v61 }
 0x43e   :  { %6298 = vpow2.f32 %v857_v53  ;;  %v1211_v32 = vpop.permute.xlu0 %1210 }
 0x43f   :  { %6300 = vpow2.f32 %v861_v10  ;;  %v1205_v44 = vpop.permute.xlu1 %1204 }
 0x440   :  { %v7212_v43 = vpop.eup %6288  ;;  %6302 = vpow2.f32 %v865_v7 }
 0x441   :  { %1206 = vrot.lane.b32.xlu0 %v6967_v30, %s6612_s21  ;;  %885 = vadd.xlane.f32.xlu1 %v7207_v2  ;;  %6304 = vpow2.f32 %v863_v20 }
 0x443   :  { %v7273_v48 = vpop.permute.xlu1 %1202 }
 0x444   :  { %v7215_v6 = vpop.eup %6290 }
 0x445   :  { %883 = vadd.xlane.f32.xlu1 %v7212_v43 }
 0x447   :  { %v7283_v36 = vpop.permute.xlu1 %1200 }
 0x448   :  { %v7219_v49 = vpop.eup %6292 }
 0x449   :  { %887 = vadd.xlane.f32.xlu1 %v7215_v6  ;;  %v7228_v17 = vpop.eup %6294 }
 0x44a   :  { %v7233_v57 = vpop.eup %6296 }
 0x44b   :  { %v7238_v62 = vpop.eup %6298  ;;  %v7289_v3 = vpop.permute.xlu1 %1198 }
 0x44c   :  { %v7243_v5 = vpop.eup %6300 }
 0x44d   :  { %891 = vadd.xlane.f32.xlu1 %v7219_v49  ;;  %v7246_v35 = vpop.eup %6302 }
 0x44e   :  { %v7254_v47 = vpop.eup %6304 }
 0x45e   :  { %1194 = vrot.lane.b32.xlu1 %v6989_v34, %s6612_s21 }
 0x460   :  { %871 = vadd.xlane.f32.xlu0 %v7228_v17 }
 0x462   :  { %1192 = vrot.lane.b32.xlu1 %v6979_v0, %s6612_s21 }
 0x464   :  { %879 = vadd.xlane.f32.xlu0 %v7233_v57 }
 0x466   :  { %1190 = vrot.lane.b32.xlu1 %v6929_v25, %s6612_s21 }
 0x468   :  { %889 = vadd.xlane.f32.xlu0 %v7238_v62 }
 0x46a   :  { %1158 = vrot.lane.b32.xlu1 %v6929_v25, %s6613_s14 }
 0x46c   :  { %893 = vadd.xlane.f32.xlu0 %v7243_v5 }
 0x470   :  { %897 = vadd.xlane.f32.xlu0 %v7246_v35 }
 0x486   :  { %1196 = vrot.lane.b32.xlu0 %v6971_v55, %s6612_s21 }
 0x48a   :  { %1164 = vrot.lane.b32.xlu0 %v6971_v55, %s6613_s14 }
 0x48e   :  { %895 = vadd.xlane.f32.xlu1 %v7254_v47  ;;  %1168 = vrot.lane.b32.xlu0 %v6963_v27, %s6613_s14 }
 0x492   :  { %1172 = vrot.lane.b32.xlu0 %v6955_v16, %s6613_s14 }
 0x496   :  { %1176 = vrot.lane.b32.xlu0 %v6947_v19, %s6613_s14 }
 0x49a   :  { %1180 = vrot.lane.b32.xlu0 %v6939_v15, %s6613_s14 }
 0x49e   :  { %1184 = vrot.lane.b32.xlu0 %v6943_v18, %s6613_s14 }
 0x49f   :  { %1160 = vrot.lane.b32.xlu1 %v6979_v0, %s6613_s14 }
 0x4a2   :  { %1188 = vrot.lane.b32.xlu0 %v6933_v13, %s6613_s14 }
 0x4a3   :  { %1162 = vrot.lane.b32.xlu1 %v6989_v34, %s6613_s14 }
 0x4a6   :  { %1605 = vrot.lane.b32.xlu0 %v6933_v13, %s6614_s15 }
 0x4a7   :  { %1166 = vrot.lane.b32.xlu1 %v6983_v33, %s6613_s14 }
 0x4aa   :  { %1601 = vrot.lane.b32.xlu0 %v6943_v18, %s6614_s15 }
 0x4ab   :  { %1170 = vrot.lane.b32.xlu1 %v6975_v31, %s6613_s14 }
 0x4ae   :  { %1595 = vrot.lane.b32.xlu0 %v6959_v26, %s6614_s15 }
 0x4af   :  { %1174 = vrot.lane.b32.xlu1 %v6967_v30, %s6613_s14 }
 0x4b2   :  { %1591 = vrot.lane.b32.xlu0 %v6967_v30, %s6614_s15 }
 0x4b3   :  { %1178 = vrot.lane.b32.xlu1 %v6959_v26, %s6613_s14 }
 0x4b4   :  { %v870_v52 = vpop.xlane.xlu0 %869 }
 0x4b5   :  { %6306 = vrcp.f32 %v870_v52 }
 0x4b6   :  { %1587 = vrot.lane.b32.xlu0 %v6975_v31, %s6614_s15  ;;  %v868_v8 = vpop.xlane.xlu1 %867 }
 0x4b7   :  { %6308 = vrcp.f32 %v868_v8  ;;  %1182 = vrot.lane.b32.xlu1 %v6951_v22, %s6613_s14 }
 0x4ba   :  { %1583 = vrot.lane.b32.xlu0 %v6983_v33, %s6614_s15  ;;  %v874_v24 = vpop.xlane.xlu1 %873 }
 0x4bb   :  { %1186 = vrot.lane.b32.xlu1 %v6935_v14, %s6613_s14  ;;  %6310 = vrcp.f32 %v874_v24  ;;  %s6617_s14 = smov 72  }
 0x4bf   :  { %1603 = vrot.lane.b32.xlu1 %v6935_v14, %s6614_s15 }
 0x4c2   :  { %v6307_v45 = vpop.eup %6306 }
 0x4c3   :  { %1599 = vrot.lane.b32.xlu1 %v6951_v22, %s6614_s15  ;;  %v916_v46 = vmul.f32 %v6307_v45, %v7185_v60  ;;  %v1207_v60 = vpop.permute.xlu0 %1206 }
 0x4c4   :  { %v6309_v39 = vpop.eup %6308 }
 0x4c5   :  { %v915_v21 = vmul.f32 %v6309_v39, %v7189_v41 }
 0x4c7   :  { %1597 = vrot.lane.b32.xlu1 %v6939_v15, %s6614_s15  ;;  %5647 = vmatprep.mubr.f32.mxu0 %v915_v21 }
 0x4c8   :  { %5648 = vmatmul.mubr.f32.vlgmr.msra.gmra.mxu0 %v916_v46  ;;  %v6311_v51 = vpop.eup %6310 }
 0x4c9   :  { %5672 = vmatpush3.xpose.msk.msra.mxu0 %vm577_vm1, %v7085_v63  ;;  %v878_v63 = vpop.xlane.xlu1 %877  ;;  %v918_v7 = vmul.f32 %v6311_v51, %v7193_v37 }
 0x4ca   :  { %5673 = vmatprep.subr.msk.mxu0 %vm577_vm1, %v7175_v54 }
 0x4cb   :  { %1593 = vrot.lane.b32.xlu1 %v6947_v19, %s6614_s15 }
 0x4cd   :  { %5674 = vmatpush3.xpose.msk.msra.mxu0 %vm577_vm1, %v7175_v54  ;;  %v876_v54 = vpop.xlane.xlu1 %875 }
 0x4ce   :  { %5675 = vmatprep.subr.msk.mxu0 %vm577_vm1, %v7173_v12  ;;  %6312 = vrcp.f32 %v876_v54 }
 0x4cf   :  { %1589 = vrot.lane.b32.xlu1 %v6955_v16, %s6614_s15 }
 0x4d1   :  { %5676 = vmatpush3.xpose.msk.msra.mxu0 %vm577_vm1, %v7173_v12  ;;  %v882_v12 = vpop.xlane.xlu1 %881 }
 0x4d2   :  { %5677 = vmatprep.subr.msk.mxu0 %vm577_vm1, %v7061_v59 }
 0x4d3   :  { %1585 = vrot.lane.b32.xlu1 %v6963_v27, %s6614_s15 }
 0x4d5   :  { %5678 = vmatpush3.xpose.msk.msra.mxu0 %vm577_vm1, %v7061_v59  ;;  %v886_v59 = vpop.xlane.xlu1 %885 }
 0x4d6   :  { %5679 = vmatprep.subr.msk.mxu0 %vm577_vm1, %v7177_v38 }
 0x4d9   :  { %5680 = vmatpush3.xpose.msk.msra.mxu0 %vm577_vm1, %v7177_v38  ;;  %v884_v41 = vpop.xlane.xlu1 %883 }
 0x4da   :  { %5681 = vmatprep.subr.msk.mxu0 %vm577_vm1, %v1211_v32 }
 0x4db   :  { %v6313_v53 = vpop.eup %6312 }
 0x4dc   :  { %v919_v61 = vmul.f32 %v6313_v53, %v7201_v42 }
 0x4dd   :  { %5682 = vmatpush3.xpose.msk.msra.mxu0 %vm577_vm1, %v1211_v32  ;;  %v888_v11 = vpop.xlane.xlu1 %887 }
 0x4de   :  { %5683 = vmatprep.subr.msk.mxu0 %vm577_vm1, %v1209_v9 }
 0x4e1   :  { %5684 = vmatpush3.xpose.msk.msra.mxu0 %vm577_vm1, %v1209_v9  ;;  %v892_v56 = vpop.xlane.xlu1 %891 }
 0x4e2   :  { %5685 = vmatprep.subr.msk.mxu0 %vm577_vm1, %v1207_v60 }
 0x4e5   :  { %5686 = vmatpush3.xpose.msk.msra.mxu0 %vm577_vm1, %v1207_v60  ;;  %v1195_v9 = vpop.permute.xlu1 %1194 }
 0x4e6   :  { %5687 = vmatprep.subr.msk.mxu0 %vm577_vm1, %v1205_v44 }
 0x4e9   :  { %5688 = vmatpush3.xpose.msk.msra.mxu0 %vm577_vm1, %v1205_v44  ;;  %v872_v38 = vpop.xlane.xlu0 %871  ;;  %v1193_v52 = vpop.permute.xlu1 %1192 }
 0x4ea   :  { %6314 = vrcp.f32 %v872_v38  ;;  %5689 = vmatprep.subr.msk.mxu0 %vm577_vm1, %v7273_v48 }
 0x4eb   :  { %6316 = vrcp.f32 %v878_v63 }
 0x4ed   :  { %5690 = vmatpush3.xpose.msk.msra.mxu0 %vm577_vm1, %v7273_v48  ;;  %v880_v50 = vpop.xlane.xlu0 %879 }
 0x4ee   :  { %6318 = vrcp.f32 %v880_v50  ;;  %5691 = vmatprep.subr.msk.mxu0 %vm577_vm1, %v7283_v36 }
 0x4ef   :  { %6320 = vrcp.f32 %v882_v12 }
 0x4f0   :  { %6322 = vrcp.f32 %v884_v41 }
 0x4f1   :  { %5692 = vmatpush3.xpose.msk.msra.mxu0 %vm577_vm1, %v7283_v36  ;;  %v890_v23 = vpop.xlane.xlu0 %889  ;;  %6324 = vrcp.f32 %v886_v59 }
 0x4f2   :  { %5693 = vmatprep.subr.msk.mxu0 %vm577_vm1, %v7289_v3  ;;  %6326 = vrcp.f32 %v888_v11 }
 0x4f3   :  { %6328 = vrcp.f32 %v890_v23 }
 0x4f4   :  { %6330 = vrcp.f32 %v892_v56 }
 0x4f5   :  { %5694 = vmatpush3.xpose.msk.msra.mxu0 %vm577_vm1, %v7289_v3  ;;  %v894_v29 = vpop.xlane.xlu0 %893 }
 0x4f6   :  { %6332 = vrcp.f32 %v894_v29 }
 0x4f7   :  { %v6315_v40 = vpop.eup %6314 }
 0x4f8   :  { %v917_v10 = vmul.f32 %v6315_v40, %v7228_v17  ;;  %v6317_v58 = vpop.eup %6316 }
 0x4f9   :  { %v898_v28 = vpop.xlane.xlu0 %897  ;;  %v920_v48 = vmul.f32 %v6317_v58, %v7197_v4 }
 0x4fa   :  { %5650 = vmatprep.mubr.f32.mxu0 %v917_v10  ;;  %6334 = vrcp.f32 %v898_v28 }
 0x4fb   :  { %v6319_v20 = vpop.eup %6318  ;;  %5651 = vmatmul.mubr.f32.gmra.mxu0 %v918_v7 }
 0x4fc   :  { %5653 = vmatprep.mubr.f32.mxu0 %v919_v61  ;;  %v6321_v36 = vpop.eup %6320  ;;  %v921_v17 = vmul.f32 %v6319_v20, %v7233_v57 }
 0x4fd   :  { %v1197_v44 = vpop.permute.xlu0 %1196  ;;  %v6323_v32 = vpop.eup %6322  ;;  %v922_v42 = vmul.f32 %v6321_v36, %v7204_v1 }
 0x4fe   :  { %5695 = vmatprep.subr.msk.mxu0 %vm577_vm1, %v1197_v44  ;;  %v6325_v3 = vpop.eup %6324  ;;  %v923_v8 = vmul.f32 %v6323_v32, %v7212_v43  ;;  %v1191_v1 = vpop.permute.xlu1 %1190 }
 0x4ff   :  { %5654 = vmatmul.mubr.f32.gmra.mxu0 %v920_v48  ;;  %v6327_v4 = vpop.eup %6326  ;;  %v924_v45 = vmul.f32 %v6325_v3, %v7207_v2  ;;  %v1124_v2 = vld [vmem:[%s9065_s4] sm:$0xff] }
 0x500   :  { %5696 = vmatpush3.xpose.msk.msra.mxu0 %vm577_vm1, %v1197_v44  ;;  %5656 = vmatprep.mubr.f32.mxu0 %v921_v17  ;;  %v6329_v39 = vpop.eup %6328  ;;  %v925_v21 = vmul.f32 %v6327_v4, %v7215_v6 }
 0x501   :  { %5697 = vmatprep.subr.msk.mxu0 %vm577_vm1, %v1195_v9  ;;  %v1165_v37 = vpop.permute.xlu0 %1164  ;;  %v6331_v46 = vpop.eup %6330  ;;  %v926_v24 = vmul.f32 %v6329_v39, %v7238_v62 }
 0x502   :  { %v927_v54 = vmul.f32 %v6331_v46, %v7219_v49  ;;  %v1159_v59 = vpop.permute.xlu1 %1158 }
 0x503   :  { %5657 = vmatmul.mubr.f32.gmra.mxu0 %v922_v42  ;;  %v6333_v63 = vpop.eup %6332 }
 0x504   :  { %5698 = vmatpush3.xpose.msk.msra.mxu0 %vm577_vm1, %v1195_v9  ;;  %5659 = vmatprep.mubr.f32.mxu0 %v923_v8  ;;  %v928_v12 = vmul.f32 %v6333_v63, %v7243_v5  ;;  %v5107_v63 = vld [vmem:[%s9064_s1 + $0x40] sm:$0xff]  }
 0x505   :  { %5699 = vmatprep.subr.msk.mxu0 %vm577_vm1, %v1193_v52  ;;  %v1169_v57 = vpop.permute.xlu0 %1168 }
 0x507   :  { %5660 = vmatmul.mubr.f32.gmra.mxu0 %v924_v45  ;;  %v6335_v51 = vpop.eup %6334 }
 0x508   :  { %5700 = vmatpush3.xpose.msk.msra.mxu0 %vm577_vm1, %v1193_v52  ;;  %5662 = vmatprep.mubr.f32.mxu0 %v925_v21  ;;  %v930_v56 = vmul.f32 %v6335_v51, %v7246_v35 }
 0x509   :  { %5701 = vmatprep.subr.msk.mxu0 %vm577_vm1, %v1191_v1  ;;  %v1173_v43 = vpop.permute.xlu0 %1172 }
 0x50b   :  { %5663 = vmatmul.mubr.f32.gmra.mxu0 %v926_v24 }
 0x50c   :  { %5702 = vmatpush3.xpose.msk.msra.mxu0 %vm577_vm1, %v1191_v1  ;;  %5665 = vmatprep.mubr.f32.mxu0 %v927_v54 }
 0x50d   :  { %v1177_v6 = vpop.permute.xlu0 %1176  ;;  %5809 = vmatprep.subr.mxu0 %v1124_v2 }
 0x50f   :  { %5666 = vmatmul.mubr.f32.gmra.mxu0 %v928_v12  ;;  %v5006_v12 = vunpack.c.l.bf16 %v5107_v63 }
 0x511   :  { %v1181_v60 = vpop.permute.xlu0 %1180 }
 0x515   :  { %v1185_v38 = vpop.permute.xlu0 %1184 }
 0x517   :  { %v896_v62 = vpop.xlane.xlu1 %895 }
 0x518   :  { %6336 = vrcp.f32 %v896_v62 }
 0x519   :  { %v1189_v49 = vpop.permute.xlu0 %1188 }
 0x51b   :  { %v1161_v41 = vpop.permute.xlu1 %1160 }
 0x51d   :  { %v1606_v50 = vpop.permute.xlu0 %1605 }
 0x51e   :  { %5727 = vmatprep.subr.mxu1 %v1606_v50 }
 0x51f   :  { %5728 = vmatpush3.msra.mxu1 %v1606_v50  ;;  %v1163_v11 = vpop.permute.xlu1 %1162 }
 0x523   :  { %v1167_v23 = vpop.permute.xlu1 %1166 }
 0x525   :  { %v6337_v29 = vpop.eup %6336 }
 0x526   :  { %v929_v53 = vmul.f32 %v6337_v29, %v7254_v47  ;;  %v1602_v47 = vpop.permute.xlu0 %1601 }
 0x527   :  { %v1171_v5 = vpop.permute.xlu1 %1170 }
 0x528   :  { %5668 = vmatprep.mubr.f32.mxu0 %v929_v53 }
 0x529   :  { %5669 = vmatmul.mubr.f32.gmra.mxu0 %v930_v56 }
 0x52a   :  { %5703 = vmatprep.mubr.msk.f32.mxu0 %vm577_vm1, %v1159_v59  ;;  %v1596_v58 = vpop.permute.xlu0 %1595  ;;  %v5108_v59 = vld [vmem:[%s9064_s1 + $0x48] sm:$0xff]  }
 0x52b   :  { %v1175_v40 = vpop.permute.xlu1 %1174  ;;  %v5010_v50 = vunpack.c.l.bf16 %v5108_v59 }
 0x52d   :  { %5704 = vmatmul.mubr.msk.f32.vlgmr.msra.gmra.mxu0 %vm577_vm1, %v1161_v41  ;;  %v5011_v41 = vunpack.c.h.bf16 %v5108_v59 }
 0x52e   :  { %5706 = vmatprep.mubr.msk.f32.mxu0 %vm577_vm1, %v1163_v11  ;;  %5810 = vmatpush3.msra.mxu0 %v1124_v2  ;;  %v1592_v9 = vpop.permute.xlu0 %1591  ;;  %v5007_v2 = vunpack.c.h.bf16 %v5107_v63  ;;  %v5114_v63 = vld [vmem:[%s9064_s1 + $0x78] sm:$0xff]  }
 0x52f   :  { %v1179_v10 = vpop.permute.xlu1 %1178 }
 0x531   :  { %5707 = vmatmul.mubr.msk.f32.gmra.mxu0 %vm577_vm1, %v1165_v37 }
 0x532   :  { %5709 = vmatprep.mubr.msk.f32.mxu0 %vm577_vm1, %v1167_v23  ;;  %v1588_v48 = vpop.permute.xlu0 %1587  ;;  %v5109_v23 = vld [vmem:[%s9064_s1 + $0x50] sm:$0xff]  }
 0x533   :  { %v1183_v28 = vpop.permute.xlu1 %1182  ;;  %v5014_v56 = vunpack.c.l.bf16 %v5109_v23 }
 0x535   :  { %5710 = vmatmul.mubr.msk.f32.gmra.mxu0 %vm577_vm1, %v1169_v57 }
 0x536   :  { %5712 = vmatprep.mubr.msk.f32.mxu0 %vm577_vm1, %v1171_v5  ;;  %v1584_v32 = vpop.permute.xlu0 %1583  ;;  %v5015_v5 = vunpack.c.h.bf16 %v5109_v23 }
 0x537   :  { %v1187_v35 = vpop.permute.xlu1 %1186 }
 0x539   :  { %5713 = vmatmul.mubr.msk.f32.gmra.mxu0 %vm577_vm1, %v1173_v43 }
 0x53a   :  { %5715 = vmatprep.mubr.msk.f32.mxu0 %vm577_vm1, %v1175_v40 }
 0x53b   :  { %v1604_v7 = vpop.permute.xlu1 %1603 }
 0x53c   :  { %5729 = vmatprep.subr.mxu1 %v1604_v7 }
 0x53d   :  { %5716 = vmatmul.mubr.msk.f32.gmra.mxu0 %vm577_vm1, %v1177_v6  ;;  %5730 = vmatpush3.msra.mxu1 %v1604_v7 }
 0x53e   :  { %5718 = vmatprep.mubr.msk.f32.mxu0 %vm577_vm1, %v1179_v10  ;;  %5731 = vmatprep.subr.mxu1 %v1602_v47  ;;  %v5110_v10 = vld [vmem:[%s9064_s1 + $0x58] sm:$0xff]  }
 0x53f   :  { %5732 = vmatpush3.msra.mxu1 %v1602_v47  ;;  %v1600_v61 = vpop.permute.xlu1 %1599  ;;  %v5019_v7 = vunpack.c.h.bf16 %v5110_v10 }
 0x540   :  { %5733 = vmatprep.subr.mxu1 %v1600_v61 }
 0x541   :  { %5719 = vmatmul.mubr.msk.f32.gmra.mxu0 %vm577_vm1, %v1181_v60  ;;  %5734 = vmatpush3.msra.mxu1 %v1600_v61 }
 0x542   :  { %5721 = vmatprep.mubr.msk.f32.mxu0 %vm577_vm1, %v1183_v28 }
 0x543   :  { %v1598_v20 = vpop.permute.xlu1 %1597 }
 0x544   :  { %5735 = vmatprep.subr.mxu1 %v1598_v20 }
 0x545   :  { %5722 = vmatmul.mubr.msk.f32.gmra.mxu0 %vm577_vm1, %v1185_v38  ;;  %5736 = vmatpush3.msra.mxu1 %v1598_v20  ;;  %v5111_v20 = vld [vmem:[%s9064_s1 + $0x60] sm:$0xff]  }
 0x546   :  { %5724 = vmatprep.mubr.msk.f32.mxu0 %vm577_vm1, %v1187_v35  ;;  %5737 = vmatprep.subr.mxu1 %v1596_v58 }
 0x547   :  { %5738 = vmatpush3.msra.mxu1 %v1596_v58  ;;  %v1594_v44 = vpop.permute.xlu1 %1593  ;;  %v5018_v58 = vunpack.c.l.bf16 %v5110_v10 }
 0x548   :  { %5739 = vmatprep.subr.mxu1 %v1594_v44 }
 0x549   :  { %5725 = vmatmul.mubr.msk.f32.gmra.mxu0 %vm577_vm1, %v1189_v49  ;;  %5740 = vmatpush3.msra.mxu1 %v1594_v44 }
 0x54a   :  { %5741 = vmatprep.subr.mxu1 %v1592_v9 }
 0x54b   :  { %5742 = vmatpush3.msra.mxu1 %v1592_v9  ;;  %v1590_v36 = vpop.permute.xlu1 %1589 }
 0x54c   :  { %5743 = vmatprep.subr.mxu1 %v1590_v36 }
 0x54d   :  { %5744 = vmatpush3.msra.mxu1 %v1590_v36  ;;  %v5023_v36 = vunpack.c.h.bf16 %v5111_v20 }
 0x54e   :  { %5745 = vmatprep.subr.mxu1 %v1588_v48 }
 0x54f   :  { %5746 = vmatpush3.msra.mxu1 %v1588_v48  ;;  %v1586_v17 = vpop.permute.xlu1 %1585 }
 0x550   :  { %5747 = vmatprep.subr.mxu1 %v1586_v17 }
 0x551   :  { %5748 = vmatpush3.msra.mxu1 %v1586_v17  ;;  %v5022_v17 = vunpack.c.l.bf16 %v5111_v20 }
 0x552   :  { %5749 = vmatprep.subr.mxu1 %v1584_v32 }
 0x553   :  { %5750 = vmatpush3.msra.mxu1 %v1584_v32 }
 0x588   :  { %v5649_v37 = vpop.f32.mrf.mxu0 }
 0x58a   :  { %v1045_v42 = vpop.f32.mrf.mxu0 }
 0x58b   :  { %5811 = vmatprep.mubr.msk.f32.mxu0 %vm577_vm1, %v1045_v42 }
 0x58c   :  { %5812 = vmatmul.mubr.msk.f32.vlgmr.msra.gmra.mxu0 %vm577_vm1, %v5649_v37  ;;  %v5112_v37 = vld [vmem:[%s9064_s1 + $0x68] sm:$0xff]  }
 0x5bb   :  { %v5652_v3 = vpop.f32.mrf.mxu0 }
 0x5bd   :  { %v1055_v52 = vpop.f32.mrf.mxu0 }
 0x5be   :  { %5814 = vmatprep.mubr.msk.f32.mxu0 %vm577_vm1, %v1055_v52 }
 0x5bf   :  { %v5655_v8 = vpop.f32.mrf.mxu0  ;;  %5815 = vmatmul.mubr.msk.f32.gmra.mxu0 %vm577_vm1, %v5652_v3 }
 0x5c1   :  { %v1065_v4 = vpop.f32.mrf.mxu0 }
 0x5c2   :  { %5817 = vmatprep.mubr.msk.f32.mxu0 %vm577_vm1, %v1065_v4  ;;  %v5026_v4 = vunpack.c.l.bf16 %v5112_v37 }
 0x5c3   :  { %v5658_v57 = vpop.f32.mrf.mxu0  ;;  %5818 = vmatmul.mubr.msk.f32.gmra.mxu0 %vm577_vm1, %v5655_v8  ;;  %v5027_v8 = vunpack.c.h.bf16 %v5112_v37 }
 0x5c5   :  { %v1075_v45 = vpop.f32.mrf.mxu0 }
 0x5c6   :  { %5820 = vmatprep.mubr.msk.f32.mxu0 %vm577_vm1, %v1075_v45  ;;  %v5113_v45 = vld [vmem:[%s9064_s1 + $0x70] sm:$0xff]  }
 0x5c7   :  { %v5661_v39 = vpop.f32.mrf.mxu0  ;;  %5821 = vmatmul.mubr.msk.f32.gmra.mxu0 %vm577_vm1, %v5658_v57 }
 0x5c9   :  { %v1085_v21 = vpop.f32.mrf.mxu0 }
 0x5ca   :  { %5823 = vmatprep.mubr.msk.f32.mxu0 %vm577_vm1, %v1085_v21 }
 0x5cb   :  { %v5664_v46 = vpop.f32.mrf.mxu0  ;;  %5824 = vmatmul.mubr.msk.f32.gmra.mxu0 %vm577_vm1, %v5661_v39 }
 0x5cd   :  { %v1095_v1 = vpop.f32.mrf.mxu0 }
 0x5ce   :  { %5826 = vmatprep.mubr.msk.f32.mxu0 %vm577_vm1, %v1095_v1  ;;  %v5031_v1 = vunpack.c.h.bf16 %v5113_v45 }
 0x5cf   :  { %v5667_v43 = vpop.f32.mrf.mxu0  ;;  %5827 = vmatmul.mubr.msk.f32.gmra.mxu0 %vm577_vm1, %v5664_v46 }
 0x5d1   :  { %v1105_v24 = vpop.f32.mrf.mxu0 }
 0x5d2   :  { %5829 = vmatprep.mubr.msk.f32.mxu0 %vm577_vm1, %v1105_v24 }
 0x5d3   :  { %5830 = vmatmul.mubr.msk.f32.gmra.mxu0 %vm577_vm1, %v5667_v43  ;;  %v5030_v43 = vunpack.c.l.bf16 %v5113_v45 }
 0x5e9   :  { %v5670_v54 = vpop.f32.mrf.mxu0 }
 0x5eb   :  { %v1115_v6 = vpop.f32.mrf.mxu0 }
 0x5ec   :  { %5832 = vmatprep.mubr.msk.f32.mxu0 %vm577_vm1, %v1115_v6 }
 0x5ed   :  { %v5705_v60 = vpop.f32.mrf.mxu0  ;;  %5833 = vmatmul.mubr.msk.f32.gmra.mxu0 %vm577_vm1, %v5670_v54 }
 0x5ee   :  { %v7418_v38 = vadd.f32 %v5705_v60, %v5007_v2  ;;  %v5034_v60 = vunpack.c.l.bf16 %v5114_v63 }
 0x5ef   :  { %v1352_v62 = vpop.f32.mrf.mxu0 }
 0x5f0   :  { %v7420_v49 = vadd.f32 %v5006_v12, %v1352_v62  ;;  %1433 = vmax.xlane.f32.xlu0 %v7418_v38  ;;  %v5035_v12 = vunpack.c.h.bf16 %v5114_v63 }
 0x5f1   :  { %v5708_v11 = vpop.f32.mrf.mxu0 }
 0x5f2   :  { %1431 = vmax.xlane.f32.xlu1 %v7420_v49  ;;  %v7427_v29 = vadd.f32 %v5708_v11, %v5011_v41 }
 0x5f3   :  { %v1362_v51 = vpop.f32.mrf.mxu0 }
 0x5f4   :  { %v7429_v53 = vadd.f32 %v5010_v50, %v1362_v51 }
 0x5f5   :  { %v5711_v40 = vpop.f32.mrf.mxu0 }
 0x5f6   :  { %1437 = vmax.xlane.f32.xlu1 %v7427_v29  ;;  %1435 = vmax.xlane.f32.xlu0 %v7429_v53  ;;  %v7436_v35 = vadd.f32 %v5711_v40, %v5015_v5 }
 0x5f7   :  { %v1372_v28 = vpop.f32.mrf.mxu0 }
 0x5f8   :  { %v7438_v47 = vadd.f32 %v5014_v56, %v1372_v28 }
 0x5f9   :  { %v5714_v61 = vpop.f32.mrf.mxu0 }
 0x5fa   :  { %1441 = vmax.xlane.f32.xlu1 %v7436_v35  ;;  %1439 = vmax.xlane.f32.xlu0 %v7438_v47  ;;  %v7445_v44 = vadd.f32 %v5714_v61, %v5019_v7 }
 0x5fb   :  { %v1382_v9 = vpop.f32.mrf.mxu0 }
 0x5fc   :  { %v7447_v48 = vadd.f32 %v5018_v58, %v1382_v9 }
 0x5fd   :  { %v5717_v32 = vpop.f32.mrf.mxu0 }
 0x5fe   :  { %1445 = vmax.xlane.f32.xlu1 %v7445_v44  ;;  %1443 = vmax.xlane.f32.xlu0 %v7447_v48  ;;  %v7454_v3 = vadd.f32 %v5717_v32, %v5023_v36 }
 0x5ff   :  { %v1392_v42 = vpop.f32.mrf.mxu0 }
 0x600   :  { %v7456_v52 = vadd.f32 %v5022_v17, %v1392_v42 }
 0x601   :  { %v5720_v57 = vpop.f32.mrf.mxu0 }
 0x602   :  { %1449 = vmax.xlane.f32.xlu1 %v7454_v3  ;;  %1447 = vmax.xlane.f32.xlu0 %v7456_v52  ;;  %v7463_v21 = vadd.f32 %v5720_v57, %v5027_v8 }
 0x603   :  { %v1402_v39 = vpop.f32.mrf.mxu0 }
 0x604   :  { %v7465_v46 = vadd.f32 %v5026_v4, %v1402_v39 }
 0x605   :  { %v5723_v24 = vpop.f32.mrf.mxu0 }
 0x606   :  { %1453 = vmax.xlane.f32.xlu1 %v7463_v21  ;;  %1451 = vmax.xlane.f32.xlu0 %v7465_v46  ;;  %v7472_v2 = vadd.f32 %v5723_v24, %v5031_v1 }
 0x607   :  { %v1412_v54 = vpop.f32.mrf.mxu0 }
 0x608   :  { %v7474_v6 = vadd.f32 %v5030_v43, %v1412_v54 }
 0x609   :  { %v5726_v59 = vpop.f32.mrf.mxu0 }
 0x60a   :  { %1457 = vmax.xlane.f32.xlu1 %v7472_v2  ;;  %1455 = vmax.xlane.f32.xlu0 %v7474_v6  ;;  %v7478_v41 = vadd.f32 %v5726_v59, %v5035_v12 }
 0x60b   :  { %v1422_v62 = vpop.f32.mrf.mxu0 }
 0x60c   :  { %v7480_v50 = vadd.f32 %v5034_v60, %v1422_v62 }
 0x60e   :  { %1461 = vmax.xlane.f32.xlu1 %v7478_v41  ;;  %1459 = vmax.xlane.f32.xlu0 %v7480_v50 }
 0x61f   :  { %1581 = vrot.lane.b32.xlu1 %v6971_v55, %s6614_s15 }
 0x624   :  { %1579 = vrot.lane.b32.xlu0 %v6989_v34, %s6614_s15 }
 0x679   :  { %v1434_v11 = vpop.xlane.xlu0 %1433 }
 0x67a   :  { %v1464_v23 = vsub.f32 %v7418_v38, %v1434_v11 }
 0x67b   :  { %v1432_v51 = vpop.xlane.xlu1 %1431 }
 0x67c   :  { %v1481_v5 = vmul.f32 1.442695, %v1464_v23  ;;  %v1463_v56 = vsub.f32 %v7420_v49, %v1432_v51 }
 0x67e   :  { %6338 = vpow2.f32 %v1481_v5  ;;  %v1479_v40 = vmul.f32 1.442695, %v1463_v56 }
 0x67f   :  { %v1436_v10 = vpop.xlane.xlu0 %1435  ;;  %v1438_v28 = vpop.xlane.xlu1 %1437 }
 0x680   :  { %6340 = vpow2.f32 %v1479_v40  ;;  %v1466_v39 = vsub.f32 %v7427_v29, %v1438_v28  ;;  %v1465_v1 = vsub.f32 %v7429_v53, %v1436_v10 }
 0x682   :  { %v1485_v43 = vmul.f32 1.442695, %v1466_v39  ;;  %v1483_v63 = vmul.f32 1.442695, %v1465_v1  ;;  %v1768_v39 = vld [vmem:[%s9065_s4 + $0x8] sm:$0xff] }
 0x683   :  { %v1440_v7 = vpop.xlane.xlu0 %1439  ;;  %v1442_v58 = vpop.xlane.xlu1 %1441 }
 0x684   :  { %v1467_v24 = vsub.f32 %v7438_v47, %v1440_v7  ;;  %v1468_v54 = vsub.f32 %v7436_v35, %v1442_v58  ;;  %6342 = vpow2.f32 %v1485_v43 }
 0x685   :  { %6344 = vpow2.f32 %v1483_v63 }
 0x686   :  { %v1487_v12 = vmul.f32 1.442695, %v1467_v24  ;;  %v1489_v59 = vmul.f32 1.442695, %v1468_v54 }
 0x687   :  { %v1444_v61 = vpop.xlane.xlu0 %1443  ;;  %v1446_v20 = vpop.xlane.xlu1 %1445 }
 0x688   :  { %v1469_v60 = vsub.f32 %v7447_v48, %v1444_v61  ;;  %v1470_v62 = vsub.f32 %v7445_v44, %v1446_v20  ;;  %6346 = vpow2.f32 %v1487_v12 }
 0x689   :  { %6348 = vpow2.f32 %v1489_v59 }
 0x68a   :  { %v1491_v11 = vmul.f32 1.442695, %v1469_v60  ;;  %v1493_v53 = vmul.f32 1.442695, %v1470_v62 }
 0x68b   :  { %v7490_v9 = vpop.eup %6338  ;;  %v1448_v36 = vpop.xlane.xlu0 %1447 }
 0x68c   :  { %v1450_v17 = vpop.xlane.xlu1 %1449  ;;  %1513 = vadd.xlane.f32.xlu0 %v7490_v9  ;;  %v1471_v29 = vsub.f32 %v7456_v52, %v1448_v36  ;;  %6350 = vpow2.f32 %v1491_v11 }
 0x68d   :  { %v7493_v38 = vpop.eup %6340  ;;  %v1472_v23 = vsub.f32 %v7454_v3, %v1450_v17  ;;  %6352 = vpow2.f32 %v1493_v53 }
 0x68e   :  { %1511 = vadd.xlane.f32.xlu1 %v7493_v38  ;;  %v1495_v47 = vmul.f32 1.442695, %v1471_v29 }
 0x68f   :  { %v1452_v49 = vpop.xlane.xlu0 %1451  ;;  %v1497_v51 = vmul.f32 1.442695, %v1472_v23 }
 0x690   :  { %v1454_v32 = vpop.xlane.xlu1 %1453  ;;  %v1473_v35 = vsub.f32 %v7465_v46, %v1452_v49  ;;  %6354 = vpow2.f32 %v1495_v47 }
 0x691   :  { %v1474_v48 = vsub.f32 %v7463_v21, %v1454_v32  ;;  %v7511_v56 = vpop.eup %6342  ;;  %6356 = vpow2.f32 %v1497_v51 }
 0x692   :  { %v1499_v5 = vmul.f32 1.442695, %v1473_v35  ;;  %v7515_v3 = vpop.eup %6344 }
 0x693   :  { %v1456_v37 = vpop.xlane.xlu0 %1455  ;;  %v1501_v52 = vmul.f32 1.442695, %v1474_v48 }
 0x694   :  { %v1458_v42 = vpop.xlane.xlu1 %1457  ;;  %v1475_v44 = vsub.f32 %v7474_v6, %v1456_v37  ;;  %6358 = vpow2.f32 %v1499_v5 }
 0x695   :  { %v1476_v40 = vsub.f32 %v7472_v2, %v1458_v42  ;;  %v7519_v21 = vpop.eup %6346  ;;  %6360 = vpow2.f32 %v1501_v52 }
 0x696   :  { %v1503_v46 = vmul.f32 1.442695, %v1475_v44  ;;  %v7523_v7 = vpop.eup %6348 }
 0x697   :  { %v1460_v8 = vpop.xlane.xlu0 %1459  ;;  %v1505_v6 = vmul.f32 1.442695, %v1476_v40 }
 0x698   :  { %v1462_v4 = vpop.xlane.xlu1 %1461  ;;  %v1477_v10 = vsub.f32 %v7480_v50, %v1460_v8  ;;  %6362 = vpow2.f32 %v1503_v46 }
 0x699   :  { %v1478_v28 = vsub.f32 %v7478_v41, %v1462_v4  ;;  %v7526_v58 = vpop.eup %6350  ;;  %6364 = vpow2.f32 %v1505_v6 }
 0x69a   :  { %v1507_v2 = vmul.f32 1.442695, %v1477_v10  ;;  %v7529_v61 = vpop.eup %6352 }
 0x69b   :  { %v1580_v45 = vpop.permute.xlu0 %1579  ;;  %v1509_v50 = vmul.f32 1.442695, %v1478_v28 }
 0x69c   :  { %v1582_v57 = vpop.permute.xlu1 %1581  ;;  %6366 = vpow2.f32 %v1507_v2 }
 0x69d   :  { %5751 = vmatprep.subr.mxu1 %v1582_v57  ;;  %v7532_v41 = vpop.eup %6354  ;;  %6368 = vpow2.f32 %v1509_v50 }
 0x69e   :  { %5752 = vmatpush3.msra.mxu1 %v1582_v57  ;;  %v7535_v20 = vpop.eup %6356 }
 0x69f   :  { %5753 = vmatprep.subr.mxu1 %v1580_v45  ;;  %1577 = vrot.lane.b32.xlu1 %v6979_v0, %s6614_s15 }
 0x6a0   :  { %5754 = vmatpush3.msra.mxu1 %v1580_v45 }
 0x6a1   :  { %v7538_v36 = vpop.eup %6358 }
 0x6a2   :  { %1575 = vrot.lane.b32.xlu0 %v6929_v25, %s6614_s15  ;;  %v7541_v17 = vpop.eup %6360  ;;  %s6618_s15 = smov 104  }
 0x6a5   :  { %v7544_v49 = vpop.eup %6362 }
 0x6a6   :  { %v7547_v32 = vpop.eup %6364 }
 0x6a9   :  { %v7550_v37 = vpop.eup %6366 }
 0x6aa   :  { %v7553_v42 = vpop.eup %6368 }
 0x6c1   :  { %1517 = vadd.xlane.f32.xlu0 %v7511_v56 }
 0x6c3   :  { %1515 = vadd.xlane.f32.xlu1 %v7515_v3 }
 0x6c5   :  { %1519 = vadd.xlane.f32.xlu0 %v7519_v21 }
 0x6c7   :  { %1521 = vadd.xlane.f32.xlu1 %v7523_v7 }
 0x6c9   :  { %1523 = vadd.xlane.f32.xlu0 %v7526_v58 }
 0x6cb   :  { %1525 = vadd.xlane.f32.xlu1 %v7529_v61 }
 0x6cd   :  { %1527 = vadd.xlane.f32.xlu0 %v7532_v41 }
 0x6cf   :  { %1529 = vadd.xlane.f32.xlu1 %v7535_v20 }
 0x6d1   :  { %1531 = vadd.xlane.f32.xlu0 %v7538_v36 }
 0x6d3   :  { %1533 = vadd.xlane.f32.xlu1 %v7541_v17 }
 0x6d5   :  { %1535 = vadd.xlane.f32.xlu0 %v7544_v49 }
 0x6d7   :  { %1537 = vadd.xlane.f32.xlu1 %v7547_v32 }
 0x6d9   :  { %1539 = vadd.xlane.f32.xlu0 %v7550_v37 }
 0x6db   :  { %1541 = vadd.xlane.f32.xlu1 %v7553_v42 }
 0x6ec   :  { %2248 = vrot.lane.b32.xlu1 %v6935_v14, %s6615_s10 }
 0x6ef   :  { %2250 = vrot.lane.b32.xlu0 %v6933_v13, %s6615_s10 }
 0x6f0   :  { %2246 = vrot.lane.b32.xlu1 %v6943_v18, %s6615_s10 }
 0x6f3   :  { %2244 = vrot.lane.b32.xlu0 %v6951_v22, %s6615_s10 }
 0x6f4   :  { %2242 = vrot.lane.b32.xlu1 %v6939_v15, %s6615_s10 }
 0x6f7   :  { %2240 = vrot.lane.b32.xlu0 %v6959_v26, %s6615_s10 }
 0x6f8   :  { %2238 = vrot.lane.b32.xlu1 %v6947_v19, %s6615_s10 }
 0x6fb   :  { %2236 = vrot.lane.b32.xlu0 %v6967_v30, %s6615_s10 }
 0x6fc   :  { %2234 = vrot.lane.b32.xlu1 %v6955_v16, %s6615_s10 }
 0x6ff   :  { %2232 = vrot.lane.b32.xlu0 %v6975_v31, %s6615_s10 }
 0x700   :  { %2230 = vrot.lane.b32.xlu1 %v6963_v27, %s6615_s10 }
 0x703   :  { %2228 = vrot.lane.b32.xlu0 %v6983_v33, %s6615_s10 }
 0x704   :  { %2226 = vrot.lane.b32.xlu1 %v6971_v55, %s6615_s10 }
 0x707   :  { %2224 = vrot.lane.b32.xlu0 %v6989_v34, %s6615_s10 }
 0x708   :  { %2222 = vrot.lane.b32.xlu1 %v6979_v0, %s6615_s10 }
 0x70b   :  { %2220 = vrot.lane.b32.xlu0 %v6929_v25, %s6615_s10 }
 0x70c   :  { %2188 = vrot.lane.b32.xlu1 %v6929_v25, %s6616_s11 }
 0x70f   :  { %2190 = vrot.lane.b32.xlu0 %v6979_v0, %s6616_s11 }
 0x710   :  { %2192 = vrot.lane.b32.xlu1 %v6989_v34, %s6616_s11 }
 0x713   :  { %2194 = vrot.lane.b32.xlu0 %v6971_v55, %s6616_s11 }
 0x714   :  { %2196 = vrot.lane.b32.xlu1 %v6983_v33, %s6616_s11 }
 0x715   :  { %v1514_v8 = vpop.xlane.xlu0 %1513 }
 0x716   :  { %6370 = vrcp.f32 %v1514_v8 }
 0x717   :  { %2198 = vrot.lane.b32.xlu0 %v6963_v27, %s6616_s11  ;;  %v1512_v4 = vpop.xlane.xlu1 %1511 }
 0x718   :  { %6372 = vrcp.f32 %v1512_v4  ;;  %2200 = vrot.lane.b32.xlu1 %v6975_v31, %s6616_s11 }
 0x719   :  { %v1576_v45 = vpop.permute.xlu0 %1575 }
 0x71b   :  { %2202 = vrot.lane.b32.xlu0 %v6955_v16, %s6616_s11  ;;  %v1578_v57 = vpop.permute.xlu1 %1577 }
 0x71c   :  { %2204 = vrot.lane.b32.xlu1 %v6967_v30, %s6616_s11  ;;  %5755 = vmatprep.subr.mxu1 %v1578_v57 }
 0x71d   :  { %5756 = vmatpush3.msra.mxu1 %v1578_v57 }
 0x71e   :  { %5757 = vmatprep.subr.mxu1 %v1576_v45 }
 0x71f   :  { %2206 = vrot.lane.b32.xlu0 %v6947_v19, %s6616_s11  ;;  %5758 = vmatpush3.msra.mxu1 %v1576_v45 }
 0x720   :  { %2208 = vrot.lane.b32.xlu1 %v6959_v26, %s6616_s11  ;;  %5783 = vmatprep.subr.mxu1 %v1768_v39 }
 0x723   :  { %2210 = vrot.lane.b32.xlu0 %v6939_v15, %s6616_s11  ;;  %v6371_v1 = vpop.eup %6370 }
 0x724   :  { %2212 = vrot.lane.b32.xlu1 %v6951_v22, %s6616_s11  ;;  %v1560_v63 = vmul.f32 %v6371_v1, %v7490_v9 }
 0x725   :  { %v6373_v43 = vpop.eup %6372 }
 0x726   :  { %v1559_v24 = vmul.f32 %v6373_v43, %v7493_v38 }
 0x727   :  { %2214 = vrot.lane.b32.xlu0 %v6943_v18, %s6616_s11 }
 0x728   :  { %2216 = vrot.lane.b32.xlu1 %v6935_v14, %s6616_s11  ;;  %5759 = vmatprep.mubr.f32.mxu1 %v1559_v24 }
 0x729   :  { %5760 = vmatmul.mubr.f32.vlgmr.msra.gmra.mxu1 %v1560_v63 }
 0x72a   :  { %5784 = vmatpush3.msra.mxu1 %v1768_v39 }
 0x72b   :  { %2218 = vrot.lane.b32.xlu0 %v6933_v13, %s6616_s11 }
 0x72c   :  { %3103 = vrot.lane.b32.xlu1 %v6933_v13, %s6617_s14 }
 0x72f   :  { %3101 = vrot.lane.b32.xlu0 %v6935_v14, %s6617_s14 }
 0x730   :  { %3099 = vrot.lane.b32.xlu1 %v6943_v18, %s6617_s14 }
 0x733   :  { %3097 = vrot.lane.b32.xlu0 %v6951_v22, %s6617_s14 }
 0x734   :  { %3095 = vrot.lane.b32.xlu1 %v6939_v15, %s6617_s14 }
 0x737   :  { %3093 = vrot.lane.b32.xlu0 %v6959_v26, %s6617_s14 }
 0x738   :  { %3091 = vrot.lane.b32.xlu1 %v6947_v19, %s6617_s14 }
 0x73b   :  { %3089 = vrot.lane.b32.xlu0 %v6967_v30, %s6617_s14 }
 0x73c   :  { %3087 = vrot.lane.b32.xlu1 %v6955_v16, %s6617_s14 }
 0x73f   :  { %3085 = vrot.lane.b32.xlu0 %v6975_v31, %s6617_s14 }
 0x740   :  { %3083 = vrot.lane.b32.xlu1 %v6963_v27, %s6617_s14 }
 0x743   :  { %3081 = vrot.lane.b32.xlu0 %v6983_v33, %s6617_s14 }
 0x744   :  { %3079 = vrot.lane.b32.xlu1 %v6971_v55, %s6617_s14 }
 0x747   :  { %3077 = vrot.lane.b32.xlu0 %v6989_v34, %s6617_s14 }
 0x748   :  { %3075 = vrot.lane.b32.xlu1 %v6979_v0, %s6617_s14 }
 0x74a   :  { %v1518_v9 = vpop.xlane.xlu0 %1517 }
 0x74b   :  { %3073 = vrot.lane.b32.xlu0 %v6929_v25, %s6617_s14  ;;  %6374 = vrcp.f32 %v1518_v9 }
 0x74c   :  { %3041 = vrot.lane.b32.xlu1 %v6929_v25, %s6618_s15  ;;  %v1516_v38 = vpop.xlane.xlu1 %1515 }
 0x74d   :  { %6376 = vrcp.f32 %v1516_v38 }
 0x74e   :  { %v1520_v54 = vpop.xlane.xlu0 %1519 }
 0x74f   :  { %6378 = vrcp.f32 %v1520_v54  ;;  %3043 = vrot.lane.b32.xlu0 %v6979_v0, %s6618_s15 }
 0x750   :  { %3045 = vrot.lane.b32.xlu1 %v6989_v34, %s6618_s15  ;;  %v1522_v12 = vpop.xlane.xlu1 %1521 }
 0x751   :  { %6380 = vrcp.f32 %v1522_v12 }
 0x752   :  { %v1524_v60 = vpop.xlane.xlu0 %1523 }
 0x753   :  { %6382 = vrcp.f32 %v1524_v60  ;;  %3047 = vrot.lane.b32.xlu0 %v6971_v55, %s6618_s15 }
 0x754   :  { %3049 = vrot.lane.b32.xlu1 %v6983_v33, %s6618_s15  ;;  %v1526_v59 = vpop.xlane.xlu1 %1525 }
 0x755   :  { %6384 = vrcp.f32 %v1526_v59 }
 0x756   :  { %v1528_v62 = vpop.xlane.xlu0 %1527 }
 0x757   :  { %6386 = vrcp.f32 %v1528_v62  ;;  %3051 = vrot.lane.b32.xlu0 %v6963_v27, %s6618_s15 }
 0x758   :  { %3053 = vrot.lane.b32.xlu1 %v6975_v31, %s6618_s15  ;;  %v1530_v11 = vpop.xlane.xlu1 %1529  ;;  %v6375_v29 = vpop.eup %6374 }
 0x759   :  { %6388 = vrcp.f32 %v1530_v11  ;;  %v1562_v48 = vmul.f32 %v6375_v29, %v7511_v56 }
 0x75a   :  { %v6377_v53 = vpop.eup %6376  ;;  %v1532_v23 = vpop.xlane.xlu0 %1531 }
 0x75b   :  { %6390 = vrcp.f32 %v1532_v23  ;;  %3055 = vrot.lane.b32.xlu0 %v6955_v16, %s6618_s15  ;;  %v1561_v47 = vmul.f32 %v6377_v53, %v7515_v3 }
 0x75c   :  { %v6379_v35 = vpop.eup %6378  ;;  %3057 = vrot.lane.b32.xlu1 %v6967_v30, %s6618_s15  ;;  %v1534_v51 = vpop.xlane.xlu1 %1533 }
 0x75d   :  { %6392 = vrcp.f32 %v1534_v51  ;;  %5762 = vmatprep.mubr.f32.mxu1 %v1561_v47  ;;  %v1563_v5 = vmul.f32 %v6379_v35, %v7519_v21 }
 0x75e   :  { %v6381_v44 = vpop.eup %6380  ;;  %v1536_v52 = vpop.xlane.xlu0 %1535  ;;  %5763 = vmatmul.mubr.f32.gmra.mxu1 %v1562_v48 }
 0x75f   :  { %6394 = vrcp.f32 %v1536_v52  ;;  %3059 = vrot.lane.b32.xlu0 %v6947_v19, %s6618_s15  ;;  %5765 = vmatprep.mubr.f32.mxu1 %v1563_v5  ;;  %v1564_v40 = vmul.f32 %v6381_v44, %v7523_v7 }
 0x760   :  { %v6383_v3 = vpop.eup %6382  ;;  %3061 = vrot.lane.b32.xlu1 %v6959_v26, %s6618_s15  ;;  %v1538_v46 = vpop.xlane.xlu1 %1537 }
 0x761   :  { %6396 = vrcp.f32 %v1538_v46  ;;  %v1565_v56 = vmul.f32 %v6383_v3, %v7526_v58 }
 0x762   :  { %v6385_v10 = vpop.eup %6384  ;;  %v1540_v21 = vpop.xlane.xlu0 %1539  ;;  %5766 = vmatmul.mubr.f32.gmra.mxu1 %v1564_v40 }
 0x763   :  { %6398 = vrcp.f32 %v1540_v21  ;;  %3063 = vrot.lane.b32.xlu0 %v6939_v15, %s6618_s15  ;;  %5768 = vmatprep.mubr.f32.mxu1 %v1565_v56  ;;  %v1566_v6 = vmul.f32 %v6385_v10, %v7529_v61 }
 0x764   :  { %v6387_v28 = vpop.eup %6386  ;;  %3065 = vrot.lane.b32.xlu1 %v6951_v22, %s6618_s15  ;;  %v1542_v7 = vpop.xlane.xlu1 %1541 }
 0x765   :  { %6400 = vrcp.f32 %v1542_v7  ;;  %v1567_v2 = vmul.f32 %v6387_v28, %v7532_v41 }
 0x766   :  { %v6389_v50 = vpop.eup %6388  ;;  %v7658_v58 = vpop.permute.xlu0 %2250  ;;  %5769 = vmatmul.mubr.f32.gmra.mxu1 %v1566_v6 }
 0x767   :  { %3067 = vrot.lane.b32.xlu0 %v6943_v18, %s6618_s15  ;;  %5771 = vmatprep.mubr.f32.mxu1 %v1567_v2  ;;  %v1568_v8 = vmul.f32 %v6389_v50, %v7535_v20 }
 0x768   :  { %v6391_v4 = vpop.eup %6390  ;;  %5835 = vmatprep.subr.msk.mxu1 %vm577_vm1, %v7658_v58  ;;  %3071 = vrot.lane.b32.xlu1 %v6933_v13, %s6618_s15  ;;  %v2249_v3 = vpop.permute.xlu1 %2248 }
 0x769   :  { %v1569_v61 = vmul.f32 %v6391_v4, %v7538_v36 }
 0x76a   :  { %v6393_v41 = vpop.eup %6392  ;;  %v7668_v57 = vpop.permute.xlu0 %2244  ;;  %5772 = vmatmul.mubr.f32.gmra.mxu1 %v1568_v8 }
 0x76b   :  { %3069 = vrot.lane.b32.xlu0 %v6935_v14, %s6618_s15  ;;  %5774 = vmatprep.mubr.f32.mxu1 %v1569_v61  ;;  %v1570_v45 = vmul.f32 %v6393_v41, %v7541_v17 }
 0x76c   :  { %v6395_v20 = vpop.eup %6394  ;;  %v2247_v10 = vpop.permute.xlu1 %2246 }
 0x76d   :  { %v1571_v39 = vmul.f32 %v6395_v20, %v7544_v49 }
 0x76e   :  { %v6397_v1 = vpop.eup %6396  ;;  %v7674_v43 = vpop.permute.xlu0 %2240  ;;  %5775 = vmatmul.mubr.f32.gmra.mxu1 %v1570_v45 }
 0x76f   :  { %2635 = vrot.lane.b32.xlu0 %v6933_v13, %s6619_s16  ;;  %5777 = vmatprep.mubr.f32.mxu1 %v1571_v39  ;;  %v1572_v36 = vmul.f32 %v6397_v1, %v7547_v32 }
 0x770   :  { %v6399_v24 = vpop.eup %6398  ;;  %v2243_v6 = vpop.permute.xlu1 %2242 }
 0x771   :  { %v1573_v63 = vmul.f32 %v6399_v24, %v7550_v37 }
 0x772   :  { %v6401_v9 = vpop.eup %6400  ;;  %v7680_v38 = vpop.permute.xlu0 %2236  ;;  %5778 = vmatmul.mubr.f32.gmra.mxu1 %v1572_v36 }
 0x773   :  { %5780 = vmatprep.mubr.f32.mxu1 %v1573_v63  ;;  %v1574_v17 = vmul.f32 %v6401_v9, %v7553_v42 }
 0x774   :  { %v2239_v2 = vpop.permute.xlu1 %2238 }
 0x776   :  { %v7683_v49 = vpop.permute.xlu0 %2232  ;;  %5781 = vmatmul.mubr.f32.gmra.mxu1 %v1574_v17 }
 0x778   :  { %v2235_v8 = vpop.permute.xlu1 %2234 }
 0x77a   :  { %v7685_v54 = vpop.permute.xlu0 %2228 }
 0x77c   :  { %v2231_v41 = vpop.permute.xlu1 %2230 }
 0x77e   :  { %v7687_v12 = vpop.permute.xlu0 %2224 }
 0x780   :  { %v2227_v39 = vpop.permute.xlu1 %2226 }
 0x782   :  { %v7689_v60 = vpop.permute.xlu0 %2220 }
 0x784   :  { %v2223_v1 = vpop.permute.xlu1 %2222 }
 0x786   :  { %v7691_v32 = vpop.permute.xlu0 %2190 }
 0x788   :  { %v7749_v36 = vpop.permute.xlu1 %2188 }
 0x78a   :  { %v7693_v59 = vpop.permute.xlu0 %2194 }
 0x78e   :  { %v7695_v37 = vpop.permute.xlu0 %2198 }
 0x792   :  { %v7697_v62 = vpop.permute.xlu0 %2202 }
 0x796   :  { %v7699_v11 = vpop.permute.xlu0 %2206 }
 0x79a   :  { %v7701_v42 = vpop.permute.xlu0 %2210 }
 0x79e   :  { %v7703_v29 = vpop.permute.xlu0 %2214 }
 0x7a2   :  { %v7705_v53 = vpop.permute.xlu0 %2218 }
 0x7a6   :  { %v7707_v23 = vpop.permute.xlu0 %3101 }
 0x7aa   :  { %v7709_v47 = vpop.permute.xlu0 %3097 }
 0x7ae   :  { %v7711_v35 = vpop.permute.xlu0 %3093 }
 0x7b2   :  { %v7713_v51 = vpop.permute.xlu0 %3089 }
 0x7b6   :  { %v7715_v48 = vpop.permute.xlu0 %3085 }
 0x7ba   :  { %v7717_v5 = vpop.permute.xlu0 %3081 }
 0x7be   :  { %v7719_v44 = vpop.permute.xlu0 %3077 }
 0x7c2   :  { %v7721_v52 = vpop.permute.xlu0 %3073 }
 0x7c6   :  { %v7723_v40 = vpop.permute.xlu0 %3043 }
 0x7ca   :  { %v7725_v46 = vpop.permute.xlu0 %3047 }
 0x7ce   :  { %v7727_v56 = vpop.permute.xlu0 %3051 }
 0x7d2   :  { %v7729_v21 = vpop.permute.xlu0 %3055 }
 0x7d6   :  { %v7731_v28 = vpop.permute.xlu0 %3059 }
 0x7da   :  { %v7733_v7 = vpop.permute.xlu0 %3063 }
 0x7de   :  { %v7735_v50 = vpop.permute.xlu0 %3067 }
 0x7e2   :  { %v7737_v4 = vpop.permute.xlu0 %3069 }
 0x7e6   :  { %v2636_v61 = vpop.permute.xlu0 %2635 }
 0x7e7   :  { %5891 = vmatprep.subr.mxu0 %v2636_v61 }
 0x7e8   :  { %5892 = vmatpush3.msra.mxu0 %v2636_v61 }
 0x7e9   :  { %v5761_v45 = vpop.f32.mrf.mxu1 }
 0x7eb   :  { %v1689_v20 = vpop.f32.mrf.mxu1 }
 0x7ec   :  { %5785 = vmatprep.mubr.msk.f32.mxu1 %vm577_vm1, %v1689_v20 }
 0x7ed   :  { %5786 = vmatmul.mubr.msk.f32.vlgmr.msra.gmra.mxu1 %vm577_vm1, %v5761_v45 }
 0x7ee   :  { %5836 = vmatpush3.xpose.msk.msra.mxu1 %vm577_vm1, %v7658_v58  ;;  %v7757_v58 = vpop.permute.xlu1 %2192 }
 0x7ef   :  { %5837 = vmatprep.subr.msk.mxu1 %vm577_vm1, %v2249_v3 }
 0x7f2   :  { %5838 = vmatpush3.xpose.msk.msra.mxu1 %vm577_vm1, %v2249_v3  ;;  %v7762_v24 = vpop.permute.xlu1 %2196 }
 0x7f3   :  { %5839 = vmatprep.subr.msk.mxu1 %vm577_vm1, %v2247_v10 }
 0x7f6   :  { %5840 = vmatpush3.xpose.msk.msra.mxu1 %vm577_vm1, %v2247_v10 }
 0x7f7   :  { %5841 = vmatprep.subr.msk.mxu1 %vm577_vm1, %v7668_v57 }
 0x7fa   :  { %5842 = vmatpush3.xpose.msk.msra.mxu1 %vm577_vm1, %v7668_v57  ;;  %v7770_v57 = vpop.permute.xlu1 %2200 }
 0x7fb   :  { %5843 = vmatprep.subr.msk.mxu1 %vm577_vm1, %v2243_v6 }
 0x7fe   :  { %5844 = vmatpush3.xpose.msk.msra.mxu1 %vm577_vm1, %v2243_v6 }
 0x7ff   :  { %5845 = vmatprep.subr.msk.mxu1 %vm577_vm1, %v7674_v43 }
 0x802   :  { %5846 = vmatpush3.xpose.msk.msra.mxu1 %vm577_vm1, %v7674_v43  ;;  %v7775_v43 = vpop.permute.xlu1 %2204 }
 0x803   :  { %5847 = vmatprep.subr.msk.mxu1 %vm577_vm1, %v2239_v2 }
 0x806   :  { %5848 = vmatpush3.xpose.msk.msra.mxu1 %vm577_vm1, %v2239_v2  ;;  %v7783_v63 = vpop.permute.xlu1 %2208 }
 0x807   :  { %5849 = vmatprep.subr.msk.mxu1 %vm577_vm1, %v7680_v38 }
 0x80a   :  { %5850 = vmatpush3.xpose.msk.msra.mxu1 %vm577_vm1, %v7680_v38  ;;  %v7788_v9 = vpop.permute.xlu1 %2212 }
 0x80b   :  { %5851 = vmatprep.subr.msk.mxu1 %vm577_vm1, %v2235_v8 }
 0x80e   :  { %5852 = vmatpush3.xpose.msk.msra.mxu1 %vm577_vm1, %v2235_v8 }
 0x80f   :  { %5853 = vmatprep.subr.msk.mxu1 %vm577_vm1, %v7683_v49 }
 0x812   :  { %5854 = vmatpush3.xpose.msk.msra.mxu1 %vm577_vm1, %v7683_v49 }
 0x813   :  { %5855 = vmatprep.subr.msk.mxu1 %vm577_vm1, %v2231_v41 }
 0x816   :  { %5856 = vmatpush3.xpose.msk.msra.mxu1 %vm577_vm1, %v2231_v41 }
 0x817   :  { %5857 = vmatprep.subr.msk.mxu1 %vm577_vm1, %v7685_v54 }
 0x81a   :  { %5858 = vmatpush3.xpose.msk.msra.mxu1 %vm577_vm1, %v7685_v54  ;;  %v7798_v54 = vpop.permute.xlu1 %2216 }
 0x81b   :  { %5859 = vmatprep.subr.msk.mxu1 %vm577_vm1, %v2227_v39 }
 0x81e   :  { %5860 = vmatpush3.xpose.msk.msra.mxu1 %vm577_vm1, %v2227_v39  ;;  %v5764_v38 = vpop.f32.mrf.mxu1 }
 0x81f   :  { %5861 = vmatprep.subr.msk.mxu1 %vm577_vm1, %v7687_v12 }
 0x820   :  { %v1699_v17 = vpop.f32.mrf.mxu1 }
 0x821   :  { %5788 = vmatprep.mubr.msk.f32.mxu1 %vm577_vm1, %v1699_v17 }
 0x822   :  { %5862 = vmatpush3.xpose.msk.msra.mxu1 %vm577_vm1, %v7687_v12  ;;  %v5767_v49 = vpop.f32.mrf.mxu1  ;;  %v3104_v12 = vpop.permute.xlu1 %3103 }
 0x823   :  { %5789 = vmatmul.mubr.msk.f32.gmra.mxu1 %vm577_vm1, %v5764_v38  ;;  %5863 = vmatprep.subr.msk.mxu1 %vm577_vm1, %v2223_v1 }
 0x824   :  { %v1709_v3 = vpop.f32.mrf.mxu1 }
 0x825   :  { %5791 = vmatprep.mubr.msk.f32.mxu1 %vm577_vm1, %v1709_v3 }
 0x826   :  { %5864 = vmatpush3.xpose.msk.msra.mxu1 %vm577_vm1, %v2223_v1  ;;  %v5770_v10 = vpop.f32.mrf.mxu1  ;;  %v3100_v45 = vpop.permute.xlu1 %3099 }
 0x827   :  { %5792 = vmatmul.mubr.msk.f32.gmra.mxu1 %vm577_vm1, %v5767_v49  ;;  %5865 = vmatprep.subr.msk.mxu1 %vm577_vm1, %v7689_v60 }
 0x828   :  { %v1719_v6 = vpop.f32.mrf.mxu1 }
 0x829   :  { %5794 = vmatprep.mubr.msk.f32.mxu1 %vm577_vm1, %v1719_v6 }
 0x82a   :  { %5866 = vmatpush3.xpose.msk.msra.mxu1 %vm577_vm1, %v7689_v60  ;;  %v5773_v2 = vpop.f32.mrf.mxu1  ;;  %v3096_v1 = vpop.permute.xlu1 %3095 }
 0x82b   :  { %5795 = vmatmul.mubr.msk.f32.gmra.mxu1 %vm577_vm1, %v5770_v10  ;;  %5973 = vmatprep.subr.msk.mxu1 %vm577_vm1, %v3104_v12 }
 0x82c   :  { %v1729_v8 = vpop.f32.mrf.mxu1 }
 0x82d   :  { %5797 = vmatprep.mubr.msk.f32.mxu1 %vm577_vm1, %v1729_v8  ;;  %v5116_v8 = vld [vmem:[%s9064_s1 + $0x88] sm:$0xff]  }
 0x82e   :  { %v5776_v61 = vpop.f32.mrf.mxu1  ;;  %v3092_v17 = vpop.permute.xlu1 %3091 }
 0x82f   :  { %5798 = vmatmul.mubr.msk.f32.gmra.mxu1 %vm577_vm1, %v5773_v2 }
 0x830   :  { %v1739_v41 = vpop.f32.mrf.mxu1 }
 0x831   :  { %5800 = vmatprep.mubr.msk.f32.mxu1 %vm577_vm1, %v1739_v41  ;;  %v5118_v41 = vld [vmem:[%s9064_s1 + $0x98] sm:$0xff]  }
 0x832   :  { %v5779_v20 = vpop.f32.mrf.mxu1  ;;  %v3088_v49 = vpop.permute.xlu1 %3087 }
 0x833   :  { %5801 = vmatmul.mubr.msk.f32.gmra.mxu1 %vm577_vm1, %v5776_v61 }
 0x834   :  { %v1749_v39 = vpop.f32.mrf.mxu1 }
 0x835   :  { %5803 = vmatprep.mubr.msk.f32.mxu1 %vm577_vm1, %v1749_v39 }
 0x836   :  { %v5782_v60 = vpop.f32.mrf.mxu1 }
 0x837   :  { %5804 = vmatmul.mubr.msk.f32.gmra.mxu1 %vm577_vm1, %v5779_v20  ;;  %v5051_v20 = vunpack.c.h.bf16 %v5118_v41 }
 0x838   :  { %v1759_v38 = vpop.f32.mrf.mxu1 }
 0x839   :  { %5806 = vmatprep.mubr.msk.f32.mxu1 %vm577_vm1, %v1759_v38  ;;  %v5117_v38 = vld [vmem:[%s9064_s1 + $0x90] sm:$0xff]  }
 0x83b   :  { %5807 = vmatmul.mubr.msk.f32.gmra.mxu1 %vm577_vm1, %v5782_v60 }
 0x83c   :  { %5867 = vmatprep.mubr.msk.f32.mxu1 %vm577_vm1, %v7749_v36 }
 0x83f   :  { %5868 = vmatmul.mubr.msk.f32.vlgmr.msra.gmra.mxu1 %vm577_vm1, %v7691_v32  ;;  %v3084_v32 = vpop.permute.xlu1 %3083 }
 0x840   :  { %5974 = vmatpush3.xpose.msk.msra.mxu1 %vm577_vm1, %v3104_v12  ;;  %5870 = vmatprep.mubr.msk.f32.mxu1 %vm577_vm1, %v7757_v58  ;;  %v5115_v58 = vld [vmem:[%s9064_s1 + $0x80] sm:$0xff]  }
 0x841   :  { %5975 = vmatprep.subr.msk.mxu1 %vm577_vm1, %v7707_v23 }
 0x843   :  { %5871 = vmatmul.mubr.msk.f32.gmra.mxu1 %vm577_vm1, %v7693_v59  ;;  %v3080_v59 = vpop.permute.xlu1 %3079 }
 0x844   :  { %5976 = vmatpush3.xpose.msk.msra.mxu1 %vm577_vm1, %v7707_v23  ;;  %5873 = vmatprep.mubr.msk.f32.mxu1 %vm577_vm1, %v7762_v24 }
 0x845   :  { %5977 = vmatprep.subr.msk.mxu1 %vm577_vm1, %v3100_v45 }
 0x847   :  { %5874 = vmatmul.mubr.msk.f32.gmra.mxu1 %vm577_vm1, %v7695_v37  ;;  %v3076_v37 = vpop.permute.xlu1 %3075 }
 0x848   :  { %5978 = vmatpush3.xpose.msk.msra.mxu1 %vm577_vm1, %v3100_v45  ;;  %5876 = vmatprep.mubr.msk.f32.mxu1 %vm577_vm1, %v7770_v57  ;;  %v5039_v57 = vunpack.c.h.bf16 %v5115_v58  ;;  %v5043_v45 = vunpack.c.h.bf16 %v5116_v8 }
 0x849   :  { %5979 = vmatprep.subr.msk.mxu1 %vm577_vm1, %v7709_v47 }
 0x84b   :  { %5877 = vmatmul.mubr.msk.f32.gmra.mxu1 %vm577_vm1, %v7697_v62  ;;  %v3042_v62 = vpop.permute.xlu1 %3041 }
 0x84c   :  { %5980 = vmatpush3.xpose.msk.msra.mxu1 %vm577_vm1, %v7709_v47  ;;  %5879 = vmatprep.mubr.msk.f32.mxu1 %vm577_vm1, %v7775_v43 }
 0x84d   :  { %5981 = vmatprep.subr.msk.mxu1 %vm577_vm1, %v3096_v1 }
 0x84f   :  { %5880 = vmatmul.mubr.msk.f32.gmra.mxu1 %vm577_vm1, %v7699_v11  ;;  %v3046_v11 = vpop.permute.xlu1 %3045 }
 0x850   :  { %5982 = vmatpush3.xpose.msk.msra.mxu1 %vm577_vm1, %v3096_v1  ;;  %5882 = vmatprep.mubr.msk.f32.mxu1 %vm577_vm1, %v7783_v63  ;;  %v5038_v63 = vunpack.c.l.bf16 %v5115_v58  ;;  %v5042_v1 = vunpack.c.l.bf16 %v5116_v8 }
 0x851   :  { %5983 = vmatprep.subr.msk.mxu1 %vm577_vm1, %v7711_v35 }
 0x853   :  { %5883 = vmatmul.mubr.msk.f32.gmra.mxu1 %vm577_vm1, %v7701_v42  ;;  %v3050_v42 = vpop.permute.xlu1 %3049 }
 0x854   :  { %5984 = vmatpush3.xpose.msk.msra.mxu1 %vm577_vm1, %v7711_v35  ;;  %5885 = vmatprep.mubr.msk.f32.mxu1 %vm577_vm1, %v7788_v9 }
 0x855   :  { %5985 = vmatprep.subr.msk.mxu1 %vm577_vm1, %v3092_v17 }
 0x857   :  { %5886 = vmatmul.mubr.msk.f32.gmra.mxu1 %vm577_vm1, %v7703_v29  ;;  %v3054_v29 = vpop.permute.xlu1 %3053 }
 0x858   :  { %5986 = vmatpush3.xpose.msk.msra.mxu1 %vm577_vm1, %v3092_v17  ;;  %5888 = vmatprep.mubr.msk.f32.mxu1 %vm577_vm1, %v7798_v54 }
 0x859   :  { %5987 = vmatprep.subr.msk.mxu1 %vm577_vm1, %v7713_v51 }
 0x85b   :  { %5889 = vmatmul.mubr.msk.f32.gmra.mxu1 %vm577_vm1, %v7705_v53  ;;  %v3058_v53 = vpop.permute.xlu1 %3057 }
 0x85c   :  { %5988 = vmatpush3.xpose.msk.msra.mxu1 %vm577_vm1, %v7713_v51  ;;  %6005 = vmatprep.mubr.msk.f32.mxu1 %vm577_vm1, %v3042_v62 }
 0x85d   :  { %5989 = vmatprep.subr.msk.mxu1 %vm577_vm1, %v3088_v49 }
 0x85f   :  { %v3062_v23 = vpop.permute.xlu1 %3061 }
 0x860   :  { %5990 = vmatpush3.xpose.msk.msra.mxu1 %vm577_vm1, %v3088_v49 }
 0x861   :  { %5991 = vmatprep.subr.msk.mxu1 %vm577_vm1, %v7715_v48 }
 0x863   :  { %v3066_v47 = vpop.permute.xlu1 %3065 }
 0x864   :  { %5992 = vmatpush3.xpose.msk.msra.mxu1 %vm577_vm1, %v7715_v48 }
 0x865   :  { %5993 = vmatprep.subr.msk.mxu1 %vm577_vm1, %v3084_v32 }
 0x867   :  { %v3072_v35 = vpop.permute.xlu1 %3071 }
 0x868   :  { %5994 = vmatpush3.xpose.msk.msra.mxu1 %vm577_vm1, %v3084_v32  ;;  %v5047_v32 = vunpack.c.h.bf16 %v5117_v38 }
 0x869   :  { %5995 = vmatprep.subr.msk.mxu1 %vm577_vm1, %v7717_v5 }
 0x86c   :  { %5996 = vmatpush3.xpose.msk.msra.mxu1 %vm577_vm1, %v7717_v5 }
 0x86d   :  { %5997 = vmatprep.subr.msk.mxu1 %vm577_vm1, %v3080_v59 }
 0x870   :  { %5998 = vmatpush3.xpose.msk.msra.mxu1 %vm577_vm1, %v3080_v59 }
 0x871   :  { %5999 = vmatprep.subr.msk.mxu1 %vm577_vm1, %v7719_v44 }
 0x874   :  { %6000 = vmatpush3.xpose.msk.msra.mxu1 %vm577_vm1, %v7719_v44 }
 0x875   :  { %6001 = vmatprep.subr.msk.mxu1 %vm577_vm1, %v3076_v37 }
 0x878   :  { %6002 = vmatpush3.xpose.msk.msra.mxu1 %vm577_vm1, %v3076_v37  ;;  %v5046_v37 = vunpack.c.l.bf16 %v5117_v38 }
 0x879   :  { %6003 = vmatprep.subr.msk.mxu1 %vm577_vm1, %v7721_v52 }
 0x87c   :  { %6004 = vmatpush3.xpose.msk.msra.mxu1 %vm577_vm1, %v7721_v52 }
 0x87f   :  { %6006 = vmatmul.mubr.msk.f32.vlgmr.msra.gmra.mxu1 %vm577_vm1, %v7723_v40 }
 0x880   :  { %6008 = vmatprep.mubr.msk.f32.mxu1 %vm577_vm1, %v3046_v11  ;;  %v5050_v11 = vunpack.c.l.bf16 %v5118_v41 }
 0x883   :  { %6009 = vmatmul.mubr.msk.f32.gmra.mxu1 %vm577_vm1, %v7725_v46 }
 0x884   :  { %6011 = vmatprep.mubr.msk.f32.mxu1 %vm577_vm1, %v3050_v42 }
 0x887   :  { %6012 = vmatmul.mubr.msk.f32.gmra.mxu1 %vm577_vm1, %v7727_v56 }
 0x888   :  { %6014 = vmatprep.mubr.msk.f32.mxu1 %vm577_vm1, %v3054_v29  ;;  %v5119_v29 = vld [vmem:[%s9064_s1 + $0xa0] sm:$0xff]  }
 0x889   :  { %v5054_v58 = vunpack.c.l.bf16 %v5119_v29 }
 0x88b   :  { %6015 = vmatmul.mubr.msk.f32.gmra.mxu1 %vm577_vm1, %v7729_v21 }
 0x88c   :  { %6017 = vmatprep.mubr.msk.f32.mxu1 %vm577_vm1, %v3058_v53 }
 0x88f   :  { %6018 = vmatmul.mubr.msk.f32.gmra.mxu1 %vm577_vm1, %v7731_v28 }
 0x890   :  { %6020 = vmatprep.mubr.msk.f32.mxu1 %vm577_vm1, %v3062_v23  ;;  %v5055_v23 = vunpack.c.h.bf16 %v5119_v29 }
 0x893   :  { %6021 = vmatmul.mubr.msk.f32.gmra.mxu1 %vm577_vm1, %v7733_v7 }
 0x894   :  { %6023 = vmatprep.mubr.msk.f32.mxu1 %vm577_vm1, %v3066_v47 }
 0x897   :  { %6024 = vmatmul.mubr.msk.f32.gmra.mxu1 %vm577_vm1, %v7735_v50 }
 0x898   :  { %6026 = vmatprep.mubr.msk.f32.mxu1 %vm577_vm1, %v7737_v4 }
 0x89b   :  { %6027 = vmatmul.mubr.msk.f32.gmra.mxu1 %vm577_vm1, %v3072_v35 }
 0x8ad   :  { %v7921_v51 = vpop.f32.mrf.mxu1 }
 0x8af   :  { %v7923_v48 = vpop.f32.mrf.mxu1 }
 0x8e3   :  { %v7925_v5 = vpop.f32.mrf.mxu1 }
 0x8e5   :  { %v7927_v44 = vpop.f32.mrf.mxu1 }
 0x8e7   :  { %v7929_v52 = vpop.f32.mrf.mxu1 }
 0x8e9   :  { %v7931_v40 = vpop.f32.mrf.mxu1 }
 0x8eb   :  { %v7933_v46 = vpop.f32.mrf.mxu1 }
 0x8ec   :  { %9067 = vst [vmem:[#allocation2_spill] sm:$0xff] %v7933_v46 }
 0x8ed   :  { %v7935_v56 = vpop.f32.mrf.mxu1 }
 0x8ee   :  { %9068 = vst [vmem:[#allocation3_spill] sm:$0xff] %v7935_v56 }
 0x8ef   :  { %v7937_v21 = vpop.f32.mrf.mxu1 }
 0x8f0   :  { %9069 = vst [vmem:[#allocation4_spill] sm:$0xff] %v7937_v21 }
 0x8f1   :  { %v7939_v28 = vpop.f32.mrf.mxu1 }
 0x8f2   :  { %9070 = vst [vmem:[#allocation5_spill] sm:$0xff] %v7939_v28 }
 0x8f3   :  { %v7941_v7 = vpop.f32.mrf.mxu1 }
 0x8f4   :  { %9071 = vst [vmem:[#allocation6_spill] sm:$0xff] %v7941_v7 }
 0x8f5   :  { %v7943_v50 = vpop.f32.mrf.mxu1 }
 0x8f6   :  { %9072 = vst [vmem:[#allocation7_spill] sm:$0xff] %v7943_v50 }
 0x8f7   :  { %v7945_v4 = vpop.f32.mrf.mxu1 }
 0x8f8   :  { %9073 = vst [vmem:[#allocation8_spill] sm:$0xff] %v7945_v4 }
 0x8f9   :  { %v7947_v36 = vpop.f32.mrf.mxu1 }
 0x8fa   :  { %9074 = vst [vmem:[#allocation9_spill] sm:$0xff] %v7947_v36 }
 0x8fb   :  { %v7952_v24 = vpop.f32.mrf.mxu1 }
 0x8fc   :  { %9075 = vst [vmem:[#allocation10_spill] sm:$0xff] %v7952_v24 }
 0x8fd   :  { %v7954_v43 = vpop.f32.mrf.mxu1 }
 0x8fe   :  { %9076 = vst [vmem:[#allocation11_spill] sm:$0xff] %v7954_v43 }
 0x8ff   :  { %v5869_v9 = vpop.f32.mrf.mxu1 }
 0x900   :  { %v7956_v54 = vadd.f32 %v5869_v9, %v5039_v57 }
 0x901   :  { %v2382_v3 = vpop.f32.mrf.mxu1 }
 0x902   :  { %v7958_v10 = vadd.f32 %v5038_v63, %v2382_v3  ;;  %2463 = vmax.xlane.f32.xlu0 %v7956_v54  ;;  %v5120_v63 = vld [vmem:[%s9064_s1 + $0xa8] sm:$0xff]  }
 0x903   :  { %v5872_v6 = vpop.f32.mrf.mxu1  ;;  %v5059_v3 = vunpack.c.h.bf16 %v5120_v63 }
 0x904   :  { %2461 = vmax.xlane.f32.xlu1 %v7958_v10  ;;  %v7972_v60 = vadd.f32 %v5872_v6, %v5043_v45 }
 0x905   :  { %v2392_v12 = vpop.f32.mrf.mxu1 }
 0x906   :  { %v7980_v49 = vadd.f32 %v5042_v1, %v2392_v12 }
 0x907   :  { %v5875_v2 = vpop.f32.mrf.mxu1 }
 0x908   :  { %v7984_v59 = vadd.f32 %v5875_v2, %v5047_v32  ;;  %v5058_v2 = vunpack.c.l.bf16 %v5120_v63 }
 0x909   :  { %v2402_v61 = vpop.f32.mrf.mxu1 }
 0x90a   :  { %v7987_v62 = vadd.f32 %v5046_v37, %v2402_v61  ;;  %v5121_v61 = vld [vmem:[%s9064_s1 + $0xb0] sm:$0xff]  }
 0x90b   :  { %v5878_v39 = vpop.f32.mrf.mxu1 }
 0x90c   :  { %v7977_v17 = vadd.f32 %v5878_v39, %v5051_v20  ;;  %v5063_v39 = vunpack.c.h.bf16 %v5121_v61 }
 0x90d   :  { %v2412_v42 = vpop.f32.mrf.mxu1 }
 0x90e   :  { %v8013_v53 = vadd.f32 %v5050_v11, %v2412_v42  ;;  %v5062_v42 = vunpack.c.l.bf16 %v5121_v61 }
 0x90f   :  { %v5881_v47 = vpop.f32.mrf.mxu1 }
 0x910   :  { %v8016_v35 = vadd.f32 %v5881_v47, %v5055_v23  ;;  %v5122_v23 = vld [vmem:[%s9064_s1 + $0xb8] sm:$0xff]  }
 0x911   :  { %v2422_v57 = vpop.f32.mrf.mxu1 }
 0x912   :  { %v8022_v9 = vadd.f32 %v5054_v58, %v2422_v57  ;;  %v5067_v58 = vunpack.c.h.bf16 %v5122_v23 }
 0x913   :  { %v5884_v6 = vpop.f32.mrf.mxu1 }
 0x914   :  { %v8025_v12 = vadd.f32 %v5884_v6, %v5059_v3  ;;  %v5066_v3 = vunpack.c.l.bf16 %v5122_v23 }
 0x915   :  { %2633 = vrot.lane.b32.xlu1 %v6935_v14, %s6619_s16  ;;  %v2432_v8 = vpop.f32.mrf.mxu1 }
 0x916   :  { %v8031_v20 = vadd.f32 %v5058_v2, %v2432_v8 }
 0x917   :  { %v5887_v38 = vpop.f32.mrf.mxu1 }
 0x918   :  { %2631 = vrot.lane.b32.xlu0 %v6943_v18, %s6619_s16  ;;  %v8035_v11 = vadd.f32 %v5887_v38, %v5063_v39 }
 0x919   :  { %v2442_v29 = vpop.f32.mrf.mxu1 }
 0x91b   :  { %v5890_v57 = vpop.f32.mrf.mxu1 }
 0x91c   :  { %v8044_v63 = vadd.f32 %v5890_v57, %v5067_v58 }
 0x91d   :  { %v2452_v6 = vpop.f32.mrf.mxu1 }
 0x91e   :  { %v8047_v2 = vadd.f32 %v5066_v3, %v2452_v6 }
 0x937   :  { %2467 = vmax.xlane.f32.xlu0 %v7972_v60 }
 0x939   :  { %2475 = vmax.xlane.f32.xlu1 %v7977_v17 }
 0x93b   :  { %2465 = vmax.xlane.f32.xlu0 %v7980_v49 }
 0x93f   :  { %2471 = vmax.xlane.f32.xlu0 %v7984_v59 }
 0x943   :  { %2469 = vmax.xlane.f32.xlu0 %v7987_v62 }
 0x94a   :  { %2629 = vrot.lane.b32.xlu1 %v6951_v22, %s6619_s16 }
 0x94e   :  { %2625 = vrot.lane.b32.xlu1 %v6959_v26, %s6619_s16 }
 0x952   :  { %2621 = vrot.lane.b32.xlu1 %v6967_v30, %s6619_s16 }
 0x956   :  { %2617 = vrot.lane.b32.xlu1 %v6975_v31, %s6619_s16 }
 0x959   :  { %2627 = vrot.lane.b32.xlu0 %v6939_v15, %s6619_s16 }
 0x95a   :  { %2613 = vrot.lane.b32.xlu1 %v6983_v33, %s6619_s16 }
 0x95d   :  { %2623 = vrot.lane.b32.xlu0 %v6947_v19, %s6619_s16 }
 0x95e   :  { %2609 = vrot.lane.b32.xlu1 %v6989_v34, %s6619_s16 }
 0x961   :  { %2619 = vrot.lane.b32.xlu0 %v6955_v16, %s6619_s16 }
 0x962   :  { %2605 = vrot.lane.b32.xlu1 %v6929_v25, %s6619_s16 }
 0x980   :  { %2473 = vmax.xlane.f32.xlu0 %v8013_v53 }
 0x984   :  { %2479 = vmax.xlane.f32.xlu0 %v8016_v35 }
 0x988   :  { %2477 = vmax.xlane.f32.xlu0 %v8022_v9 }
 0x98b   :  { %v2464_v41 = vpop.xlane.xlu0 %2463 }
 0x98c   :  { %2483 = vmax.xlane.f32.xlu0 %v8025_v12 }
 0x98d   :  { %v2462_v45 = vpop.xlane.xlu1 %2461 }
 0x98e   :  { %v2493_v1 = vsub.f32 %v7958_v10, %v2462_v45  ;;  %v8041_v10 = vadd.f32 %v5062_v42, %v2442_v29 }
 0x98f   :  { %v2632_v47 = vpop.permute.xlu0 %2631 }
 0x990   :  { %v2509_v32 = vmul.f32 1.442695, %v2493_v1  ;;  %2481 = vmax.xlane.f32.xlu0 %v8031_v20 }
 0x991   :  { %v2634_v37 = vpop.permute.xlu1 %2633 }
 0x992   :  { %6402 = vpow2.f32 %v2509_v32  ;;  %5893 = vmatprep.subr.mxu0 %v2634_v37  ;;  %v2494_v32 = vsub.f32 %v7956_v54, %v2464_v41 }
 0x993   :  { %5894 = vmatpush3.msra.mxu0 %v2634_v37 }
 0x994   :  { %2487 = vmax.xlane.f32.xlu0 %v8035_v11  ;;  %5895 = vmatprep.subr.mxu0 %v2632_v47  ;;  %v2511_v29 = vmul.f32 1.442695, %v2494_v32 }
 0x995   :  { %5896 = vmatpush3.msra.mxu0 %v2632_v47 }
 0x998   :  { %2485 = vmax.xlane.f32.xlu0 %v8041_v10 }
 0x99c   :  { %2491 = vmax.xlane.f32.xlu0 %v8044_v63 }
 0x99f   :  { %v8049_v8 = vpop.eup %6402 }
 0x9a0   :  { %2489 = vmax.xlane.f32.xlu0 %v8047_v2  ;;  %2541 = vadd.xlane.f32.xlu1 %v8049_v8 }
 0x9b6   :  { %2615 = vrot.lane.b32.xlu0 %v6963_v27, %s6619_s16 }
 0x9ba   :  { %2611 = vrot.lane.b32.xlu0 %v6971_v55, %s6619_s16 }
 0x9be   :  { %2607 = vrot.lane.b32.xlu0 %v6979_v0, %s6619_s16 }
 0x9c0   :  { %v2468_v61 = vpop.xlane.xlu0 %2467 }
 0x9c1   :  { %v2496_v23 = vsub.f32 %v7972_v60, %v2468_v61 }
 0x9c2   :  { %v2476_v45 = vpop.xlane.xlu1 %2475 }
 0x9c3   :  { %v2515_v3 = vmul.f32 1.442695, %v2496_v23  ;;  %v2500_v54 = vsub.f32 %v7977_v17, %v2476_v45 }
 0x9c4   :  { %v2466_v39 = vpop.xlane.xlu0 %2465 }
 0x9c5   :  { %v2495_v1 = vsub.f32 %v7980_v49, %v2466_v39  ;;  %v2523_v61 = vmul.f32 1.442695, %v2500_v54 }
 0x9c6   :  { %v2630_v38 = vpop.permute.xlu1 %2629 }
 0x9c7   :  { %v2513_v37 = vmul.f32 1.442695, %v2495_v1  ;;  %5897 = vmatprep.subr.mxu0 %v2630_v38 }
 0x9c8   :  { %v2472_v42 = vpop.xlane.xlu0 %2471  ;;  %5898 = vmatpush3.msra.mxu0 %v2630_v38 }
 0x9c9   :  { %6404 = vpow2.f32 %v2513_v37  ;;  %v2498_v6 = vsub.f32 %v7984_v59, %v2472_v42 }
 0x9ca   :  { %v2626_v57 = vpop.permute.xlu1 %2625  ;;  %6406 = vpow2.f32 %v2511_v29 }
 0x9cb   :  { %v2519_v41 = vmul.f32 1.442695, %v2498_v6 }
 0x9cc   :  { %v2470_v47 = vpop.xlane.xlu0 %2469 }
 0x9cd   :  { %v2497_v58 = vsub.f32 %v7987_v62, %v2470_v47 }
 0x9ce   :  { %v2622_v1 = vpop.permute.xlu1 %2621 }
 0x9cf   :  { %v2517_v49 = vmul.f32 1.442695, %v2497_v58 }
 0x9d0   :  { %v2628_v39 = vpop.permute.xlu0 %2627 }
 0x9d1   :  { %6408 = vpow2.f32 %v2517_v49  ;;  %5899 = vmatprep.subr.mxu0 %v2628_v39 }
 0x9d2   :  { %5900 = vmatpush3.msra.mxu0 %v2628_v39  ;;  %6410 = vpow2.f32 %v2515_v3  ;;  %v2618_v38 = vpop.permute.xlu1 %2617 }
 0x9d3   :  { %5901 = vmatprep.subr.mxu0 %v2626_v57  ;;  %6412 = vpow2.f32 %v2519_v41 }
 0x9d4   :  { %v2624_v60 = vpop.permute.xlu0 %2623  ;;  %5902 = vmatpush3.msra.mxu0 %v2626_v57  ;;  %6414 = vpow2.f32 %v2523_v61 }
 0x9d5   :  { %5903 = vmatprep.subr.mxu0 %v2624_v60 }
 0x9d6   :  { %v8065_v62 = vpop.eup %6404  ;;  %5904 = vmatpush3.msra.mxu0 %v2624_v60  ;;  %v2614_v61 = vpop.permute.xlu1 %2613 }
 0x9d7   :  { %2545 = vadd.xlane.f32.xlu1 %v8065_v62  ;;  %5905 = vmatprep.subr.mxu0 %v2622_v1  ;;  %v8068_v17 = vpop.eup %6406 }
 0x9d8   :  { %v2620_v59 = vpop.permute.xlu0 %2619  ;;  %5906 = vmatpush3.msra.mxu0 %v2622_v1  ;;  %v8087_v1 = vpop.f32.mrf.mxu1 }
 0x9d9   :  { %5907 = vmatprep.subr.mxu0 %v2620_v59 }
 0x9da   :  { %5908 = vmatpush3.msra.mxu0 %v2620_v59 }
 0x9db   :  { %5909 = vmatprep.subr.mxu0 %v2618_v38 }
 0x9dc   :  { %5910 = vmatpush3.msra.mxu0 %v2618_v38 }
 0x9dd   :  { %2543 = vadd.xlane.f32.xlu0 %v8068_v17 }
 0x9de   :  { %v8071_v45 = vpop.eup %6408 }
 0x9df   :  { %2549 = vadd.xlane.f32.xlu1 %v8071_v45  ;;  %v8074_v32 = vpop.eup %6410 }
 0x9e0   :  { %v8077_v37 = vpop.eup %6412 }
 0x9e1   :  { %2547 = vadd.xlane.f32.xlu0 %v8074_v32  ;;  %v8080_v42 = vpop.eup %6414 }
 0x9e5   :  { %2551 = vadd.xlane.f32.xlu0 %v8077_v37 }
 0x9e9   :  { %2555 = vadd.xlane.f32.xlu0 %v8080_v42 }
 0xa09   :  { %v2474_v29 = vpop.xlane.xlu0 %2473 }
 0xa0a   :  { %v2499_v23 = vsub.f32 %v8013_v53, %v2474_v29 }
 0xa0c   :  { %v2521_v47 = vmul.f32 1.442695, %v2499_v23 }
 0xa0d   :  { %v2480_v58 = vpop.xlane.xlu0 %2479 }
 0xa0e   :  { %6416 = vpow2.f32 %v2521_v47  ;;  %v2502_v57 = vsub.f32 %v8016_v35, %v2480_v58  ;;  %v8092_v35 = vpop.f32.mrf.mxu1  ;;  %v2610_v58 = vpop.permute.xlu1 %2609 }
 0xa10   :  { %v2527_v3 = vmul.f32 1.442695, %v2502_v57  ;;  %v8098_v47 = vpop.f32.mrf.mxu1 }
 0xa11   :  { %v2478_v6 = vpop.xlane.xlu0 %2477 }
 0xa12   :  { %6418 = vpow2.f32 %v2527_v3  ;;  %v2501_v49 = vsub.f32 %v8022_v9, %v2478_v6 }
 0xa14   :  { %v2525_v39 = vmul.f32 1.442695, %v2501_v49  ;;  %v3245_v49 = vpop.f32.mrf.mxu1 }
 0xa15   :  { %v2484_v54 = vpop.xlane.xlu0 %2483 }
 0xa16   :  { %6420 = vpow2.f32 %v2525_v39  ;;  %v2504_v41 = vsub.f32 %v8025_v12, %v2484_v54  ;;  %v2606_v54 = vpop.permute.xlu1 %2605 }
 0xa18   :  { %v2531_v60 = vmul.f32 1.442695, %v2504_v41 }
 0xa19   :  { %v2482_v53 = vpop.xlane.xlu0 %2481 }
 0xa1a   :  { %6422 = vpow2.f32 %v2531_v60  ;;  %v2503_v59 = vsub.f32 %v8031_v20, %v2482_v53  ;;  %v8108_v53 = vpop.f32.mrf.mxu1 }
 0xa1b   :  { %v8090_v38 = vpop.eup %6416 }
 0xa1c   :  { %v2529_v29 = vmul.f32 1.442695, %v2503_v59  ;;  %2553 = vadd.xlane.f32.xlu1 %v8090_v38 }
 0xa1d   :  { %v2488_v9 = vpop.xlane.xlu0 %2487 }
 0xa1e   :  { %6424 = vpow2.f32 %v2529_v29  ;;  %v2506_v23 = vsub.f32 %v8035_v11, %v2488_v9 }
 0xa1f   :  { %v8096_v12 = vpop.eup %6418 }
 0xa20   :  { %v2535_v57 = vmul.f32 1.442695, %v2506_v23  ;;  %2559 = vadd.xlane.f32.xlu0 %v8096_v12 }
 0xa21   :  { %v2486_v20 = vpop.xlane.xlu0 %2485 }
 0xa22   :  { %6426 = vpow2.f32 %v2535_v57  ;;  %v2505_v3 = vsub.f32 %v8041_v10, %v2486_v20  ;;  %v3255_v57 = vpop.f32.mrf.mxu1 }
 0xa23   :  { %v8102_v6 = vpop.eup %6420 }
 0xa24   :  { %v2533_v39 = vmul.f32 1.442695, %v2505_v3  ;;  %2557 = vadd.xlane.f32.xlu1 %v8102_v6 }
 0xa25   :  { %v2492_v11 = vpop.xlane.xlu0 %2491 }
 0xa26   :  { %6428 = vpow2.f32 %v2533_v39  ;;  %v2508_v41 = vsub.f32 %v8044_v63, %v2492_v11  ;;  %v6016_v39 = vpop.f32.mrf.mxu1 }
 0xa27   :  { %v8106_v60 = vpop.eup %6422 }
 0xa28   :  { %v2539_v59 = vmul.f32 1.442695, %v2508_v41  ;;  %2563 = vadd.xlane.f32.xlu0 %v8106_v60  ;;  %v3265_v41 = vpop.f32.mrf.mxu1 }
 0xa29   :  { %v2490_v29 = vpop.xlane.xlu0 %2489  ;;  %v2542_v10 = vpop.xlane.xlu1 %2541 }
 0xa2a   :  { %6430 = vpow2.f32 %v2539_v59  ;;  %v2507_v9 = vsub.f32 %v8047_v2, %v2490_v29  ;;  %v5123_v59 = vld [vmem:[%s9064_s1 + $0xc0] sm:$0xff]  }
 0xa2b   :  { %v8112_v23 = vpop.eup %6424  ;;  %6432 = vrcp.f32 %v2542_v10  ;;  %v5070_v10 = vunpack.c.l.bf16 %v5123_v59  ;;  %v5071_v43 = vunpack.c.h.bf16 %v5123_v59 }
 0xa2c   :  { %v2537_v20 = vmul.f32 1.442695, %v2507_v9  ;;  %2561 = vadd.xlane.f32.xlu1 %v8112_v23 }
 0xa2d   :  { %v2616_v63 = vpop.permute.xlu0 %2615 }
 0xa2e   :  { %6434 = vpow2.f32 %v2537_v20  ;;  %5911 = vmatprep.subr.mxu0 %v2616_v63  ;;  %v6019_v20 = vpop.f32.mrf.mxu1 }
 0xa2f   :  { %v8115_v3 = vpop.eup %6426  ;;  %5912 = vmatpush3.msra.mxu0 %v2616_v63  ;;  %v5124_v63 = vld [vmem:[%s9064_s1 + $0xc8] sm:$0xff]  }
 0xa30   :  { %2567 = vadd.xlane.f32.xlu0 %v8115_v3  ;;  %5913 = vmatprep.subr.mxu0 %v2614_v61  ;;  %v5074_v24 = vunpack.c.l.bf16 %v5124_v63  ;;  %v3275_v4 = vpop.f32.mrf.mxu1 }
 0xa31   :  { %v2612_v11 = vpop.permute.xlu0 %2611  ;;  %5914 = vmatpush3.msra.mxu0 %v2614_v61 }
 0xa32   :  { %5915 = vmatprep.subr.mxu0 %v2612_v11  ;;  %v8144_v59 = vadd.f32 %v5074_v24, %v3245_v49  ;;  %v5127_v24 = vld [vmem:[%s9064_s1 + $0xe0] sm:$0xff]  }
 0xa33   :  { %v8118_v2 = vpop.eup %6428  ;;  %5916 = vmatpush3.msra.mxu0 %v2612_v11 }
 0xa34   :  { %2565 = vadd.xlane.f32.xlu1 %v8118_v2  ;;  %5917 = vmatprep.subr.mxu0 %v2610_v58 }
 0xa35   :  { %v2608_v29 = vpop.permute.xlu0 %2607  ;;  %5918 = vmatpush3.msra.mxu0 %v2610_v58  ;;  %v8132_v58 = vadd.f32 %v5070_v10, %v8092_v35  ;;  %v6022_v10 = vpop.f32.mrf.mxu1 }
 0xa36   :  { %5919 = vmatprep.subr.mxu0 %v2608_v29 }
 0xa37   :  { %v8124_v9 = vpop.eup %6430  ;;  %5920 = vmatpush3.msra.mxu0 %v2608_v29  ;;  %v5125_v29 = vld [vmem:[%s9064_s1 + $0xd0] sm:$0xff]  }
 0xa38   :  { %v6433_v61 = vpop.eup %6432  ;;  %2571 = vadd.xlane.f32.xlu0 %v8124_v9  ;;  %5921 = vmatprep.subr.mxu0 %v2606_v54  ;;  %v5078_v35 = vunpack.c.l.bf16 %v5125_v29  ;;  %v5079_v50 = vunpack.c.h.bf16 %v5125_v29 }
 0xa39   :  { %5922 = vmatpush3.msra.mxu0 %v2606_v54  ;;  %v2589_v11 = vmul.f32 %v6433_v61, %v8049_v8  ;;  %v8142_v54 = vadd.f32 %v8087_v1, %v5071_v43  ;;  %v5075_v8 = vunpack.c.h.bf16 %v5124_v63  ;;  %v5126_v61 = vld [vmem:[%s9064_s1 + $0xd8] sm:$0xff]   ;;  %v3285_v1 = vpop.f32.mrf.mxu1 }
 0xa3a   :  { %v8154_v7 = vadd.f32 %v5078_v35, %v3255_v57  ;;  %v5082_v43 = vunpack.c.l.bf16 %v5126_v61  ;;  %v8162_v49 = vadd.f32 %v8108_v53, %v5079_v50  ;;  %v5083_v63 = vunpack.c.h.bf16 %v5126_v61  ;;  %v5128_v57 = vld [vmem:[%s9064_s1 + $0xe8] sm:$0xff]  }
 0xa3b   :  { %v8134_v36 = vpop.eup %6434  ;;  %5923 = vmatprep.mubr.f32.mxu0 %v2589_v11  ;;  %v8152_v11 = vadd.f32 %v8098_v47, %v5075_v8  ;;  %v5086_v47 = vunpack.c.l.bf16 %v5127_v24  ;;  %v6025_v29 = vpop.f32.mrf.mxu1  ;;  %v5087_v35 = vunpack.c.h.bf16 %v5127_v24  ;;  %v5090_v50 = vunpack.c.l.bf16 %v5128_v57 }
 0xa3c   :  { %2569 = vadd.xlane.f32.xlu1 %v8134_v36  ;;  %3314 = vmax.xlane.f32.xlu0 %v8132_v58  ;;  %v8164_v28 = vadd.f32 %v5082_v43, %v3265_v41  ;;  %v8171_v8 = vadd.f32 %v6016_v39, %v5083_v63  ;;  %v5129_v41 = vld [vmem:[%s9064_s1 + $0xf0] sm:$0xff]   ;;  %v5091_v43 = vunpack.c.h.bf16 %v5128_v57 }
 0xa3d   :  { %v8173_v21 = vadd.f32 %v5086_v47, %v3275_v4  ;;  %v3295_v53 = vpop.f32.mrf.mxu1  ;;  %v8180_v61 = vadd.f32 %v6019_v20, %v5087_v35  ;;  %v8182_v56 = vadd.f32 %v5090_v50, %v3285_v1  ;;  %v5094_v39 = vunpack.c.l.bf16 %v5129_v41  ;;  %v5130_v4 = vld [vmem:[%s9064_s1 + $0xf8] sm:$0xff]  }
 0xa3e   :  { %v8189_v24 = vadd.f32 %v6022_v10, %v5091_v43  ;;  %v5095_v47 = vunpack.c.h.bf16 %v5129_v41  ;;  %v5098_v20 = vunpack.c.l.bf16 %v5130_v4  ;;  %v5099_v57 = vunpack.c.h.bf16 %v5130_v4  ;;  %v2798_v41 = vld [vmem:[%s9065_s4 + $0x10] sm:$0xff] }
 0xa3f   :  { %v6028_v63 = vpop.f32.mrf.mxu1  ;;  %v8191_v46 = vadd.f32 %v5094_v39, %v3295_v53  ;;  %5947 = vmatprep.subr.mxu0 %v2798_v41 }
 0xa40   :  { %3316 = vmax.xlane.f32.xlu1 %v8142_v54  ;;  %3318 = vmax.xlane.f32.xlu0 %v8144_v59  ;;  %v8195_v1 = vadd.f32 %v6025_v29, %v5095_v47  ;;  %v8201_v10 = vadd.f32 %v6028_v63, %v5099_v57 }
 0xa41   :  { %v3305_v35 = vpop.f32.mrf.mxu1 }
 0xa42   :  { %v8197_v50 = vadd.f32 %v5098_v20, %v3305_v35 }
 0xa44   :  { %3320 = vmax.xlane.f32.xlu1 %v8152_v11  ;;  %3322 = vmax.xlane.f32.xlu0 %v8154_v7 }
 0xa48   :  { %3324 = vmax.xlane.f32.xlu1 %v8162_v49  ;;  %3326 = vmax.xlane.f32.xlu0 %v8164_v28 }
 0xa4c   :  { %3328 = vmax.xlane.f32.xlu1 %v8171_v8  ;;  %3330 = vmax.xlane.f32.xlu0 %v8173_v21 }
 0xa50   :  { %3332 = vmax.xlane.f32.xlu1 %v8180_v61  ;;  %3334 = vmax.xlane.f32.xlu0 %v8182_v56 }
 0xa54   :  { %3336 = vmax.xlane.f32.xlu1 %v8189_v24  ;;  %3338 = vmax.xlane.f32.xlu0 %v8191_v46 }
 0xa58   :  { %3340 = vmax.xlane.f32.xlu1 %v8195_v1  ;;  %3342 = vmax.xlane.f32.xlu0 %v8197_v50 }
 0xa5c   :  { %3344 = vmax.xlane.f32.xlu1 %v8201_v10 }
 0xa60   :  { %v2546_v53 = vpop.xlane.xlu1 %2545 }
 0xa61   :  { %6436 = vrcp.f32 %v2546_v53 }
 0xa66   :  { %v2544_v29 = vpop.xlane.xlu0 %2543 }
 0xa67   :  { %6438 = vrcp.f32 %v2544_v29 }
 0xa68   :  { %v2550_v43 = vpop.xlane.xlu1 %2549 }
 0xa69   :  { %6440 = vrcp.f32 %v2550_v43 }
 0xa6a   :  { %v2548_v39 = vpop.xlane.xlu0 %2547 }
 0xa6b   :  { %6442 = vrcp.f32 %v2548_v39 }
 0xa6d   :  { %3486 = vrot.lane.b32.xlu1 %v6935_v14, %s6620_s26 }
 0xa6e   :  { %v2552_v63 = vpop.xlane.xlu0 %2551  ;;  %3488 = vrot.lane.b32.xlu0 %v6933_v13, %s6620_s26  ;;  %v6437_v4 = vpop.eup %6436 }
 0xa6f   :  { %6444 = vrcp.f32 %v2552_v63  ;;  %v2591_v14 = vmul.f32 %v6437_v4, %v8065_v62 }
 0xa71   :  { %3482 = vrot.lane.b32.xlu1 %v6951_v22, %s6620_s26 }
 0xa72   :  { %3484 = vrot.lane.b32.xlu0 %v6943_v18, %s6620_s26 }
 0xa74   :  { %v6439_v47 = vpop.eup %6438 }
 0xa75   :  { %3478 = vrot.lane.b32.xlu1 %v6959_v26, %s6620_s26  ;;  %v2590_v20 = vmul.f32 %v6439_v47, %v8068_v17 }
 0xa76   :  { %3480 = vrot.lane.b32.xlu0 %v6939_v15, %s6620_s26  ;;  %v6441_v13 = vpop.eup %6440 }
 0xa77   :  { %5924 = vmatmul.mubr.f32.vlgmr.msra.gmra.mxu0 %v2590_v20  ;;  %v2593_v22 = vmul.f32 %v6441_v13, %v8071_v45 }
 0xa78   :  { %v6443_v35 = vpop.eup %6442  ;;  %5926 = vmatprep.mubr.f32.mxu0 %v2591_v14  ;;  %5948 = vmatpush3.msra.mxu0 %v2798_v41 }
 0xa79   :  { %3474 = vrot.lane.b32.xlu1 %v6967_v30, %s6620_s26  ;;  %v2592_v18 = vmul.f32 %v6443_v35, %v8074_v32 }
 0xa7a   :  { %3476 = vrot.lane.b32.xlu0 %v6947_v19, %s6620_s26  ;;  %v2556_v19 = vpop.xlane.xlu0 %2555 }
 0xa7b   :  { %5927 = vmatmul.mubr.f32.gmra.mxu0 %v2592_v18  ;;  %6446 = vrcp.f32 %v2556_v19 }
 0xa7c   :  { %v6445_v26 = vpop.eup %6444  ;;  %5929 = vmatprep.mubr.f32.mxu0 %v2593_v22 }
 0xa7d   :  { %3470 = vrot.lane.b32.xlu1 %v6975_v31, %s6620_s26  ;;  %v2594_v15 = vmul.f32 %v6445_v26, %v8077_v37 }
 0xa7e   :  { %3472 = vrot.lane.b32.xlu0 %v6955_v16, %s6620_s26 }
 0xa7f   :  { %5930 = vmatmul.mubr.f32.gmra.mxu0 %v2594_v15 }
 0xa81   :  { %3466 = vrot.lane.b32.xlu1 %v6983_v33, %s6620_s26 }
 0xa82   :  { %3468 = vrot.lane.b32.xlu0 %v6963_v27, %s6620_s26 }
 0xa85   :  { %3462 = vrot.lane.b32.xlu1 %v6989_v34, %s6620_s26 }
 0xa86   :  { %3464 = vrot.lane.b32.xlu0 %v6971_v55, %s6620_s26 }
 0xa88   :  { %v6447_v27 = vpop.eup %6446 }
 0xa89   :  { %3458 = vrot.lane.b32.xlu1 %v6929_v25, %s6620_s26  ;;  %v2596_v25 = vmul.f32 %v6447_v27, %v8080_v42 }
 0xa8a   :  { %3460 = vrot.lane.b32.xlu0 %v6979_v0, %s6620_s26 }
 0xaa5   :  { %v2554_v16 = vpop.xlane.xlu1 %2553 }
 0xaa6   :  { %6448 = vrcp.f32 %v2554_v16 }
 0xaa9   :  { %v2560_v30 = vpop.xlane.xlu0 %2559 }
 0xaaa   :  { %6450 = vrcp.f32 %v2560_v30 }
 0xaad   :  { %v2558_v31 = vpop.xlane.xlu1 %2557 }
 0xaae   :  { %6452 = vrcp.f32 %v2558_v31 }
 0xab1   :  { %v2564_v33 = vpop.xlane.xlu0 %2563 }
 0xab2   :  { %6454 = vrcp.f32 %v2564_v33 }
 0xab3   :  { %v6449_v34 = vpop.eup %6448 }
 0xab4   :  { %v2595_v62 = vmul.f32 %v6449_v34, %v8090_v38 }
 0xab5   :  { %v2562_v55 = vpop.xlane.xlu1 %2561 }
 0xab6   :  { %6456 = vrcp.f32 %v2562_v55  ;;  %5932 = vmatprep.mubr.f32.mxu0 %v2595_v62 }
 0xab7   :  { %5933 = vmatmul.mubr.f32.gmra.mxu0 %v2596_v25  ;;  %v6451_v0 = vpop.eup %6450 }
 0xab8   :  { %v2598_v57 = vmul.f32 %v6451_v0, %v8096_v12 }
 0xab9   :  { %v2568_v17 = vpop.xlane.xlu0 %2567 }
 0xaba   :  { %6458 = vrcp.f32 %v2568_v17 }
 0xabb   :  { %v6453_v45 = vpop.eup %6452 }
 0xabc   :  { %v2597_v32 = vmul.f32 %v6453_v45, %v8102_v6 }
 0xabd   :  { %v2566_v37 = vpop.xlane.xlu1 %2565 }
 0xabe   :  { %6460 = vrcp.f32 %v2566_v37  ;;  %5935 = vmatprep.mubr.f32.mxu0 %v2597_v32 }
 0xabf   :  { %5936 = vmatmul.mubr.f32.gmra.mxu0 %v2598_v57  ;;  %v6455_v53 = vpop.eup %6454 }
 0xac0   :  { %v2600_v39 = vmul.f32 %v6455_v53, %v8106_v60 }
 0xac1   :  { %v2572_v38 = vpop.xlane.xlu0 %2571 }
 0xac2   :  { %6462 = vrcp.f32 %v2572_v38 }
 0xac3   :  { %v6457_v41 = vpop.eup %6456 }
 0xac4   :  { %v2599_v42 = vmul.f32 %v6457_v41, %v8112_v23 }
 0xac5   :  { %v3315_v29 = vpop.xlane.xlu0 %3314  ;;  %v2570_v43 = vpop.xlane.xlu1 %2569 }
 0xac6   :  { %v3346_v63 = vsub.f32 %v8132_v58, %v3315_v29  ;;  %6464 = vrcp.f32 %v2570_v43  ;;  %5938 = vmatprep.mubr.f32.mxu0 %v2599_v42 }
 0xac7   :  { %5939 = vmatmul.mubr.f32.gmra.mxu0 %v2600_v39  ;;  %v6459_v47 = vpop.eup %6458 }
 0xac8   :  { %v3362_v6 = vmul.f32 1.442695, %v3346_v63  ;;  %v2602_v58 = vmul.f32 %v6459_v47, %v8115_v3 }
 0xac9   :  { %v3319_v12 = vpop.xlane.xlu0 %3318  ;;  %v3317_v4 = vpop.xlane.xlu1 %3316 }
 0xaca   :  { %6466 = vpow2.f32 %v3362_v6  ;;  %v3348_v20 = vsub.f32 %v8144_v59, %v3319_v12  ;;  %v3347_v14 = vsub.f32 %v8142_v54, %v3317_v4 }
 0xacb   :  { %v6461_v23 = vpop.eup %6460 }
 0xacc   :  { %v3366_v13 = vmul.f32 1.442695, %v3348_v20  ;;  %v3364_v35 = vmul.f32 1.442695, %v3347_v14  ;;  %v2601_v18 = vmul.f32 %v6461_v23, %v8118_v2 }
 0xacd   :  { %v3323_v60 = vpop.xlane.xlu0 %3322  ;;  %v3321_v22 = vpop.xlane.xlu1 %3320 }
 0xace   :  { %6468 = vpow2.f32 %v3366_v13  ;;  %v3350_v26 = vsub.f32 %v8154_v7, %v3323_v60  ;;  %v3349_v15 = vsub.f32 %v8152_v11, %v3321_v22  ;;  %5941 = vmatprep.mubr.f32.mxu0 %v2601_v18 }
 0xacf   :  { %6470 = vpow2.f32 %v3364_v35  ;;  %5942 = vmatmul.mubr.f32.gmra.mxu0 %v2602_v58  ;;  %v6463_v30 = vpop.eup %6462 }
 0xad0   :  { %v3370_v59 = vmul.f32 1.442695, %v3350_v26  ;;  %v3368_v19 = vmul.f32 1.442695, %v3349_v15  ;;  %v2604_v62 = vmul.f32 %v6463_v30, %v8124_v9  ;;  %v8318_v26 = vpop.f32.mrf.mxu0 }
 0xad1   :  { %v3327_v54 = vpop.xlane.xlu0 %3326  ;;  %v3325_v16 = vpop.xlane.xlu1 %3324 }
 0xad2   :  { %6472 = vpow2.f32 %v3370_v59  ;;  %v3352_v2 = vsub.f32 %v8164_v28, %v3327_v54  ;;  %v3351_v31 = vsub.f32 %v8162_v49, %v3325_v16  ;;  %v8320_v15 = vpop.f32.mrf.mxu0 }
 0xad3   :  { %v6465_v27 = vpop.eup %6464  ;;  %6474 = vpow2.f32 %v3368_v19 }
 0xad4   :  { %v3374_v3 = vmul.f32 1.442695, %v3352_v2  ;;  %v3372_v33 = vmul.f32 1.442695, %v3351_v31  ;;  %v2603_v7 = vmul.f32 %v6465_v27, %v8134_v36  ;;  %v8322_v59 = vpop.f32.mrf.mxu0 }
 0xad5   :  { %v3331_v11 = vpop.xlane.xlu0 %3330  ;;  %v3329_v34 = vpop.xlane.xlu1 %3328 }
 0xad6   :  { %6476 = vpow2.f32 %v3374_v3  ;;  %v3354_v55 = vsub.f32 %v8173_v21, %v3331_v11  ;;  %v3353_v25 = vsub.f32 %v8171_v8, %v3329_v34  ;;  %5944 = vmatprep.mubr.f32.mxu0 %v2603_v7  ;;  %v8324_v19 = vpop.f32.mrf.mxu0 }
 0xad7   :  { %v8263_v0 = vpop.eup %6466  ;;  %6478 = vpow2.f32 %v3372_v33  ;;  %5945 = vmatmul.mubr.f32.gmra.mxu0 %v2604_v62 }
 0xad8   :  { %v3378_v28 = vmul.f32 1.442695, %v3354_v55  ;;  %v3376_v49 = vmul.f32 1.442695, %v3353_v25  ;;  %3394 = vadd.xlane.f32.xlu1 %v8263_v0  ;;  %v8326_v54 = vpop.f32.mrf.mxu0 }
 0xad9   :  { %v3335_v17 = vpop.xlane.xlu0 %3334  ;;  %v3333_v36 = vpop.xlane.xlu1 %3332 }
 0xada   :  { %6480 = vpow2.f32 %v3378_v28  ;;  %v3356_v45 = vsub.f32 %v8182_v56, %v3335_v17  ;;  %v3355_v9 = vsub.f32 %v8180_v61, %v3333_v36  ;;  %v8328_v16 = vpop.f32.mrf.mxu0 }
 0xadb   :  { %v8268_v32 = vpop.eup %6468  ;;  %6482 = vpow2.f32 %v3376_v49 }
 0xadc   :  { %v8270_v21 = vpop.eup %6470  ;;  %v3382_v8 = vmul.f32 1.442695, %v3356_v45  ;;  %v3380_v37 = vmul.f32 1.442695, %v3355_v9  ;;  %3398 = vadd.xlane.f32.xlu1 %v8268_v32  ;;  %v8330_v30 = vpop.f32.mrf.mxu0 }
 0xadd   :  { %3396 = vadd.xlane.f32.xlu0 %v8270_v21  ;;  %v3339_v57 = vpop.xlane.xlu0 %3338  ;;  %v3337_v38 = vpop.xlane.xlu1 %3336 }
 0xade   :  { %6484 = vpow2.f32 %v3382_v8  ;;  %v3358_v53 = vsub.f32 %v8191_v46, %v3339_v57  ;;  %v3357_v56 = vsub.f32 %v8189_v24, %v3337_v38  ;;  %v8332_v2 = vpop.f32.mrf.mxu0 }
 0xadf   :  { %v8276_v41 = vpop.eup %6472  ;;  %6486 = vpow2.f32 %v3380_v37 }
 0xae0   :  { %v8278_v61 = vpop.eup %6474  ;;  %v3386_v42 = vmul.f32 1.442695, %v3358_v53  ;;  %v3384_v29 = vmul.f32 1.442695, %v3357_v56  ;;  %3402 = vadd.xlane.f32.xlu1 %v8276_v41  ;;  %v8334_v31 = vpop.f32.mrf.mxu0 }
 0xae1   :  { %3400 = vadd.xlane.f32.xlu0 %v8278_v61  ;;  %v3343_v43 = vpop.xlane.xlu0 %3342  ;;  %v3341_v39 = vpop.xlane.xlu1 %3340 }
 0xae2   :  { %6488 = vpow2.f32 %v3386_v42  ;;  %v3360_v63 = vsub.f32 %v8197_v50, %v3343_v43  ;;  %v3359_v46 = vsub.f32 %v8195_v1, %v3341_v39  ;;  %v8336_v27 = vpop.f32.mrf.mxu0 }
 0xae3   :  { %v8284_v6 = vpop.eup %6476  ;;  %6490 = vpow2.f32 %v3384_v29 }
 0xae4   :  { %v8286_v24 = vpop.eup %6478  ;;  %v3390_v12 = vmul.f32 1.442695, %v3360_v63  ;;  %v3388_v4 = vmul.f32 1.442695, %v3359_v46  ;;  %3406 = vadd.xlane.f32.xlu1 %v8284_v6  ;;  %v8338_v3 = vpop.f32.mrf.mxu0 }
 0xae5   :  { %3404 = vadd.xlane.f32.xlu0 %v8286_v24  ;;  %v3489_v47 = vpop.permute.xlu0 %3488  ;;  %v3345_v20 = vpop.xlane.xlu1 %3344 }
 0xae6   :  { %6492 = vpow2.f32 %v3390_v12  ;;  %v3361_v14 = vsub.f32 %v8201_v10, %v3345_v20  ;;  %6029 = vmatprep.subr.mxu0 %v3489_v47  ;;  %v8340_v33 = vpop.f32.mrf.mxu0 }
 0xae7   :  { %v8291_v50 = vpop.eup %6480  ;;  %6494 = vpow2.f32 %v3388_v4 }
 0xae8   :  { %v8293_v1 = vpop.eup %6482  ;;  %v3392_v23 = vmul.f32 1.442695, %v3361_v14  ;;  %3410 = vadd.xlane.f32.xlu1 %v8291_v50  ;;  %v8342_v7 = vpop.f32.mrf.mxu0 }
 0xae9   :  { %3408 = vadd.xlane.f32.xlu0 %v8293_v1  ;;  %v3487_v11 = vpop.permute.xlu1 %3486  ;;  %v3485_v55 = vpop.permute.xlu0 %3484 }
 0xaea   :  { %6496 = vpow2.f32 %v3392_v23  ;;  %v8344_v34 = vpop.f32.mrf.mxu0 }
 0xaeb   :  { %v8297_v13 = vpop.eup %6484 }
 0xaec   :  { %v8299_v35 = vpop.eup %6486  ;;  %3414 = vadd.xlane.f32.xlu1 %v8297_v13  ;;  %v8346_v62 = vpop.f32.mrf.mxu0 }
 0xaed   :  { %3412 = vadd.xlane.f32.xlu0 %v8299_v35  ;;  %v3483_v25 = vpop.permute.xlu1 %3482  ;;  %v3481_v17 = vpop.permute.xlu0 %3480 }
 0xaee   :  { %v8348_v28 = vpop.f32.mrf.mxu0 }
 0xaef   :  { %v8303_v10 = vpop.eup %6488 }
 0xaf0   :  { %v8305_v18 = vpop.eup %6490  ;;  %3418 = vadd.xlane.f32.xlu1 %v8303_v10 }
 0xaf1   :  { %3416 = vadd.xlane.f32.xlu0 %v8305_v18  ;;  %v3479_v45 = vpop.permute.xlu1 %3478  ;;  %v3477_v37 = vpop.permute.xlu0 %3476 }
 0xaf3   :  { %v8309_v60 = vpop.eup %6492 }
 0xaf4   :  { %v8311_v22 = vpop.eup %6494  ;;  %3422 = vadd.xlane.f32.xlu1 %v8309_v60 }
 0xaf5   :  { %3420 = vadd.xlane.f32.xlu0 %v8311_v22  ;;  %v3475_v38 = vpop.permute.xlu1 %3474  ;;  %v3473_v56 = vpop.permute.xlu0 %3472 }
 0xaf7   :  { %v8315_v58 = vpop.eup %6496 }
 0xaf9   :  { %3424 = vadd.xlane.f32.xlu0 %v8315_v58  ;;  %v3471_v42 = vpop.permute.xlu1 %3470  ;;  %v3469_v29 = vpop.permute.xlu0 %3468 }
 0xafd   :  { %v3467_v43 = vpop.permute.xlu1 %3466  ;;  %v3465_v39 = vpop.permute.xlu0 %3464 }
 0xb01   :  { %v3463_v63 = vpop.permute.xlu1 %3462  ;;  %v3461_v46 = vpop.permute.xlu0 %3460 }
 0xb05   :  { %v3459_v12 = vpop.permute.xlu1 %3458 }
 0xb37   :  { %v5925_v49 = vpop.f32.mrf.mxu0 }
 0xb39   :  { %v2719_v36 = vpop.f32.mrf.mxu0 }
 0xb3a   :  { %5949 = vmatprep.mubr.msk.f32.mxu0 %vm577_vm1, %v2719_v36 }
 0xb3b   :  { %v5928_v9 = vpop.f32.mrf.mxu0  ;;  %5950 = vmatmul.mubr.msk.f32.vlgmr.msra.gmra.mxu0 %vm577_vm1, %v5925_v49 }
 0xb3c   :  { %6030 = vmatpush3.msra.mxu0 %v3489_v47 }
 0xb3d   :  { %6031 = vmatprep.subr.mxu0 %v3487_v11  ;;  %v2729_v8 = vpop.f32.mrf.mxu0 }
 0xb3e   :  { %6032 = vmatpush3.msra.mxu0 %v3487_v11  ;;  %5952 = vmatprep.mubr.msk.f32.mxu0 %vm577_vm1, %v2729_v8 }
 0xb3f   :  { %6033 = vmatprep.subr.mxu0 %v3485_v55  ;;  %v5931_v57 = vpop.f32.mrf.mxu0  ;;  %5953 = vmatmul.mubr.msk.f32.gmra.mxu0 %vm577_vm1, %v5928_v9 }
 0xb40   :  { %6034 = vmatpush3.msra.mxu0 %v3485_v55 }
 0xb41   :  { %6035 = vmatprep.subr.mxu0 %v3483_v25  ;;  %v2739_v53 = vpop.f32.mrf.mxu0 }
 0xb42   :  { %6036 = vmatpush3.msra.mxu0 %v3483_v25  ;;  %5955 = vmatprep.mubr.msk.f32.mxu0 %vm577_vm1, %v2739_v53 }
 0xb43   :  { %6037 = vmatprep.subr.mxu0 %v3481_v17  ;;  %5956 = vmatmul.mubr.msk.f32.gmra.mxu0 %vm577_vm1, %v5931_v57 }
 0xb44   :  { %6038 = vmatpush3.msra.mxu0 %v3481_v17 }
 0xb45   :  { %6039 = vmatprep.subr.mxu0 %v3479_v45 }
 0xb46   :  { %6040 = vmatpush3.msra.mxu0 %v3479_v45 }
 0xb47   :  { %6041 = vmatprep.subr.mxu0 %v3477_v37 }
 0xb48   :  { %6042 = vmatpush3.msra.mxu0 %v3477_v37 }
 0xb49   :  { %6043 = vmatprep.subr.mxu0 %v3475_v38 }
 0xb4a   :  { %6044 = vmatpush3.msra.mxu0 %v3475_v38 }
 0xb4b   :  { %6045 = vmatprep.subr.mxu0 %v3473_v56 }
 0xb4c   :  { %6046 = vmatpush3.msra.mxu0 %v3473_v56 }
 0xb4d   :  { %6047 = vmatprep.subr.mxu0 %v3471_v42 }
 0xb4e   :  { %6048 = vmatpush3.msra.mxu0 %v3471_v42 }
 0xb4f   :  { %6049 = vmatprep.subr.mxu0 %v3469_v29 }
 0xb50   :  { %6050 = vmatpush3.msra.mxu0 %v3469_v29 }
 0xb51   :  { %6051 = vmatprep.subr.mxu0 %v3467_v43 }
 0xb52   :  { %6052 = vmatpush3.msra.mxu0 %v3467_v43 }
 0xb53   :  { %6053 = vmatprep.subr.mxu0 %v3465_v39 }
 0xb54   :  { %6054 = vmatpush3.msra.mxu0 %v3465_v39 }
 0xb55   :  { %6055 = vmatprep.subr.mxu0 %v3463_v63 }
 0xb56   :  { %6056 = vmatpush3.msra.mxu0 %v3463_v63 }
 0xb57   :  { %6057 = vmatprep.subr.mxu0 %v3461_v46 }
 0xb58   :  { %6058 = vmatpush3.msra.mxu0 %v3461_v46 }
 0xb59   :  { %6059 = vmatprep.subr.mxu0 %v3459_v12 }
 0xb5a   :  { %6060 = vmatpush3.msra.mxu0 %v3459_v12 }
 0xb61   :  { %v3395_v47 = vpop.xlane.xlu1 %3394 }
 0xb62   :  { %6498 = vrcp.f32 %v3395_v47 }
 0xb65   :  { %v3399_v23 = vpop.xlane.xlu1 %3398 }
 0xb66   :  { %v3397_v14 = vpop.xlane.xlu0 %3396 }
 0xb67   :  { %6500 = vrcp.f32 %v3397_v14 }
 0xb68   :  { %6502 = vrcp.f32 %v3399_v23 }
 0xb69   :  { %v3403_v49 = vpop.xlane.xlu1 %3402 }
 0xb6a   :  { %v3401_v25 = vpop.xlane.xlu0 %3400 }
 0xb6b   :  { %6504 = vrcp.f32 %v3401_v25 }
 0xb6c   :  { %6506 = vrcp.f32 %v3403_v49 }
 0xb6d   :  { %v3407_v9 = vpop.xlane.xlu1 %3406 }
 0xb6e   :  { %v3405_v36 = vpop.xlane.xlu0 %3404 }
 0xb6f   :  { %6508 = vrcp.f32 %v3405_v36  ;;  %v6499_v56 = vpop.eup %6498 }
 0xb70   :  { %6510 = vrcp.f32 %v3407_v9  ;;  %v3442_v46 = vmul.f32 %v6499_v56, %v8263_v0 }
 0xb71   :  { %v3411_v57 = vpop.xlane.xlu1 %3410 }
 0xb72   :  { %v3409_v8 = vpop.xlane.xlu0 %3408 }
 0xb73   :  { %6512 = vrcp.f32 %v3409_v8 }
 0xb74   :  { %v6501_v39 = vpop.eup %6500  ;;  %6514 = vrcp.f32 %v3411_v57 }
 0xb75   :  { %v3415_v42 = vpop.xlane.xlu1 %3414  ;;  %v6503_v12 = vpop.eup %6502  ;;  %v3443_v47 = vmul.f32 %v6501_v39, %v8270_v21 }
 0xb76   :  { %v3413_v53 = vpop.xlane.xlu0 %3412  ;;  %v3444_v14 = vmul.f32 %v6503_v12, %v8268_v32  ;;  %v2087_v12 = vadd.f32 %v8324_v19, %v7927_v44 }
 0xb77   :  { %v5934_v4 = vpop.f32.mrf.mxu0  ;;  %6516 = vrcp.f32 %v3413_v53 }
 0xb78   :  { %6518 = vrcp.f32 %v3415_v42 }
 0xb79   :  { %v2749_v20 = vpop.f32.mrf.mxu0 }
 0xb7a   :  { %5958 = vmatprep.mubr.msk.f32.mxu0 %vm577_vm1, %v2749_v20  ;;  %v3417_v63 = vpop.xlane.xlu0 %3416  ;;  %v6505_v20 = vpop.eup %6504 }
 0xb7b   :  { %5959 = vmatmul.mubr.msk.f32.gmra.mxu0 %vm577_vm1, %v5934_v4  ;;  %v3419_v4 = vpop.xlane.xlu1 %3418  ;;  %v6507_v23 = vpop.eup %6506  ;;  %6520 = vrcp.f32 %v3417_v63 }
 0xb7c   :  { %v6509_v0 = vpop.eup %6508  ;;  %6522 = vrcp.f32 %v3419_v4  ;;  %v3446_v25 = vmul.f32 %v6507_v23, %v8276_v41  ;;  %v9078_v23 = vld [vmem:[#allocation3_spill] sm:$0xff] }
 0xb7d   :  { %v6511_v49 = vpop.eup %6510  ;;  %v3447_v21 = vmul.f32 %v6509_v0, %v8286_v24  ;;  %v9079_v0 = vld [vmem:[#allocation4_spill] sm:$0xff] }
 0xb7f   :  { %v5937_v11 = vpop.f32.mrf.mxu0 }
 0xb80   :  { %v6513_v36 = vpop.eup %6512 }
 0xb81   :  { %v2759_v55 = vpop.f32.mrf.mxu0  ;;  %v6515_v9 = vpop.eup %6514 }
 0xb82   :  { %5961 = vmatprep.mubr.msk.f32.mxu0 %vm577_vm1, %v2759_v55  ;;  %v3445_v55 = vmul.f32 %v6505_v20, %v8278_v61  ;;  %v3449_v61 = vmul.f32 %v6513_v36, %v8293_v1  ;;  %v3450_v41 = vmul.f32 %v6515_v9, %v8291_v50  ;;  %v9081_v36 = vld [vmem:[#allocation6_spill] sm:$0xff] }
 0xb83   :  { %5962 = vmatmul.mubr.msk.f32.gmra.mxu0 %vm577_vm1, %v5937_v11  ;;  %v3421_v11 = vpop.xlane.xlu0 %3420 }
 0xb84   :  { %6524 = vrcp.f32 %v3421_v11  ;;  %v6517_v8 = vpop.eup %6516  ;;  %v2107_v11 = vadd.f32 %v8332_v2, %v9078_v23  ;;  %v2132_v2 = vadd.f32 %v8338_v3, %v9081_v36 }
 0xb85   :  { %v3451_v57 = vmul.f32 %v6517_v8, %v8299_v35  ;;  %v3651_v35 = vld [vmem:[%s9065_s4 + $0x18] sm:$0xff] }
 0xb86   :  { %6085 = vmatprep.subr.mxu0 %v3651_v35 }
 0xb87   :  { %v5940_v17 = vpop.f32.mrf.mxu0  ;;  %v3425_v32 = vpop.xlane.xlu0 %3424 }
 0xb89   :  { %v2769_v45 = vpop.f32.mrf.mxu0 }
 0xb8a   :  { %5964 = vmatprep.mubr.msk.f32.mxu0 %vm577_vm1, %v2769_v45  ;;  %v3448_v45 = vmul.f32 %v6511_v49, %v8284_v6 }
 0xb8b   :  { %5965 = vmatmul.mubr.msk.f32.gmra.mxu0 %vm577_vm1, %v5940_v17  ;;  %v3423_v17 = vpop.xlane.xlu1 %3422 }
 0xb8c   :  { %6526 = vrcp.f32 %v3423_v17 }
 0xb8d   :  { %6528 = vrcp.f32 %v3425_v32 }
 0xb8f   :  { %v5943_v37 = vpop.f32.mrf.mxu0 }
 0xb91   :  { %v2779_v38 = vpop.f32.mrf.mxu0 }
 0xb92   :  { %5967 = vmatprep.mubr.msk.f32.mxu0 %vm577_vm1, %v2779_v38 }
 0xb93   :  { %5968 = vmatmul.mubr.msk.f32.gmra.mxu0 %vm577_vm1, %v5943_v37  ;;  %v6519_v37 = vpop.eup %6518 }
 0xb94   :  { %v6521_v24 = vpop.eup %6520  ;;  %v3452_v38 = vmul.f32 %v6519_v37, %v8297_v13 }
 0xb95   :  { %v6523_v53 = vpop.eup %6522  ;;  %v3453_v6 = vmul.f32 %v6521_v24, %v8305_v18 }
 0xb96   :  { %v6525_v56 = vpop.eup %6524  ;;  %v3454_v42 = vmul.f32 %v6523_v53, %v8303_v10  ;;  %v2082_v10 = vadd.f32 %v8318_v26, %v7921_v51  ;;  %v2102_v51 = vadd.f32 %v8326_v54, %v7929_v52 }
 0xb97   :  { %v5946_v29 = vpop.f32.mrf.mxu0  ;;  %v3455_v50 = vmul.f32 %v6525_v56, %v8311_v22  ;;  %v2077_v22 = vadd.f32 %v8320_v15, %v7923_v48  ;;  %v2097_v15 = vadd.f32 %v8328_v16, %v7931_v40  ;;  %v2122_v40 = vadd.f32 %v8334_v31, %v9079_v0 }
 0xb99   :  { %v2789_v43 = vpop.f32.mrf.mxu0  ;;  %v6527_v1 = vpop.eup %6526 }
 0xb9a   :  { %5970 = vmatprep.mubr.msk.f32.mxu0 %vm577_vm1, %v2789_v43  ;;  %v3456_v43 = vmul.f32 %v6527_v1, %v8309_v60 }
 0xb9b   :  { %5971 = vmatmul.mubr.msk.f32.gmra.mxu0 %vm577_vm1, %v5946_v29  ;;  %v6529_v29 = vpop.eup %6528 }
 0xb9c   :  { %6061 = vmatprep.mubr.f32.mxu0 %v3442_v46  ;;  %v3457_v13 = vmul.f32 %v6529_v29, %v8315_v58  ;;  %v2092_v58 = vadd.f32 %v8322_v59, %v7925_v5 }
 0xb9f   :  { %6062 = vmatmul.mubr.f32.vlgmr.msra.gmra.mxu0 %v3443_v47 }
 0xba0   :  { %6064 = vmatprep.mubr.f32.mxu0 %v3444_v14  ;;  %6086 = vmatpush3.msra.mxu0 %v3651_v35  ;;  %v9077_v14 = vld [vmem:[#allocation2_spill] sm:$0xff] }
 0xba1   :  { %v2112_v44 = vadd.f32 %v8330_v30, %v9077_v14 }
 0xba3   :  { %6065 = vmatmul.mubr.f32.gmra.mxu0 %v3445_v55 }
 0xba4   :  { %6067 = vmatprep.mubr.f32.mxu0 %v3446_v25  ;;  %v9080_v25 = vld [vmem:[#allocation5_spill] sm:$0xff] }
 0xba5   :  { %v2117_v49 = vadd.f32 %v8336_v27, %v9080_v25 }
 0xba7   :  { %6068 = vmatmul.mubr.f32.gmra.mxu0 %v3447_v21 }
 0xba8   :  { %6070 = vmatprep.mubr.f32.mxu0 %v3448_v45  ;;  %v9082_v45 = vld [vmem:[#allocation7_spill] sm:$0xff] }
 0xba9   :  { %v2127_v9 = vadd.f32 %v8340_v33, %v9082_v45 }
 0xbab   :  { %6071 = vmatmul.mubr.f32.gmra.mxu0 %v3449_v61 }
 0xbac   :  { %6073 = vmatprep.mubr.f32.mxu0 %v3450_v41  ;;  %v9083_v41 = vld [vmem:[#allocation8_spill] sm:$0xff] }
 0xbad   :  { %v2142_v27 = vadd.f32 %v8342_v7, %v9083_v41  ;;  %v6597_v41 = vld [vmem:[%s9060_s0 + $0x10] sm:$0xff] }
 0xbaf   :  { %6074 = vmatmul.mubr.f32.gmra.mxu0 %v3451_v57  ;;  %v9084_v57 = vld [vmem:[#allocation9_spill] sm:$0xff] }
 0xbb0   :  { %6076 = vmatprep.mubr.f32.mxu0 %v3452_v38  ;;  %v2137_v24 = vadd.f32 %v8344_v34, %v9084_v57 }
 0xbb3   :  { %6077 = vmatmul.mubr.f32.gmra.mxu0 %v3453_v6  ;;  %v9085_v6 = vld [vmem:[#allocation10_spill] sm:$0xff] }
 0xbb4   :  { %6079 = vmatprep.mubr.f32.mxu0 %v3454_v42  ;;  %v2152_v33 = vadd.f32 %v8346_v62, %v9085_v6  ;;  %v9086_v42 = vld [vmem:[#allocation11_spill] sm:$0xff] }
 0xbb5   :  { %v2147_v1 = vadd.f32 %v8348_v28, %v9086_v42 }
 0xbb7   :  { %6080 = vmatmul.mubr.f32.gmra.mxu0 %v3455_v50 }
 0xbb8   :  { %6082 = vmatprep.mubr.f32.mxu0 %v3456_v43 }
 0xbbb   :  { %6083 = vmatmul.mubr.f32.gmra.mxu0 %v3457_v13 }
 0xbfb   :  { %v5951_v18 = vpop.f32.mrf.mxu0 }
 0xbfc   :  { %v8389_v39 = vadd.f32 %v5951_v18, %v2082_v10 }
 0xbfd   :  { %v2913_v60 = vpop.f32.mrf.mxu0 }
 0xbfe   :  { %v8393_v63 = vadd.f32 %v2913_v60, %v2077_v22 }
 0xbff   :  { %v5954_v46 = vpop.f32.mrf.mxu0 }
 0xc00   :  { %v8397_v4 = vadd.f32 %v5954_v46, %v2092_v58 }
 0xc01   :  { %v2923_v47 = vpop.f32.mrf.mxu0 }
 0xc02   :  { %v8401_v26 = vadd.f32 %v2923_v47, %v2087_v12 }
 0xc03   :  { %v5957_v48 = vpop.f32.mrf.mxu0 }
 0xc04   :  { %v8405_v20 = vadd.f32 %v5957_v48, %v2102_v51 }
 0xc05   :  { %v2933_v5 = vpop.f32.mrf.mxu0 }
 0xc06   :  { %v8407_v59 = vadd.f32 %v2933_v5, %v2097_v15  ;;  %v8468_v15 = vld [vmem:[%s9062_s5 + $0x4] ss:$0 sm:$0xff] }
 0xc3b   :  { %v5960_v19 = vpop.f32.mrf.mxu0 }
 0xc3c   :  { %v8413_v55 = vadd.f32 %v5960_v19, %v2112_v44 }
 0xc3d   :  { %v2943_v52 = vpop.f32.mrf.mxu0 }
 0xc3e   :  { %v8415_v54 = vadd.f32 %v2943_v52, %v2107_v11  ;;  %v6594_v52 = vld [vmem:[%s9060_s0 + $0x8] sm:$0xff] }
 0xc43   :  { %v5963_v16 = vpop.f32.mrf.mxu0 }
 0xc44   :  { %v8421_v17 = vadd.f32 %v5963_v16, %v2122_v40 }
 0xc45   :  { %v2953_v21 = vpop.f32.mrf.mxu0 }
 0xc46   :  { %v8423_v30 = vadd.f32 %v2953_v21, %v2117_v49 }
 0xc4b   :  { %v5966_v32 = vpop.f32.mrf.mxu0 }
 0xc4c   :  { %v8429_v61 = vadd.f32 %v5966_v32, %v2132_v2 }
 0xc4d   :  { %v2963_v8 = vpop.f32.mrf.mxu0 }
 0xc4e   :  { %v8431_v31 = vadd.f32 %v2963_v8, %v2127_v9 }
 0xc53   :  { %v5969_v37 = vpop.f32.mrf.mxu0 }
 0xc54   :  { %v8437_v38 = vadd.f32 %v5969_v37, %v2142_v27 }
 0xc55   :  { %v2973_v53 = vpop.f32.mrf.mxu0 }
 0xc56   :  { %v8439_v3 = vadd.f32 %v2973_v53, %v2137_v24  ;;  %v6598_v53 = vld [vmem:[%s9060_s0 + $0x28] sm:$0xff] }
 0xc5b   :  { %v5972_v56 = vpop.f32.mrf.mxu0 }
 0xc5c   :  { %v8445_v50 = vadd.f32 %v5972_v56, %v2152_v33 }
 0xc5d   :  { %v2983_v29 = vpop.f32.mrf.mxu0 }
 0xc5e   :  { %v8447_v7 = vadd.f32 %v2983_v29, %v2147_v1  ;;  %v6599_v1 = vld [vmem:[%s9060_s0 + $0x20] sm:$0xff] }
 0xc5f   :  { %v6063_v43 = vpop.f32.mrf.mxu0 }
 0xc61   :  { %v3572_v13 = vpop.f32.mrf.mxu0 }
 0xc62   :  { %6087 = vmatprep.mubr.msk.f32.mxu0 %vm577_vm1, %v3572_v13 }
 0xc63   :  { %v6066_v34 = vpop.f32.mrf.mxu0  ;;  %6088 = vmatmul.mubr.msk.f32.vlgmr.msra.gmra.mxu0 %vm577_vm1, %v6063_v43 }
 0xc65   :  { %v3582_v35 = vpop.f32.mrf.mxu0 }
 0xc66   :  { %6090 = vmatprep.mubr.msk.f32.mxu0 %vm577_vm1, %v3582_v35  ;;  %v6600_v35 = vld [vmem:[%s9060_s0 + $0x38] sm:$0xff] }
 0xc67   :  { %v6069_v62 = vpop.f32.mrf.mxu0  ;;  %6091 = vmatmul.mubr.msk.f32.gmra.mxu0 %vm577_vm1, %v6066_v34 }
 0xc69   :  { %v3592_v10 = vpop.f32.mrf.mxu0 }
 0xc6a   :  { %6093 = vmatprep.mubr.msk.f32.mxu0 %vm577_vm1, %v3592_v10 }
 0xc6b   :  { %v6072_v28 = vpop.f32.mrf.mxu0  ;;  %6094 = vmatmul.mubr.msk.f32.gmra.mxu0 %vm577_vm1, %v6069_v62 }
 0xc6d   :  { %v3602_v18 = vpop.f32.mrf.mxu0 }
 0xc6e   :  { %6096 = vmatprep.mubr.msk.f32.mxu0 %vm577_vm1, %v3602_v18 }
 0xc6f   :  { %v6075_v22 = vpop.f32.mrf.mxu0  ;;  %6097 = vmatmul.mubr.msk.f32.gmra.mxu0 %vm577_vm1, %v6072_v28 }
 0xc71   :  { %v3612_v60 = vpop.f32.mrf.mxu0 }
 0xc72   :  { %6099 = vmatprep.mubr.msk.f32.mxu0 %vm577_vm1, %v3612_v60 }
 0xc73   :  { %v6078_v58 = vpop.f32.mrf.mxu0  ;;  %6100 = vmatmul.mubr.msk.f32.gmra.mxu0 %vm577_vm1, %v6075_v22  ;;  %v6601_v22 = vld [vmem:[%s9060_s0 + $0x30] sm:$0xff] }
 0xc75   :  { %v3622_v46 = vpop.f32.mrf.mxu0 }
 0xc76   :  { %6102 = vmatprep.mubr.msk.f32.mxu0 %vm577_vm1, %v3622_v46 }
 0xc77   :  { %v6081_v12 = vpop.f32.mrf.mxu0  ;;  %6103 = vmatmul.mubr.msk.f32.gmra.mxu0 %vm577_vm1, %v6078_v58 }
 0xc79   :  { %v3632_v47 = vpop.f32.mrf.mxu0 }
 0xc7a   :  { %6105 = vmatprep.mubr.msk.f32.mxu0 %vm577_vm1, %v3632_v47  ;;  %v6602_v47 = vld [vmem:[%s9060_s0 + $0x48] sm:$0xff] }
 0xc7b   :  { %v6084_v51 = vpop.f32.mrf.mxu0  ;;  %6106 = vmatmul.mubr.msk.f32.gmra.mxu0 %vm577_vm1, %v6081_v12 }
 0xc7d   :  { %v3642_v48 = vpop.f32.mrf.mxu0 }
 0xc7e   :  { %6108 = vmatprep.mubr.msk.f32.mxu0 %vm577_vm1, %v3642_v48 }
 0xc7f   :  { %6109 = vmatmul.mubr.msk.f32.gmra.mxu0 %vm577_vm1, %v6084_v51 }
 0xd23   :  { %v6089_v5 = vpop.f32.mrf.mxu0 }
 0xd24   :  { %v3846_v14 = vadd.f32 %v6089_v5, %v8389_v39  ;;  %v6595_v39 = vld [vmem:[%s9060_s0] sm:$0xff] }
 0xd25   :  { %v3766_v44 = vpop.f32.mrf.mxu0 }
 0xd26   :  { %v3866_v19 = vadd.f32 %v8468_v15, %v3846_v14  ;;  %v3845_v23 = vadd.f32 %v3766_v44, %v8393_v63  ;;  %v6603_v44 = vld [vmem:[%s9060_s0 + $0x40] sm:$0xff] }
 0xd27   :  { %v6092_v11 = vpop.f32.mrf.mxu0 }
 0xd28   :  { %v8476_v0 = vadd.f32 %v6594_v52, %v3866_v19  ;;  %v3865_v40 = vadd.f32 %v8468_v15, %v3845_v23  ;;  %v3848_v16 = vadd.f32 %v6092_v11, %v8397_v4  ;;  %v6596_v4 = vld [vmem:[%s9060_s0 + $0x18] sm:$0xff] }
 0xd29   :  { %v3776_v25 = vpop.f32.mrf.mxu0 }
 0xd2a   :  { %v8483_v49 = vadd.f32 %v6595_v39, %v3865_v40  ;;  %v3868_v63 = vadd.f32 %v8468_v15, %v3848_v16  ;;  %v3847_v21 = vadd.f32 %v3776_v25, %v8401_v26  ;;  %v3900_v36 = vsel %vm45_vm0, %v8476_v0, 0.0  ;;  %v6604_v40 = vld [vmem:[%s9060_s0 + $0x58] sm:$0xff] }
 0xd2b   :  { %3901 = vadd.xlane.f32.xlu1 %v3900_v36  ;;  %v6095_v2 = vpop.f32.mrf.mxu0 }
 0xd2c   :  { %v8492_v32 = vadd.f32 %v6596_v4, %v3868_v63  ;;  %v3867_v45 = vadd.f32 %v8468_v15, %v3847_v21  ;;  %v3850_v9 = vadd.f32 %v6095_v2, %v8405_v20  ;;  %v3897_v8 = vsel %vm45_vm0, %v8483_v49, 0.0  ;;  %v6605_v21 = vld [vmem:[%s9060_s0 + $0x50] sm:$0xff] }
 0xd2d   :  { %3898 = vadd.xlane.f32.xlu0 %v3897_v8  ;;  %v3786_v26 = vpop.f32.mrf.mxu0 }
 0xd2e   :  { %v8501_v27 = vadd.f32 %v6597_v41, %v3867_v45  ;;  %v3870_v37 = vadd.f32 %v8468_v15, %v3850_v9  ;;  %v3849_v57 = vadd.f32 %v3786_v26, %v8407_v59  ;;  %v3906_v24 = vsel %vm45_vm0, %v8492_v32, 0.0  ;;  %v6606_v9 = vld [vmem:[%s9060_s0 + $0x68] sm:$0xff] }
 0xd2f   :  { %3907 = vadd.xlane.f32.xlu1 %v3906_v24  ;;  %v6098_v20 = vpop.f32.mrf.mxu0 }
 0xd30   :  { %v8510_v6 = vadd.f32 %v6598_v53, %v3870_v37  ;;  %v3869_v33 = vadd.f32 %v8468_v15, %v3849_v57  ;;  %v3852_v56 = vadd.f32 %v6098_v20, %v8413_v55  ;;  %v3903_v42 = vsel %vm45_vm0, %v8501_v27, 0.0  ;;  %v6607_v57 = vld [vmem:[%s9060_s0 + $0x60] sm:$0xff] }
 0xd31   :  { %3904 = vadd.xlane.f32.xlu0 %v3903_v42  ;;  %v3796_v59 = vpop.f32.mrf.mxu0 }
 0xd32   :  { %v8519_v29 = vadd.f32 %v6599_v1, %v3869_v33  ;;  %v3872_v43 = vadd.f32 %v8468_v15, %v3852_v56  ;;  %v3851_v13 = vadd.f32 %v3796_v59, %v8415_v54  ;;  %v3912_v34 = vsel %vm45_vm0, %v8510_v6, 0.0 }
 0xd33   :  { %3913 = vadd.xlane.f32.xlu1 %v3912_v34  ;;  %v6101_v55 = vpop.f32.mrf.mxu0 }
 0xd34   :  { %v8528_v62 = vadd.f32 %v6600_v35, %v3872_v43  ;;  %v3871_v10 = vadd.f32 %v8468_v15, %v3851_v13  ;;  %v3854_v28 = vadd.f32 %v6101_v55, %v8421_v17  ;;  %v3909_v18 = vsel %vm45_vm0, %v8519_v29, 0.0 }
 0xd35   :  { %3910 = vadd.xlane.f32.xlu0 %v3909_v18  ;;  %v3806_v54 = vpop.f32.mrf.mxu0 }
 0xd36   :  { %v8537_v60 = vadd.f32 %v6601_v22, %v3871_v10  ;;  %v3874_v58 = vadd.f32 %v8468_v15, %v3854_v28  ;;  %v3853_v46 = vadd.f32 %v3806_v54, %v8423_v30  ;;  %v3918_v12 = vsel %vm45_vm0, %v8528_v62, 0.0 }
 0xd37   :  { %3919 = vadd.xlane.f32.xlu1 %v3918_v12  ;;  %v6104_v17 = vpop.f32.mrf.mxu0 }
 0xd38   :  { %v8546_v51 = vadd.f32 %v6602_v47, %v3874_v58  ;;  %v3873_v48 = vadd.f32 %v8468_v15, %v3853_v46  ;;  %v3856_v5 = vadd.f32 %v6104_v17, %v8429_v61  ;;  %v3915_v14 = vsel %vm45_vm0, %v8537_v60, 0.0 }
 0xd39   :  { %3916 = vadd.xlane.f32.xlu0 %v3915_v14  ;;  %v3816_v30 = vpop.f32.mrf.mxu0 }
 0xd3a   :  { %v8555_v19 = vadd.f32 %v6603_v44, %v3873_v48  ;;  %v3876_v23 = vadd.f32 %v8468_v15, %v3856_v5  ;;  %v3855_v11 = vadd.f32 %v3816_v30, %v8431_v31  ;;  %v3924_v52 = vsel %vm45_vm0, %v8546_v51, 0.0 }
 0xd3b   :  { %3925 = vadd.xlane.f32.xlu1 %v3924_v52  ;;  %v6107_v61 = vpop.f32.mrf.mxu0 }
 0xd3c   :  { %v8564_v16 = vadd.f32 %v6604_v40, %v3876_v23  ;;  %v3875_v25 = vadd.f32 %v8468_v15, %v3855_v11  ;;  %v3858_v39 = vadd.f32 %v6107_v61, %v8437_v38  ;;  %v3921_v63 = vsel %vm45_vm0, %v8555_v19, 0.0 }
 0xd3d   :  { %3922 = vadd.xlane.f32.xlu0 %v3921_v63  ;;  %v3826_v31 = vpop.f32.mrf.mxu0 }
 0xd3e   :  { %v8573_v36 = vadd.f32 %v6605_v21, %v3875_v25  ;;  %v3878_v2 = vadd.f32 %v8468_v15, %v3858_v39  ;;  %v3857_v4 = vadd.f32 %v3826_v31, %v8439_v3  ;;  %v3930_v45 = vsel %vm45_vm0, %v8564_v16, 0.0 }
 0xd3f   :  { %3931 = vadd.xlane.f32.xlu1 %v3930_v45  ;;  %v6110_v38 = vpop.f32.mrf.mxu0 }
 0xd40   :  { %v8582_v8 = vadd.f32 %v6606_v9, %v3878_v2  ;;  %v3877_v26 = vadd.f32 %v8468_v15, %v3857_v4  ;;  %v3860_v41 = vadd.f32 %v6110_v38, %v8445_v50  ;;  %v3927_v37 = vsel %vm45_vm0, %v8573_v36, 0.0  ;;  %v6608_v50 = vld [vmem:[%s9060_s0 + $0x78] sm:$0xff] }
 0xd41   :  { %3928 = vadd.xlane.f32.xlu0 %v3927_v37  ;;  %v3836_v3 = vpop.f32.mrf.mxu0 }
 0xd42   :  { %v8591_v24 = vadd.f32 %v6607_v57, %v3877_v26  ;;  %v3880_v20 = vadd.f32 %v8468_v15, %v3860_v41  ;;  %v3859_v53 = vadd.f32 %v3836_v3, %v8447_v7  ;;  %v3936_v33 = vsel %vm45_vm0, %v8582_v8, 0.0  ;;  %v6609_v7 = vld [vmem:[%s9060_s0 + $0x70] sm:$0xff] }
 0xd43   :  { %3937 = vadd.xlane.f32.xlu1 %v3936_v33 }
 0xd44   :  { %v8600_v56 = vadd.f32 %v6608_v50, %v3880_v20  ;;  %v3879_v42 = vadd.f32 %v8468_v15, %v3859_v53  ;;  %v3933_v59 = vsel %vm45_vm0, %v8591_v24, 0.0  ;;  %v4148_v15 = vld [vmem:[%s9061_s2 + $0x38] sm:$0xff] }
 0xd45   :  { %3934 = vadd.xlane.f32.xlu0 %v3933_v59  ;;  %6111 = vmatprep.subr.mxu1 %v4148_v15 }
 0xd46   :  { %v8608_v1 = vadd.f32 %v6609_v7, %v3879_v42  ;;  %v3942_v43 = vsel %vm45_vm0, %v8600_v56, 0.0  ;;  %6112 = vmatpush3.msra.mxu1 %v4148_v15 }
 0xd47   :  { %3943 = vadd.xlane.f32.xlu1 %v3942_v43 }
 0xd48   :  { %v3939_v13 = vsel %vm45_vm0, %v8608_v1, 0.0 }
 0xd49   :  { %3940 = vadd.xlane.f32.xlu0 %v3939_v13 }
 0xdb4   :  { %v3902_v34 = vpop.xlane.xlu1 %3901 }
 0xdb5   :  { %v3946_v55 = vmul.f32 0.03125, %v3902_v34 }
 0xdb6   :  { %v3899_v35 = vpop.xlane.xlu0 %3898 }
 0xdb7   :  { %v8618_v10 = vsub.f32 %v8476_v0, %v3946_v55  ;;  %v3945_v28 = vmul.f32 0.03125, %v3899_v35 }
 0xdb8   :  { %v3908_v18 = vpop.xlane.xlu1 %3907 }
 0xdb9   :  { %v8621_v54 = vsub.f32 %v8483_v49, %v3945_v28  ;;  %v3948_v22 = vmul.f32 0.03125, %v3908_v18  ;;  %v3978_v58 = vmul.f32 %v8618_v10, %v8618_v10 }
 0xdba   :  { %v3905_v46 = vpop.xlane.xlu0 %3904 }
 0xdbb   :  { %v8626_v12 = vsub.f32 %v8492_v32, %v3948_v22  ;;  %v3947_v17 = vmul.f32 0.03125, %v3905_v46  ;;  %v3996_v47 = vsel %vm45_vm0, %v3978_v58, 0.0  ;;  %v3977_v48 = vmul.f32 %v8621_v54, %v8621_v54 }
 0xdbc   :  { %v3914_v5 = vpop.xlane.xlu1 %3913  ;;  %3997 = vadd.xlane.f32.xlu1 %v3996_v47 }
 0xdbd   :  { %v8632_v14 = vsub.f32 %v8501_v27, %v3947_v17  ;;  %v3950_v30 = vmul.f32 0.03125, %v3914_v5  ;;  %v3993_v44 = vsel %vm45_vm0, %v3977_v48, 0.0  ;;  %v3980_v23 = vmul.f32 %v8626_v12, %v8626_v12 }
 0xdbe   :  { %v3911_v11 = vpop.xlane.xlu0 %3910  ;;  %3994 = vadd.xlane.f32.xlu0 %v3993_v44 }
 0xdbf   :  { %v8638_v52 = vsub.f32 %v8510_v6, %v3950_v30  ;;  %v3949_v61 = vmul.f32 0.03125, %v3911_v11  ;;  %v4002_v40 = vsel %vm45_vm0, %v3980_v23, 0.0  ;;  %v3979_v25 = vmul.f32 %v8632_v14, %v8632_v14 }
 0xdc0   :  { %v3920_v39 = vpop.xlane.xlu1 %3919  ;;  %4003 = vadd.xlane.f32.xlu1 %v4002_v40 }
 0xdc1   :  { %v8644_v63 = vsub.f32 %v8519_v29, %v3949_v61  ;;  %v3952_v31 = vmul.f32 0.03125, %v3920_v39  ;;  %v3999_v21 = vsel %vm45_vm0, %v3979_v25, 0.0  ;;  %v3982_v2 = vmul.f32 %v8638_v52, %v8638_v52 }
 0xdc2   :  { %v3917_v4 = vpop.xlane.xlu0 %3916  ;;  %4000 = vadd.xlane.f32.xlu0 %v3999_v21 }
 0xdc3   :  { %v8650_v45 = vsub.f32 %v8528_v62, %v3952_v31  ;;  %v3951_v38 = vmul.f32 0.03125, %v3917_v4  ;;  %v4008_v9 = vsel %vm45_vm0, %v3982_v2, 0.0  ;;  %v3981_v26 = vmul.f32 %v8644_v63, %v8644_v63 }
 0xdc4   :  { %v3926_v41 = vpop.xlane.xlu1 %3925  ;;  %4009 = vadd.xlane.f32.xlu1 %v4008_v9 }
 0xdc5   :  { %v8656_v37 = vsub.f32 %v8537_v60, %v3951_v38  ;;  %v3954_v3 = vmul.f32 0.03125, %v3926_v41  ;;  %v4005_v57 = vsel %vm45_vm0, %v3981_v26, 0.0  ;;  %v3984_v20 = vmul.f32 %v8650_v45, %v8650_v45 }
 0xdc6   :  { %v3923_v53 = vpop.xlane.xlu0 %3922  ;;  %4006 = vadd.xlane.f32.xlu0 %v4005_v57 }
 0xdc7   :  { %v8662_v33 = vsub.f32 %v8546_v51, %v3954_v3  ;;  %v3953_v50 = vmul.f32 0.03125, %v3923_v53  ;;  %v4014_v42 = vsel %vm45_vm0, %v3984_v20, 0.0  ;;  %v3983_v59 = vmul.f32 %v8656_v37, %v8656_v37 }
 0xdc8   :  { %v3932_v7 = vpop.xlane.xlu1 %3931  ;;  %4015 = vadd.xlane.f32.xlu1 %v4014_v42  ;;  %v4146_v42 = vld [vmem:[%s9061_s2 + $0x28] sm:$0xff] }
 0xdc9   :  { %v8668_v43 = vsub.f32 %v8555_v19, %v3953_v50  ;;  %v3956_v13 = vmul.f32 0.03125, %v3932_v7  ;;  %v4011_v15 = vsel %vm45_vm0, %v3983_v59, 0.0  ;;  %v3986_v34 = vmul.f32 %v8662_v33, %v8662_v33  ;;  %v4147_v50 = vld [vmem:[%s9061_s2 + $0x30] sm:$0xff]  ;;  %v4145_v59 = vld [vmem:[%s9061_s2 + $0x20] sm:$0xff] }
 0xdca   :  { %v3929_v55 = vpop.xlane.xlu0 %3928  ;;  %4012 = vadd.xlane.f32.xlu0 %v4011_v15  ;;  %6113 = vmatprep.subr.mxu1 %v4147_v50 }
 0xdcb   :  { %v8674_v35 = vsub.f32 %v8564_v16, %v3956_v13  ;;  %v3955_v28 = vmul.f32 0.03125, %v3929_v55  ;;  %v4020_v18 = vsel %vm45_vm0, %v3986_v34, 0.0  ;;  %v3985_v22 = vmul.f32 %v8668_v43, %v8668_v43  ;;  %6114 = vmatpush3.msra.mxu1 %v4147_v50 }
 0xdcc   :  { %v3938_v58 = vpop.xlane.xlu1 %3937  ;;  %4021 = vadd.xlane.f32.xlu1 %v4020_v18  ;;  %6115 = vmatprep.subr.mxu1 %v4146_v42 }
 0xdcd   :  { %v8680_v46 = vsub.f32 %v8573_v36, %v3955_v28  ;;  %v3958_v17 = vmul.f32 0.03125, %v3938_v58  ;;  %v4017_v47 = vsel %vm45_vm0, %v3985_v22, 0.0  ;;  %v3988_v48 = vmul.f32 %v8674_v35, %v8674_v35  ;;  %6116 = vmatpush3.msra.mxu1 %v4146_v42 }
 0xdce   :  { %v3935_v5 = vpop.xlane.xlu0 %3934  ;;  %4018 = vadd.xlane.f32.xlu0 %v4017_v47  ;;  %6117 = vmatprep.subr.mxu1 %v4145_v59 }
 0xdcf   :  { %v8686_v30 = vsub.f32 %v8582_v8, %v3958_v17  ;;  %v3957_v44 = vmul.f32 0.03125, %v3935_v5  ;;  %v4026_v23 = vsel %vm45_vm0, %v3988_v48, 0.0  ;;  %v3987_v11 = vmul.f32 %v8680_v46, %v8680_v46  ;;  %6118 = vmatpush3.msra.mxu1 %v4145_v59 }
 0xdd0   :  { %4027 = vadd.xlane.f32.xlu1 %v4026_v23  ;;  %v3944_v61 = vpop.xlane.xlu1 %3943 }
 0xdd1   :  { %v8692_v40 = vsub.f32 %v8591_v24, %v3957_v44  ;;  %v3960_v25 = vmul.f32 0.03125, %v3944_v61  ;;  %v4023_v39 = vsel %vm45_vm0, %v3987_v11, 0.0  ;;  %v3990_v31 = vmul.f32 %v8686_v30, %v8686_v30 }
 0xdd2   :  { %4024 = vadd.xlane.f32.xlu0 %v4023_v39  ;;  %v3941_v21 = vpop.xlane.xlu0 %3940 }
 0xdd3   :  { %v8698_v2 = vsub.f32 %v8600_v56, %v3960_v25  ;;  %v3959_v4 = vmul.f32 0.03125, %v3941_v21  ;;  %v4032_v38 = vsel %vm45_vm0, %v3990_v31, 0.0  ;;  %v3989_v9 = vmul.f32 %v8692_v40, %v8692_v40 }
 0xdd4   :  { %4033 = vadd.xlane.f32.xlu1 %v4032_v38 }
 0xdd5   :  { %v8704_v26 = vsub.f32 %v8608_v1, %v3959_v4  ;;  %v4029_v41 = vsel %vm45_vm0, %v3989_v9, 0.0  ;;  %v3992_v3 = vmul.f32 %v8698_v2, %v8698_v2 }
 0xdd6   :  { %4030 = vadd.xlane.f32.xlu0 %v4029_v41 }
 0xdd7   :  { %v4038_v57 = vsel %vm45_vm0, %v3992_v3, 0.0  ;;  %v3991_v20 = vmul.f32 %v8704_v26, %v8704_v26 }
 0xdd8   :  { %4039 = vadd.xlane.f32.xlu1 %v4038_v57 }
 0xdd9   :  { %v4035_v53 = vsel %vm45_vm0, %v3991_v20, 0.0 }
 0xdda   :  { %4036 = vadd.xlane.f32.xlu0 %v4035_v53  ;;  %v8725_v53 = vld [vmem:[%s9062_s5 + $0x2] ss:$0 sm:$0xff] }
 0xe45   :  { %v3998_v7 = vpop.xlane.xlu1 %3997 }
 0xe46   :  { %v4042_v13 = vmul.f32 0.03125, %v3998_v7 }
 0xe47   :  { %v3995_v15 = vpop.xlane.xlu0 %3994 }
 0xe48   :  { %v4058_v34 = vadd.f32 1e-05, %v4042_v13  ;;  %v4041_v55 = vmul.f32 0.03125, %v3995_v15 }
 0xe49   :  { %v4004_v28 = vpop.xlane.xlu1 %4003 }
 0xe4a   :  { %6530 = vrsqrt.f32 %v4058_v34  ;;  %v4057_v18 = vadd.f32 1e-05, %v4041_v55  ;;  %v4044_v22 = vmul.f32 0.03125, %v4004_v28 }
 0xe4b   :  { %v4001_v58 = vpop.xlane.xlu0 %4000 }
 0xe4c   :  { %6532 = vrsqrt.f32 %v4057_v18  ;;  %v4060_v17 = vadd.f32 1e-05, %v4044_v22  ;;  %v4043_v47 = vmul.f32 0.03125, %v4001_v58 }
 0xe4d   :  { %v4010_v48 = vpop.xlane.xlu1 %4009 }
 0xe4e   :  { %6534 = vrsqrt.f32 %v4060_v17  ;;  %v4059_v5 = vadd.f32 1e-05, %v4043_v47  ;;  %v4046_v44 = vmul.f32 0.03125, %v4010_v48 }
 0xe4f   :  { %v4007_v23 = vpop.xlane.xlu0 %4006 }
 0xe50   :  { %6536 = vrsqrt.f32 %v4059_v5  ;;  %v4062_v11 = vadd.f32 1e-05, %v4046_v44  ;;  %v4045_v61 = vmul.f32 0.03125, %v4007_v23 }
 0xe51   :  { %v4016_v25 = vpop.xlane.xlu1 %4015 }
 0xe52   :  { %6538 = vrsqrt.f32 %v4062_v11  ;;  %v4061_v39 = vadd.f32 1e-05, %v4045_v61  ;;  %v4048_v31 = vmul.f32 0.03125, %v4016_v25 }
 0xe53   :  { %v4013_v21 = vpop.xlane.xlu0 %4012 }
 0xe54   :  { %6540 = vrsqrt.f32 %v4061_v39  ;;  %v4064_v4 = vadd.f32 1e-05, %v4048_v31  ;;  %v4047_v38 = vmul.f32 0.03125, %v4013_v21 }
 0xe55   :  { %v4022_v9 = vpop.xlane.xlu1 %4021 }
 0xe56   :  { %6542 = vrsqrt.f32 %v4064_v4  ;;  %v4063_v41 = vadd.f32 1e-05, %v4047_v38  ;;  %v4050_v3 = vmul.f32 0.03125, %v4022_v9 }
 0xe57   :  { %v6531_v57 = vpop.eup %6530  ;;  %v4019_v20 = vpop.xlane.xlu0 %4018 }
 0xe58   :  { %v4090_v50 = vmul.f32 %v6531_v57, %v8618_v10  ;;  %6544 = vrsqrt.f32 %v4063_v41  ;;  %v4066_v42 = vadd.f32 1e-05, %v4050_v3  ;;  %v4049_v59 = vmul.f32 0.03125, %v4019_v20  ;;  %v8733_v10 = vld [vmem:[%s9062_s5 + $0x3] ss:$0 sm:$0xff] }
 0xe59   :  { %v6533_v7 = vpop.eup %6532  ;;  %v4028_v13 = vpop.xlane.xlu1 %4027 }
 0xe5a   :  { %6546 = vrsqrt.f32 %v4066_v42  ;;  %v4065_v15 = vadd.f32 1e-05, %v4049_v59  ;;  %v4052_v34 = vmul.f32 0.03125, %v4028_v13  ;;  %v4110_v28 = vmul.f32 %v8725_v53, %v4090_v50 }
 0xe5b   :  { %v6535_v55 = vpop.eup %6534  ;;  %v4025_v18 = vpop.xlane.xlu0 %4024  ;;  %v4089_v22 = vmul.f32 %v6533_v7, %v8621_v54 }
 0xe5c   :  { %6548 = vrsqrt.f32 %v4065_v15  ;;  %v4068_v58 = vadd.f32 1e-05, %v4052_v34  ;;  %v4051_v17 = vmul.f32 0.03125, %v4025_v18  ;;  %v4092_v44 = vmul.f32 %v6535_v55, %v8626_v12 }
 0xe5d   :  { %v6537_v47 = vpop.eup %6536  ;;  %v4034_v48 = vpop.xlane.xlu1 %4033  ;;  %v4109_v5 = vmul.f32 %v8725_v53, %v4089_v22  ;;  %v4130_v31 = vadd.f32 %v8733_v10, %v4110_v28 }
 0xe5e   :  { %6550 = vrsqrt.f32 %v4068_v58  ;;  %v4067_v23 = vadd.f32 1e-05, %v4051_v17  ;;  %v4054_v11 = vmul.f32 0.03125, %v4034_v48  ;;  %v4091_v61 = vmul.f32 %v6537_v47, %v8632_v14 }
 0xe5f   :  { %v6539_v54 = vpop.eup %6538  ;;  %v4031_v25 = vpop.xlane.xlu0 %4030  ;;  %v4129_v39 = vadd.f32 %v8733_v10, %v4109_v5  ;;  %v4112_v21 = vmul.f32 %v8725_v53, %v4092_v44 }
 0xe60   :  { %6552 = vrsqrt.f32 %v4067_v23  ;;  %v4070_v4 = vadd.f32 1e-05, %v4054_v11  ;;  %v4053_v38 = vmul.f32 0.03125, %v4031_v25  ;;  %v4111_v9 = vmul.f32 %v8725_v53, %v4091_v61 }
 0xe61   :  { %v6541_v41 = vpop.eup %6540  ;;  %6119 = vmatprep.mubr.msk.f32.mxu1 %vm45_vm0, %v4129_v39  ;;  %v4040_v12 = vpop.xlane.xlu1 %4039  ;;  %v4094_v3 = vmul.f32 %v6539_v54, %v8638_v52  ;;  %v4132_v59 = vadd.f32 %v8733_v10, %v4112_v21 }
 0xe62   :  { %6554 = vrsqrt.f32 %v4070_v4  ;;  %v4069_v14 = vadd.f32 1e-05, %v4053_v38  ;;  %v4056_v57 = vmul.f32 0.03125, %v4040_v12  ;;  %6120 = vmatmul.mubr.msk.f32.vlgmr.msra.gmra.mxu1 %vm45_vm0, %v4130_v31  ;;  %v4131_v20 = vadd.f32 %v8733_v10, %v4111_v9 }
 0xe63   :  { %v6543_v50 = vpop.eup %6542  ;;  %v4037_v42 = vpop.xlane.xlu0 %4036  ;;  %v4093_v7 = vmul.f32 %v6541_v41, %v8644_v63  ;;  %v4114_v13 = vmul.f32 %v8725_v53, %v4094_v3 }
 0xe64   :  { %6556 = vrsqrt.f32 %v4069_v14  ;;  %v4072_v15 = vadd.f32 1e-05, %v4056_v57  ;;  %v4055_v34 = vmul.f32 0.03125, %v4037_v42  ;;  %6122 = vmatprep.mubr.msk.f32.mxu1 %vm45_vm0, %v4131_v20  ;;  %v4096_v52 = vmul.f32 %v6543_v50, %v8650_v45 }
 0xe65   :  { %v6545_v55 = vpop.eup %6544  ;;  %v4113_v28 = vmul.f32 %v8725_v53, %v4093_v7  ;;  %v4134_v17 = vadd.f32 %v8733_v10, %v4114_v13 }
 0xe66   :  { %6558 = vrsqrt.f32 %v4072_v15  ;;  %v4071_v18 = vadd.f32 1e-05, %v4055_v34  ;;  %6123 = vmatmul.mubr.msk.f32.gmra.mxu1 %vm45_vm0, %v4132_v59  ;;  %v4095_v22 = vmul.f32 %v6545_v55, %v8656_v37  ;;  %v4116_v48 = vmul.f32 %v8725_v53, %v4096_v52  ;;  %v4503_v15 = vld [vmem:[%s9065_s4 + $0x80] sm:$0xff]  ;;  %v4502_v34 = vld [vmem:[%s9065_s4 + $0x78] sm:$0xff]  ;;  %v4501_v52 = vld [vmem:[%s9065_s4 + $0x70] sm:$0xff] }
 0xe67   :  { %v6547_v58 = vpop.eup %6546  ;;  %v4133_v63 = vadd.f32 %v8733_v10, %v4113_v28  ;;  %v4500_v55 = vld [vmem:[%s9065_s4 + $0x68] sm:$0xff]  ;;  %v4499_v28 = vld [vmem:[%s9065_s4 + $0x60] sm:$0xff] }
 0xe68   :  { %6560 = vrsqrt.f32 %v4071_v18  ;;  %v4115_v47 = vmul.f32 %v8725_v53, %v4095_v22  ;;  %v4098_v45 = vmul.f32 %v6547_v58, %v8662_v33  ;;  %v4136_v11 = vadd.f32 %v8733_v10, %v4116_v48  ;;  %v4498_v18 = vld [vmem:[%s9065_s4 + $0x58] sm:$0xff]  ;;  %v4497_v22 = vld [vmem:[%s9065_s4 + $0x50] sm:$0xff]  ;;  %v4496_v58 = vld [vmem:[%s9065_s4 + $0x48] sm:$0xff] }
 0xe69   :  { %v6549_v5 = vpop.eup %6548  ;;  %6125 = vmatprep.mubr.msk.f32.mxu1 %vm45_vm0, %v4133_v63  ;;  %v4495_v63 = vld [vmem:[%s9065_s4 + $0x40] sm:$0xff]  ;;  %v4492_v48 = vld [vmem:[%s9065_s4 + $0x28] sm:$0xff] }
 0xe6a   :  { %6126 = vmatmul.mubr.msk.f32.gmra.mxu1 %vm45_vm0, %v4134_v17  ;;  %v4135_v44 = vadd.f32 %v8733_v10, %v4115_v47  ;;  %v4097_v37 = vmul.f32 %v6549_v5, %v8668_v43  ;;  %v4118_v54 = vmul.f32 %v8725_v53, %v4098_v45  ;;  %v4494_v17 = vld [vmem:[%s9065_s4 + $0x38] sm:$0xff]  ;;  %v4493_v47 = vld [vmem:[%s9065_s4 + $0x30] sm:$0xff]  ;;  %v4491_v45 = vld [vmem:[%s9065_s4 + $0x20] sm:$0xff] }
 0xe6b   :  { %v6551_v23 = vpop.eup %6550  ;;  %v8847_v5 = vld [vmem:[%s9063_s3 + $0x1] ss:$0 sm:$0xff] }
 0xe6c   :  { %6128 = vmatprep.mubr.msk.f32.mxu1 %vm45_vm0, %v4135_v44  ;;  %v4117_v61 = vmul.f32 %v8725_v53, %v4097_v37  ;;  %v4100_v33 = vmul.f32 %v6551_v23, %v8674_v35  ;;  %v4138_v43 = vadd.f32 %v8733_v10, %v4118_v54 }
 0xe6d   :  { %v6553_v25 = vpop.eup %6552 }
 0xe6e   :  { %6129 = vmatmul.mubr.msk.f32.gmra.mxu1 %vm45_vm0, %v4136_v11  ;;  %v4137_v39 = vadd.f32 %v8733_v10, %v4117_v61  ;;  %v4099_v31 = vmul.f32 %v6553_v25, %v8680_v46  ;;  %v4120_v38 = vmul.f32 %v8725_v53, %v4100_v33 }
 0xe6f   :  { %v6555_v21 = vpop.eup %6554 }
 0xe70   :  { %6131 = vmatprep.mubr.msk.f32.mxu1 %vm45_vm0, %v4137_v39  ;;  %v4119_v4 = vmul.f32 %v8725_v53, %v4099_v31  ;;  %v4102_v9 = vmul.f32 %v6555_v21, %v8686_v30  ;;  %v4140_v46 = vadd.f32 %v8733_v10, %v4120_v38 }
 0xe71   :  { %v6557_v41 = vpop.eup %6556 }
 0xe72   :  { %6132 = vmatmul.mubr.msk.f32.gmra.mxu1 %vm45_vm0, %v4138_v43  ;;  %v4139_v35 = vadd.f32 %v8733_v10, %v4119_v4  ;;  %v4101_v12 = vmul.f32 %v6557_v41, %v8692_v40  ;;  %v4122_v57 = vmul.f32 %v8725_v53, %v4102_v9 }
 0xe73   :  { %v6559_v3 = vpop.eup %6558 }
 0xe74   :  { %6134 = vmatprep.mubr.msk.f32.mxu1 %vm45_vm0, %v4139_v35  ;;  %v4121_v14 = vmul.f32 %v8725_v53, %v4101_v12  ;;  %v4104_v20 = vmul.f32 %v6559_v3, %v8698_v2  ;;  %v4142_v40 = vadd.f32 %v8733_v10, %v4122_v57 }
 0xe75   :  { %v6561_v50 = vpop.eup %6560 }
 0xe76   :  { %6135 = vmatmul.mubr.msk.f32.gmra.mxu1 %vm45_vm0, %v4140_v46  ;;  %v4141_v30 = vadd.f32 %v8733_v10, %v4121_v14  ;;  %v4103_v42 = vmul.f32 %v6561_v50, %v8704_v26  ;;  %v4124_v7 = vmul.f32 %v8725_v53, %v4104_v20  ;;  %v4506_v26 = vld [vmem:[%s9065_s4 + $0x98] sm:$0xff] }
 0xe77   :  { %6143 = vmatprep.subr.mxu0 %v4506_v26  ;;  %6199 = vmatprep.subr.mxu1 %v4506_v26 }
 0xe78   :  { %6137 = vmatprep.mubr.msk.f32.mxu1 %vm45_vm0, %v4141_v30  ;;  %v4123_v59 = vmul.f32 %v8725_v53, %v4103_v42  ;;  %v4144_v2 = vadd.f32 %v8733_v10, %v4124_v7  ;;  %6144 = vmatpush3.msra.mxu0 %v4506_v26  ;;  %v4505_v53 = vld [vmem:[%s9065_s4 + $0x90] sm:$0xff] }
 0xe79   :  { %6215 = vmatpush3.msra.mxu1 %v4506_v26  ;;  %6145 = vmatprep.subr.mxu0 %v4505_v53 }
 0xe7a   :  { %6138 = vmatmul.mubr.msk.f32.gmra.mxu1 %vm45_vm0, %v4142_v40  ;;  %v4143_v13 = vadd.f32 %v8733_v10, %v4123_v59  ;;  %6200 = vmatprep.subr.mxu1 %v4505_v53  ;;  %v4504_v10 = vld [vmem:[%s9065_s4 + $0x88] sm:$0xff] }
 0xe7b   :  { %6146 = vmatpush3.msra.mxu0 %v4505_v53  ;;  %6216 = vmatpush3.msra.mxu1 %v4505_v53 }
 0xe7c   :  { %6140 = vmatprep.mubr.msk.f32.mxu1 %vm45_vm0, %v4143_v13  ;;  %6147 = vmatprep.subr.mxu0 %v4504_v10 }
 0xe7d   :  { %6201 = vmatprep.subr.mxu1 %v4504_v10  ;;  %6148 = vmatpush3.msra.mxu0 %v4504_v10 }
 0xe7e   :  { %6141 = vmatmul.mubr.msk.f32.gmra.mxu1 %vm45_vm0, %v4144_v2  ;;  %6149 = vmatprep.subr.mxu0 %v4503_v15 }
 0xe7f   :  { %6217 = vmatpush3.msra.mxu1 %v4504_v10  ;;  %6150 = vmatpush3.msra.mxu0 %v4503_v15 }
 0xe80   :  { %6202 = vmatprep.subr.mxu1 %v4503_v15  ;;  %6151 = vmatprep.subr.mxu0 %v4502_v34 }
 0xe81   :  { %6218 = vmatpush3.msra.mxu1 %v4503_v15  ;;  %6152 = vmatpush3.msra.mxu0 %v4502_v34 }
 0xe82   :  { %6203 = vmatprep.subr.mxu1 %v4502_v34  ;;  %6153 = vmatprep.subr.mxu0 %v4501_v52 }
 0xe83   :  { %6219 = vmatpush3.msra.mxu1 %v4502_v34  ;;  %6154 = vmatpush3.msra.mxu0 %v4501_v52 }
 0xe84   :  { %6204 = vmatprep.subr.mxu1 %v4501_v52  ;;  %6155 = vmatprep.subr.mxu0 %v4500_v55 }
 0xe85   :  { %6220 = vmatpush3.msra.mxu1 %v4501_v52  ;;  %6156 = vmatpush3.msra.mxu0 %v4500_v55 }
 0xe86   :  { %6205 = vmatprep.subr.mxu1 %v4500_v55  ;;  %6157 = vmatprep.subr.mxu0 %v4499_v28 }
 0xe87   :  { %6221 = vmatpush3.msra.mxu1 %v4500_v55  ;;  %6158 = vmatpush3.msra.mxu0 %v4499_v28 }
 0xe88   :  { %6206 = vmatprep.subr.mxu1 %v4499_v28  ;;  %6159 = vmatprep.subr.mxu0 %v4498_v18 }
 0xe89   :  { %6222 = vmatpush3.msra.mxu1 %v4499_v28  ;;  %6160 = vmatpush3.msra.mxu0 %v4498_v18 }
 0xe8a   :  { %6207 = vmatprep.subr.mxu1 %v4498_v18  ;;  %6161 = vmatprep.subr.mxu0 %v4497_v22 }
 0xe8b   :  { %6223 = vmatpush3.msra.mxu1 %v4498_v18  ;;  %6162 = vmatpush3.msra.mxu0 %v4497_v22 }
 0xe8c   :  { %6208 = vmatprep.subr.mxu1 %v4497_v22  ;;  %6163 = vmatprep.subr.mxu0 %v4496_v58 }
 0xe8d   :  { %6224 = vmatpush3.msra.mxu1 %v4497_v22  ;;  %6164 = vmatpush3.msra.mxu0 %v4496_v58 }
 0xe8e   :  { %6209 = vmatprep.subr.mxu1 %v4496_v58  ;;  %6165 = vmatprep.subr.mxu0 %v4495_v63 }
 0xe8f   :  { %6225 = vmatpush3.msra.mxu1 %v4496_v58  ;;  %6166 = vmatpush3.msra.mxu0 %v4495_v63 }
 0xe90   :  { %6210 = vmatprep.subr.mxu1 %v4495_v63  ;;  %6167 = vmatprep.subr.mxu0 %v4494_v17 }
 0xe91   :  { %6226 = vmatpush3.msra.mxu1 %v4495_v63  ;;  %6168 = vmatpush3.msra.mxu0 %v4494_v17 }
 0xe92   :  { %6211 = vmatprep.subr.mxu1 %v4494_v17  ;;  %6169 = vmatprep.subr.mxu0 %v4493_v47 }
 0xe93   :  { %6227 = vmatpush3.msra.mxu1 %v4494_v17  ;;  %6170 = vmatpush3.msra.mxu0 %v4493_v47 }
 0xe94   :  { %6212 = vmatprep.subr.mxu1 %v4493_v47  ;;  %6171 = vmatprep.subr.mxu0 %v4492_v48 }
 0xe95   :  { %6228 = vmatpush3.msra.mxu1 %v4493_v47  ;;  %6172 = vmatpush3.msra.mxu0 %v4492_v48 }
 0xe96   :  { %6213 = vmatprep.subr.mxu1 %v4492_v48  ;;  %6173 = vmatprep.subr.mxu0 %v4491_v45 }
 0xe97   :  { %6229 = vmatpush3.msra.mxu1 %v4492_v48  ;;  %6174 = vmatpush3.msra.mxu0 %v4491_v45 }
 0xe98   :  { %6214 = vmatprep.subr.mxu1 %v4491_v45 }
 0xe99   :  { %6230 = vmatpush3.msra.mxu1 %v4491_v45 }
 0xf22   :  { %v6121_v44 = vpop.f32.mrf.mxu1 }
 0xf23   :  { %v8850_v37 = vadd.f32 %v6121_v44, %v8847_v5 }
 0xf24   :  { %v4268_v23 = vpop.f32.mrf.mxu1 }
 0xf25   :  { %v4364_v11 = vmul.f32 0.044715, %v8850_v37  ;;  %v8854_v61 = vadd.f32 %v8847_v5, %v4268_v23 }
 0xf26   :  { %v6124_v54 = vpop.f32.mrf.mxu1 }
 0xf27   :  { %v4380_v33 = vmul.f32 %v4364_v11, %v8850_v37  ;;  %v4363_v25 = vmul.f32 0.044715, %v8854_v61  ;;  %v8859_v39 = vadd.f32 %v6124_v54, %v8847_v5 }
 0xf28   :  { %v4278_v31 = vpop.f32.mrf.mxu1 }
 0xf29   :  { %v4396_v21 = vmul.f32 %v4380_v33, %v8850_v37  ;;  %v4379_v43 = vmul.f32 %v4363_v25, %v8854_v61  ;;  %v4366_v4 = vmul.f32 0.044715, %v8859_v39  ;;  %v8865_v38 = vadd.f32 %v8847_v5, %v4278_v31 }
 0xf2a   :  { %v6127_v9 = vpop.f32.mrf.mxu1 }
 0xf2b   :  { %v4412_v41 = vadd.f32 %v4396_v21, %v8850_v37  ;;  %v4382_v35 = vmul.f32 %v4366_v4, %v8859_v39  ;;  %v4365_v12 = vmul.f32 0.044715, %v8865_v38  ;;  %v8871_v3 = vadd.f32 %v6127_v9, %v8847_v5 }
 0xf2c   :  { %v4288_v46 = vpop.f32.mrf.mxu1  ;;  %v4395_v14 = vmul.f32 %v4379_v43, %v8854_v61 }
 0xf2d   :  { %v4428_v57 = vmul.f32 0.7978846, %v4412_v41  ;;  %v4398_v20 = vmul.f32 %v4382_v35, %v8859_v39  ;;  %v4381_v50 = vmul.f32 %v4365_v12, %v8865_v38  ;;  %v4368_v30 = vmul.f32 0.044715, %v8871_v3 }
 0xf2e   :  { %v8878_v42 = vadd.f32 %v8847_v5, %v4288_v46  ;;  %v6130_v40 = vpop.f32.mrf.mxu1  ;;  %v4411_v59 = vadd.f32 %v4395_v14, %v8854_v61 }
 0xf2f   :  { %6562 = vtanh.f32 %v4428_v57  ;;  %v4414_v7 = vadd.f32 %v4398_v20, %v8859_v39  ;;  %v4384_v13 = vmul.f32 %v4368_v30, %v8871_v3  ;;  %v8884_v2 = vadd.f32 %v6130_v40, %v8847_v5 }
 0xf30   :  { %v4367_v26 = vmul.f32 0.044715, %v8878_v42  ;;  %v4298_v53 = vpop.f32.mrf.mxu1  ;;  %v4427_v10 = vmul.f32 0.7978846, %v4411_v59  ;;  %v4397_v15 = vmul.f32 %v4381_v50, %v8865_v38 }
 0xf31   :  { %v4400_v34 = vmul.f32 %v4384_v13, %v8871_v3  ;;  %v4370_v52 = vmul.f32 0.044715, %v8884_v2  ;;  %v8891_v55 = vadd.f32 %v8847_v5, %v4298_v53  ;;  %v4430_v28 = vmul.f32 0.7978846, %v4414_v7 }
 0xf32   :  { %v4383_v18 = vmul.f32 %v4367_v26, %v8878_v42  ;;  %v6133_v22 = vpop.f32.mrf.mxu1  ;;  %6564 = vtanh.f32 %v4427_v10  ;;  %v4413_v58 = vadd.f32 %v4397_v15, %v8865_v38 }
 0xf33   :  { %v4416_v63 = vadd.f32 %v4400_v34, %v8871_v3  ;;  %v4386_v17 = vmul.f32 %v4370_v52, %v8884_v2  ;;  %v4369_v47 = vmul.f32 0.044715, %v8891_v55  ;;  %v8899_v48 = vadd.f32 %v6133_v22, %v8847_v5 }
 0xf34   :  { %v4308_v45 = vpop.f32.mrf.mxu1  ;;  %v4429_v44 = vmul.f32 0.7978846, %v4413_v58  ;;  %6566 = vtanh.f32 %v4430_v28  ;;  %v4399_v23 = vmul.f32 %v4383_v18, %v8878_v42  ;;  %v4348_v34 = vmul.f32 0.5, %v8850_v37 }
 0xf35   :  { %v4402_v11 = vmul.f32 %v4386_v17, %v8884_v2  ;;  %v4385_v54 = vmul.f32 %v4369_v47, %v8891_v55  ;;  %v4372_v33 = vmul.f32 0.044715, %v8899_v48  ;;  %v8906_v25 = vadd.f32 %v8847_v5, %v4308_v45 }
 0xf36   :  { %v6136_v31 = vpop.f32.mrf.mxu1  ;;  %6568 = vtanh.f32 %v4429_v44  ;;  %v4415_v21 = vadd.f32 %v4399_v23, %v8878_v42  ;;  %v4432_v43 = vmul.f32 0.7978846, %v4416_v63  ;;  %v4347_v17 = vmul.f32 0.5, %v8854_v61 }
 0xf37   :  { %v4418_v4 = vadd.f32 %v4402_v11, %v8884_v2  ;;  %v4388_v9 = vmul.f32 %v4372_v33, %v8899_v48  ;;  %v4371_v41 = vmul.f32 0.044715, %v8906_v25  ;;  %v8913_v35 = vadd.f32 %v6136_v31, %v8847_v5 }
 0xf38   :  { %v4318_v12 = vpop.f32.mrf.mxu1  ;;  %v4431_v46 = vmul.f32 0.7978846, %v4415_v21  ;;  %6570 = vtanh.f32 %v4432_v43  ;;  %v4401_v14 = vmul.f32 %v4385_v54, %v8891_v55 }
 0xf39   :  { %v4404_v57 = vmul.f32 %v4388_v9, %v8899_v48  ;;  %v4387_v20 = vmul.f32 %v4371_v41, %v8906_v25  ;;  %v4374_v50 = vmul.f32 0.044715, %v8913_v35  ;;  %v8920_v30 = vadd.f32 %v8847_v5, %v4318_v12 }
 0xf3a   :  { %v6139_v40 = vpop.f32.mrf.mxu1  ;;  %6572 = vtanh.f32 %v4431_v46  ;;  %v4417_v59 = vadd.f32 %v4401_v14, %v8891_v55  ;;  %v4434_v7 = vmul.f32 0.7978846, %v4418_v4 }
 0xf3b   :  { %v4420_v13 = vadd.f32 %v4404_v57, %v8899_v48  ;;  %v4390_v26 = vmul.f32 %v4374_v50, %v8913_v35  ;;  %v4373_v53 = vmul.f32 0.044715, %v8920_v30  ;;  %v8927_v10 = vadd.f32 %v6139_v40, %v8847_v5 }
 0xf3c   :  { %v6563_v15 = vpop.eup %6562  ;;  %v4328_v52 = vpop.f32.mrf.mxu1  ;;  %v4433_v28 = vmul.f32 0.7978846, %v4417_v59  ;;  %6574 = vtanh.f32 %v4434_v7  ;;  %v4403_v18 = vmul.f32 %v4387_v20, %v8906_v25 }
 0xf3d   :  { %v4460_v22 = vadd.f32 1.0, %v6563_v15  ;;  %v4406_v58 = vmul.f32 %v4390_v26, %v8913_v35  ;;  %v4376_v63 = vmul.f32 0.044715, %v8927_v10  ;;  %v8935_v47 = vadd.f32 %v8847_v5, %v4328_v52 }
 0xf3e   :  { %v6142_v45 = vpop.f32.mrf.mxu1  ;;  %6576 = vtanh.f32 %v4433_v28  ;;  %v4419_v44 = vadd.f32 %v4403_v18, %v8906_v25  ;;  %v4436_v37 = vmul.f32 0.7978846, %v4420_v13  ;;  %v4389_v54 = vmul.f32 %v4373_v53, %v8920_v30 }
 0xf3f   :  { %v6565_v23 = vpop.eup %6564  ;;  %v4422_v11 = vadd.f32 %v4406_v58, %v8913_v35  ;;  %v4392_v33 = vmul.f32 %v4376_v63, %v8927_v10  ;;  %v8942_v31 = vadd.f32 %v6142_v45, %v8847_v5  ;;  %v4375_v61 = vmul.f32 0.044715, %v8935_v47 }
 0xf40   :  { %v4338_v21 = vpop.f32.mrf.mxu1  ;;  %v4459_v43 = vadd.f32 1.0, %v6565_v23  ;;  %v4435_v4 = vmul.f32 0.7978846, %v4419_v44  ;;  %6578 = vtanh.f32 %v4436_v37  ;;  %v4476_v41 = vmul.f32 %v4460_v22, %v4348_v34 }
 0xf41   :  { %v6567_v9 = vpop.eup %6566  ;;  %v4408_v12 = vmul.f32 %v4392_v33, %v8927_v10  ;;  %v4378_v46 = vmul.f32 0.044715, %v8942_v31  ;;  %v8948_v14 = vadd.f32 %v8847_v5, %v4338_v21  ;;  %v4391_v57 = vmul.f32 %v4375_v61, %v8935_v47 }
 0xf42   :  { %v4475_v20 = vmul.f32 %v4459_v43, %v4347_v17  ;;  %v4462_v50 = vadd.f32 1.0, %v6567_v9  ;;  %6580 = vtanh.f32 %v4435_v4  ;;  %v4405_v26 = vmul.f32 %v4389_v54, %v8920_v30 }
 0xf43   :  { %v6569_v40 = vpop.eup %6568  ;;  %v4424_v59 = vadd.f32 %v4408_v12, %v8927_v10  ;;  %v4394_v7 = vmul.f32 %v4378_v46, %v8942_v31  ;;  %v4377_v13 = vmul.f32 0.044715, %v8948_v14  ;;  %v4349_v53 = vmul.f32 0.5, %v8865_v38 }
 0xf44   :  { %6175 = vmatprep.mubr.f32.mxu0 %v4475_v20  ;;  %v4461_v15 = vadd.f32 1.0, %v6569_v40  ;;  %v4350_v5 = vmul.f32 0.5, %v8859_v39  ;;  %v4438_v34 = vmul.f32 0.7978846, %v4422_v11  ;;  %v4421_v22 = vadd.f32 %v4405_v26, %v8920_v30 }
 0xf45   :  { %v6571_v52 = vpop.eup %6570  ;;  %v4410_v28 = vmul.f32 %v4394_v7, %v8942_v31  ;;  %v4393_v18 = vmul.f32 %v4377_v13, %v8948_v14  ;;  %6176 = vmatmul.mubr.f32.vlgmr.msra.gmra.mxu0 %v4476_v41  ;;  %v4407_v58 = vmul.f32 %v4391_v57, %v8935_v47  ;;  %v4440_v23 = vmul.f32 0.7978846, %v4424_v59 }
 0xf46   :  { %v4477_v63 = vmul.f32 %v4461_v15, %v4349_v53  ;;  %v4478_v17 = vmul.f32 %v4462_v50, %v4350_v5  ;;  %v4464_v45 = vadd.f32 1.0, %v6571_v52  ;;  %6582 = vtanh.f32 %v4438_v34 }
 0xf47   :  { %v6573_v44 = vpop.eup %6572  ;;  %v4426_v38 = vadd.f32 %v4410_v28, %v8942_v31  ;;  %v4437_v37 = vmul.f32 0.7978846, %v4421_v22  ;;  %v4423_v39 = vadd.f32 %v4407_v58, %v8935_v47  ;;  %v4351_v11 = vmul.f32 0.5, %v8878_v42 }
 0xf48   :  { %6178 = vmatprep.mubr.f32.mxu0 %v4477_v63  ;;  %v4463_v54 = vadd.f32 1.0, %v6573_v44  ;;  %v4409_v33 = vmul.f32 %v4393_v18, %v8948_v14  ;;  %v4352_v43 = vmul.f32 0.5, %v8871_v3  ;;  %v4353_v42 = vmul.f32 0.5, %v8891_v55 }
 0xf49   :  { %v6575_v61 = vpop.eup %6574  ;;  %v4442_v21 = vmul.f32 0.7978846, %v4426_v38  ;;  %6179 = vmatmul.mubr.f32.gmra.mxu0 %v4478_v17  ;;  %6584 = vtanh.f32 %v4437_v37  ;;  %v4439_v4 = vmul.f32 0.7978846, %v4423_v39  ;;  %v4354_v3 = vmul.f32 0.5, %v8884_v2 }
 0xf4a   :  { %v4479_v9 = vmul.f32 %v4463_v54, %v4351_v11  ;;  %6586 = vtanh.f32 %v4440_v23  ;;  %v4425_v41 = vadd.f32 %v4409_v33, %v8948_v14  ;;  %v4480_v46 = vmul.f32 %v4464_v45, %v4352_v43 }
 0xf4b   :  { %v6577_v12 = vpop.eup %6576  ;;  %6588 = vtanh.f32 %v4442_v21  ;;  %v4466_v57 = vadd.f32 1.0, %v6575_v61  ;;  %v4355_v53 = vmul.f32 0.5, %v8906_v25  ;;  %v4356_v5 = vmul.f32 0.5, %v8899_v48 }
 0xf4c   :  { %6181 = vmatprep.mubr.f32.mxu0 %v4479_v9  ;;  %v4465_v20 = vadd.f32 1.0, %v6577_v12  ;;  %6590 = vtanh.f32 %v4439_v4  ;;  %v4441_v50 = vmul.f32 0.7978846, %v4425_v41  ;;  %v4357_v22 = vmul.f32 0.5, %v8920_v30 }
 0xf4d   :  { %v6579_v40 = vpop.eup %6578  ;;  %6182 = vmatmul.mubr.f32.gmra.mxu0 %v4480_v46  ;;  %v4482_v13 = vmul.f32 %v4466_v57, %v4354_v3  ;;  %v4358_v17 = vmul.f32 0.5, %v8913_v35  ;;  %v4359_v38 = vmul.f32 0.5, %v8935_v47  ;;  %v4360_v54 = vmul.f32 0.5, %v8927_v10  ;;  %v4971_v47 = vld [vmem:[%s9062_s5 + $0x5] ss:$0 sm:$0xff] }
 0xf4e   :  { %v4481_v59 = vmul.f32 %v4465_v20, %v4353_v42  ;;  %6592 = vtanh.f32 %v4441_v50  ;;  %v4468_v26 = vadd.f32 1.0, %v6579_v40  ;;  %v4361_v30 = vmul.f32 0.5, %v8948_v14 }
 0xf4f   :  { %v6581_v7 = vpop.eup %6580  ;;  %v4362_v61 = vmul.f32 0.5, %v8942_v31 }
 0xf50   :  { %6184 = vmatprep.mubr.f32.mxu0 %v4481_v59  ;;  %v4467_v15 = vadd.f32 1.0, %v6581_v7  ;;  %v4484_v52 = vmul.f32 %v4468_v26, %v4356_v5 }
 0xf51   :  { %6185 = vmatmul.mubr.f32.gmra.mxu0 %v4482_v13 }
 0xf52   :  { %v4483_v55 = vmul.f32 %v4467_v15, %v4355_v53 }
 0xf53   :  { %v6583_v34 = vpop.eup %6582 }
 0xf54   :  { %6187 = vmatprep.mubr.f32.mxu0 %v4483_v55  ;;  %v4470_v18 = vadd.f32 1.0, %v6583_v34 }
 0xf55   :  { %6188 = vmatmul.mubr.f32.gmra.mxu0 %v4484_v52 }
 0xf56   :  { %v6585_v28 = vpop.eup %6584  ;;  %v4486_v44 = vmul.f32 %v4470_v18, %v4358_v17 }
 0xf57   :  { %v6587_v2 = vpop.eup %6586  ;;  %v4469_v58 = vadd.f32 1.0, %v6585_v28 }
 0xf58   :  { %v6589_v63 = vpop.eup %6588  ;;  %v4472_v37 = vadd.f32 1.0, %v6587_v2 }
 0xf59   :  { %v6591_v45 = vpop.eup %6590  ;;  %v4485_v25 = vmul.f32 %v4469_v58, %v4357_v22  ;;  %v4474_v23 = vadd.f32 1.0, %v6589_v63 }
 0xf5a   :  { %v4471_v48 = vadd.f32 1.0, %v6591_v45  ;;  %v4488_v35 = vmul.f32 %v4472_v37, %v4360_v54 }
 0xf5b   :  { %v6593_v39 = vpop.eup %6592  ;;  %6190 = vmatprep.mubr.f32.mxu0 %v4485_v25  ;;  %v4490_v43 = vmul.f32 %v4474_v23, %v4362_v61 }
 0xf5c   :  { %6191 = vmatmul.mubr.f32.gmra.mxu0 %v4486_v44  ;;  %v4487_v11 = vmul.f32 %v4471_v48, %v4359_v38  ;;  %v4473_v33 = vadd.f32 1.0, %v6593_v39 }
 0xf5e   :  { %6193 = vmatprep.mubr.f32.mxu0 %v4487_v11  ;;  %v4489_v21 = vmul.f32 %v4473_v33, %v4361_v30 }
 0xf60   :  { %6194 = vmatmul.mubr.f32.gmra.mxu0 %v4488_v35  ;;  %6196 = vmatprep.mubr.f32.mxu1 %v4489_v21 }
 0xf61   :  { %6197 = vmatmul.mubr.f32.vlgmr.msra.gmra.mxu1 %v4490_v43 }
0x1005   :  { %v6177_v4 = vpop.f32.mrf.mxu0 }
0x1006   :  { %v4583_v9 = vadd.f32 %v6177_v4, %v4971_v47 }
0x1007   :  { %v4577_v41 = vpop.f32.mrf.mxu0 }
0x1008   :  { %v4657_v10 = vadd.f32 %v4583_v9, %v8476_v0  ;;  %v4578_v14 = vadd.f32 %v4971_v47, %v4577_v41 }
0x1009   :  { %v6180_v12 = vpop.f32.mrf.mxu0 }
0x100a   :  { %4673 = vst.msk [vmem:[%s9066_s6 + $0x8] sm:$0xff] %vm45_vm0, %v4657_v10  ;;  %v4656_v31 = vadd.f32 %v4578_v14, %v8483_v49  ;;  %v4593_v46 = vadd.f32 %v6180_v12, %v4971_v47 }
0x100b   :  { %v4587_v57 = vpop.f32.mrf.mxu0 }
0x100c   :  { %4672 = vst.msk [vmem:[%s9066_s6] sm:$0xff] %vm45_vm0, %v4656_v31  ;;  %v4659_v42 = vadd.f32 %v4593_v46, %v8492_v32  ;;  %v4588_v20 = vadd.f32 %v4971_v47, %v4587_v57 }
0x100d   :  { %v6183_v0 = vpop.f32.mrf.mxu0 }
0x100e   :  { %4675 = vst.msk [vmem:[%s9066_s6 + $0x18] sm:$0xff] %vm45_vm0, %v4659_v42  ;;  %v4658_v50 = vadd.f32 %v4588_v20, %v8501_v27  ;;  %v4603_v40 = vadd.f32 %v6183_v0, %v4971_v47 }
0x100f   :  { %v4597_v49 = vpop.f32.mrf.mxu0 }
0x1010   :  { %4674 = vst.msk [vmem:[%s9066_s6 + $0x10] sm:$0xff] %vm45_vm0, %v4658_v50  ;;  %v4661_v3 = vadd.f32 %v4603_v40, %v8510_v6  ;;  %v4598_v59 = vadd.f32 %v4971_v47, %v4597_v49 }
0x1011   :  { %v6186_v32 = vpop.f32.mrf.mxu0 }
0x1012   :  { %4677 = vst.msk [vmem:[%s9066_s6 + $0x28] sm:$0xff] %vm45_vm0, %v4661_v3  ;;  %v4660_v7 = vadd.f32 %v4598_v59, %v8519_v29  ;;  %v4613_v13 = vadd.f32 %v6186_v32, %v4971_v47 }
0x1013   :  { %v4607_v27 = vpop.f32.mrf.mxu0 }
0x1014   :  { %4676 = vst.msk [vmem:[%s9066_s6 + $0x20] sm:$0xff] %vm45_vm0, %v4660_v7  ;;  %v4663_v26 = vadd.f32 %v4613_v13, %v8528_v62  ;;  %v4608_v53 = vadd.f32 %v4971_v47, %v4607_v27 }
0x1015   :  { %v6189_v6 = vpop.f32.mrf.mxu0 }
0x1016   :  { %4679 = vst.msk [vmem:[%s9066_s6 + $0x38] sm:$0xff] %vm45_vm0, %v4663_v26  ;;  %v4662_v15 = vadd.f32 %v4608_v53, %v8537_v60  ;;  %v4623_v5 = vadd.f32 %v6189_v6, %v4971_v47 }
0x1017   :  { %v4617_v29 = vpop.f32.mrf.mxu0 }
0x1018   :  { %4678 = vst.msk [vmem:[%s9066_s6 + $0x30] sm:$0xff] %vm45_vm0, %v4662_v15  ;;  %v4665_v55 = vadd.f32 %v4623_v5, %v8546_v51  ;;  %v4618_v34 = vadd.f32 %v4971_v47, %v4617_v29 }
0x101a   :  { %4681 = vst.msk [vmem:[%s9066_s6 + $0x48] sm:$0xff] %vm45_vm0, %v4665_v55  ;;  %v4664_v62 = vadd.f32 %v4618_v34, %v8555_v19 }
0x101c   :  { %4680 = vst.msk [vmem:[%s9066_s6 + $0x40] sm:$0xff] %vm45_vm0, %v4664_v62  ;;  %v6192_v60 = vpop.f32.mrf.mxu0 }
0x101d   :  { %v4633_v52 = vadd.f32 %v6192_v60, %v4971_v47 }
0x101e   :  { %v4627_v28 = vpop.f32.mrf.mxu0 }
0x101f   :  { %v4667_v18 = vadd.f32 %v4633_v52, %v8564_v16  ;;  %v4628_v2 = vadd.f32 %v4971_v47, %v4627_v28 }
0x1020   :  { %v6195_v51 = vpop.f32.mrf.mxu0 }
0x1021   :  { %4683 = vst.msk [vmem:[%s9066_s6 + $0x58] sm:$0xff] %vm45_vm0, %v4667_v18  ;;  %v4666_v22 = vadd.f32 %v4628_v2, %v8573_v36  ;;  %v4643_v19 = vadd.f32 %v6195_v51, %v4971_v47  ;;  %v6198_v58 = vpop.f32.mrf.mxu1 }
0x1022   :  { %v4637_v63 = vpop.f32.mrf.mxu0  ;;  %v4653_v17 = vadd.f32 %v6198_v58, %v4971_v47 }
0x1023   :  { %4682 = vst.msk [vmem:[%s9066_s6 + $0x50] sm:$0xff] %vm45_vm0, %v4666_v22  ;;  %v4669_v16 = vadd.f32 %v4643_v19, %v8582_v8  ;;  %v4638_v45 = vadd.f32 %v4971_v47, %v4637_v63  ;;  %v4647_v25 = vpop.f32.mrf.mxu1 }
0x1024   :  { %v4671_v44 = vadd.f32 %v4653_v17, %v8600_v56  ;;  %v4648_v38 = vadd.f32 %v4971_v47, %v4647_v25 }
0x1025   :  { %4685 = vst.msk [vmem:[%s9066_s6 + $0x68] sm:$0xff] %vm45_vm0, %v4669_v16  ;;  %v4668_v36 = vadd.f32 %v4638_v45, %v8591_v24 }
0x1026   :  { %4687 = vst.msk [vmem:[%s9066_s6 + $0x78] sm:$0xff] %vm45_vm0, %v4671_v44  ;;  %v4670_v48 = vadd.f32 %v4648_v38, %v8608_v1 }
0x1027   :  { %4684 = vst.msk [vmem:[%s9066_s6 + $0x60] sm:$0xff] %vm45_vm0, %v4668_v36 }
0x1028   :  { %4686 = vst.msk [vmem:[%s9066_s6 + $0x70] sm:$0xff] %vm45_vm0, %v4670_v48 }

</bundles_post_ra>
